<compile_context>
chip_gen: v6e
topology: v6e:2x2x1
jax: 0.10.0
libtpu: 0.0.40
codegen_flags: <defaults>
</compile_context>

<pallas_src>
import functools

import numpy as np
import jax
import jax.numpy as jnp
from jax.experimental import pallas as pl
from jax.experimental.pallas import tpu as pltpu


_CONV_SPECS = [(4, 2, 1), (4, 2, 1), (4, 2, 1), (4, 1, 0)]   # (kernel, stride, pad)
_BN_EPS = 1e-5


# ----------------------------- Pallas kernel ------------------------------- #

def _fused_patch_net_kernel(p1_ref, w1_ref, g2_ref, g3_ref, g4_ref,
                            s1_ref, s2_ref, s3_ref, s4_ref,
                            o_ref, a1_ref):
    """Whole patch_net forward: 4x (conv + BN(eval) + ReLU) + mean over patches.

    p1_ref : (L, K1, M1) bf16  layer-1 im2col patches (per patch, transposed)
    w1_ref : (C, K1)     bf16  layer-1 weights, BN scale folded in
    g2_ref : (C, M1, N2) bf16  layer-2 banded weights, per input channel
    g3_ref : (C*M2, N3)  bf16  layer-3 banded weights (input channel-major rows)
    g4_ref : (C*M3, N4)  bf16  layer-4 banded weights
    s*_ref :             f32   per-layer additive shifts (conv bias + BN folded)
    o_ref  : (1, N4)     f32   mean over the L patches of the final ReLU output
    a1_ref : (L, C, M1)  f32   VMEM scratch for the layer-1 activations
    """
    L, C, _ = a1_ref.shape
    w1 = w1_ref[...]
    s1 = s1_ref[...]

    # ---- layer 1: conv-as-GEMM on host-built im2col patches (one per patch l)
    for l in range(L):
        y = jnp.dot(w1, p1_ref[l], preferred_element_type=jnp.float32)  # (C, M1)
        a1_ref[l] = jnp.maximum(y + s1, 0.0)          # tile-aligned (C, M1) store

    # ---- layer 2: banded-weight GEMMs, accumulated over the input channel ---
    acc = jnp.zeros((L, g2_ref.shape[2]), jnp.float32)
    for ci in range(C):
        lhs = a1_ref[:, ci, :].astype(jnp.bfloat16)   # (L, M1)
        acc = acc + jnp.dot(lhs, g2_ref[ci], preferred_element_type=jnp.float32)
    y2 = jnp.maximum(acc + s2_ref[...], 0.0).astype(jnp.bfloat16)        # (L, C*M2)

    # ---- layer 3: one banded GEMM (y2 columns are already (ci, h, w)-major) --
    y3 = jnp.dot(y2, g3_ref[...], preferred_element_type=jnp.float32)
    y3 = jnp.maximum(y3 + s3_ref[...], 0.0).astype(jnp.bfloat16)         # (L, C*M3)

    # ---- layer 4 + fused mean over the L patches (torch.mean(dim=0)) --------
    y4 = jnp.dot(y3, g4_ref[...], preferred_element_type=jnp.float32)
    y4 = jnp.maximum(y4 + s4_ref[...], 0.0)                              # (L, N4)
    o_ref[...] = jnp.mean(y4, axis=0, keepdims=True)


def _full_spec(shape):
    nd = len(shape)
    return pl.BlockSpec(shape, lambda i, _nd=nd: (0,) * _nd)


def fused_patch_net(p1t, w1s, g2, g3, g4, s1, s2, s3, s4):
    L, _, M1 = p1t.shape
    C = w1s.shape[0]
    N4 = g4.shape[1]
    operands = (p1t, w1s, g2, g3, g4, s1, s2, s3, s4)
    return pl.pallas_call(
        _fused_patch_net_kernel,
        out_shape=jax.ShapeDtypeStruct((1, N4), jnp.float32),
        grid=(1,),
        in_specs=[_full_spec(a.shape) for a in operands],
        out_specs=_full_spec((1, N4)),
        scratch_shapes=[pltpu.VMEM((L, C, M1), jnp.float32)],
        compiler_params=pltpu.CompilerParams(
            dimension_semantics=("arbitrary",)),
    )(*operands)


# ------------------------------- JAX glue ---------------------------------- #

def _im2col(x, k, stride, pad):
    """x: (L, C, H, W) -> patches (L, Ho*Wo, C*k*k), column order (c, kh, kw)."""
    L, C, H, W = x.shape
    xp = jnp.pad(x, ((0, 0), (0, 0), (pad, pad), (pad, pad)))
    Ho = (H + 2 * pad - k) // stride + 1
    Wo = (W + 2 * pad - k) // stride + 1
    cols = []
    for di in range(k):
        for dj in range(k):
            sl = xp[:, :,
                    di:di + stride * (Ho - 1) + 1:stride,
                    dj:dj + stride * (Wo - 1) + 1:stride]   # (L, C, Ho, Wo)
            cols.append(sl)
    patches = jnp.stack(cols, axis=-1).reshape(L, C, Ho, Wo, k, k)
    patches = patches.transpose(0, 2, 3, 1, 4, 5)            # (L, Ho, Wo, C, kh, kw)
    return patches.reshape(L, Ho * Wo, C * k * k), Ho, Wo


def init_params(C, key):
    """Deterministic synthetic parameters for the 4 Conv2d+BN blocks (eval BN)."""
    params = []
    for idx, (k, _, _) in enumerate(_CONV_SPECS):
        key, kw_, kb_ = jax.random.split(key, 3)
        fan_in = C * k * k
        bound = 1.0 / float(np.sqrt(fan_in))
        w = jax.random.uniform(kw_, (C, C, k, k), jnp.float32, -bound, bound)
        b = jax.random.uniform(kb_, (C,), jnp.float32, -bound, bound)
        gamma = 1.0 + 0.05 * jnp.arange(C, dtype=jnp.float32)
        beta = 0.01 * jnp.arange(C, dtype=jnp.float32)
        run_mean = 0.02 * jnp.arange(C, dtype=jnp.float32) * ((-1.0) ** idx)
        run_var = jnp.ones((C,), jnp.float32)
        params.append(dict(w=w, b=b, gamma=gamma, beta=beta,
                           mean=run_mean, var=run_var))
    return params


def _tap_selector(Hi, Wi, k, s, p):
    """T[hi*Wi+wi, kh*k+kw, ho*Wo+wo] = 1 iff that conv tap reads that input."""
    Ho = (Hi + 2 * p - k) // s + 1
    Wo = (Wi + 2 * p - k) // s + 1
    T = np.zeros((Hi * Wi, k * k, Ho * Wo), np.float32)
    for ho in range(Ho):
        for wo in range(Wo):
            for kh in range(k):
                for kw in range(k):
                    hi = s * ho - p + kh
                    wi = s * wo - p + kw
                    if 0 <= hi < Hi and 0 <= wi < Wi:
                        T[hi * Wi + wi, kh * k + kw, ho * Wo + wo] = 1.0
    return T, Ho, Wo


def prepare_net(params, k_size):
    """Fold BN(eval) into weights/shifts and build the banded GEMM operands."""
    C = params[0]["w"].shape[0]

    def fold(prm):
        sc = prm["gamma"] / jnp.sqrt(prm["var"] + _BN_EPS)
        sh = (prm["b"] - prm["mean"]) * sc + prm["beta"]
        return sc, sh

    # layer 1: plain conv-as-GEMM weights (BN scale folded into the rows)
    sc, sh = fold(params[0])
    w1s = (params[0]["w"].reshape(C, -1) * sc[:, None]).astype(jnp.bfloat16)
    s1 = sh.reshape(C, 1).astype(jnp.float32)

    # layers 2..4: banded weight matrices G[ci, (hi,wi), (co,ho,wo)]
    k0, s0, p0 = _CONV_SPECS[0]
    Hi = (k_size + 2 * p0 - k0) // s0 + 1        # spatial size entering layer 2
    gs, shs = [], []
    for li in range(1, len(_CONV_SPECS)):
        k, s, p = _CONV_SPECS[li]
        T, Ho, Wo = _tap_selector(Hi, Hi, k, s, p)
        sc, sh = fold(params[li])
        wsc = params[li]["w"].reshape(C, C, k * k) * sc[:, None, None]   # (co, ci, t)
        G = jnp.einsum("mtn,oct->cmon", T, wsc)                           # (ci, m, co, n)
        G = G.reshape(C, Hi * Hi, C * Ho * Wo).astype(jnp.bfloat16)
        shf = jnp.repeat(sh, Ho * Wo).reshape(1, C * Ho * Wo).astype(jnp.float32)
        gs.append(G)
        shs.append(shf)
        Hi = Ho
    g2, g3, g4 = gs
    # layers 3/4 consume the full (ci, hi, wi)-major activation row: flatten ci
    g3 = g3.reshape(-1, g3.shape[-1])
    g4 = g4.reshape(-1, g4.shape[-1])
    return dict(w1s=w1s, s1=s1, g2=g2, g3=g3, g4=g4,
                s2=shs[0], s3=shs[1], s4=shs[2])


def patch_net_forward(diff_batch, net, P_portion, K_portion):
    B0, C0, H, W = diff_batch.shape
    C = P_portion ** 3
    assert B0 * C0 == C, "B*C of diff_batch must equal P_portion**3"

    # diff_batch.view(1, -1, H, W); F.unfold(k=k_size, stride=k_size);
    # permute + view  ->  (L, C, k_size, k_size)
    x = diff_batch.reshape(1, C, H, W)
    k_size = H // K_portion
    nH, nW = H // k_size, W // k_size
    x = x.reshape(C, nH, k_size, nW, k_size)
    x = x.transpose(1, 3, 0, 2, 4).reshape(nH * nW, C, k_size, k_size)

    # host-side im2col for layer 1 only, transposed to (L, K, M) for the MXU.
    k0, s0, p0 = _CONV_SPECS[0]
    patches, _, _ = _im2col(x, k0, s0, p0)                   # (L, Ho*Wo, C*k*k)
    p1t = patches.transpose(0, 2, 1).astype(jnp.bfloat16)    # (L, C*k*k, Ho*Wo)

    out = fused_patch_net(p1t, net["w1s"], net["g2"], net["g3"], net["g4"],
                          net["s1"], net["s2"], net["s3"], net["s4"])
    return out.reshape(-1)


# --------------------------------- main ------------------------------------ #

if __name__ == "__main__":
    P_portion, K_portion = 2, 2
    C = P_portion ** 3                      # 8 channels
    # Final conv (k=4, s=1, p=0) needs k_size/8 == 4  =>  k_size = 32, H = W = 64.
    H = W = 32 * K_portion

    key = jax.random.PRNGKey(0)
    key, kx = jax.random.split(key)
    # diff_batch: (2, 4, 64, 64); 2*4 == P_portion**3 as the module's view requires.
    diff_batch = jax.random.normal(kx, (2, 4, H, W), dtype=jnp.float32)

    params = init_params(C, key)
    net = prepare_net(params, k_size=H // K_portion)

    fwd = jax.jit(functools.partial(patch_net_forward,
                                    P_portion=P_portion, K_portion=K_portion))
    avg_vector = fwd(diff_batch, net)
    jax.block_until_ready(avg_vector)

    assert avg_vector.shape == (C,), avg_vector.shape
    assert bool(jnp.all(jnp.isfinite(avg_vector)))
    print("KERNEL_OK")
</pallas_src>

<mosaic_0001>
module attributes {stable_mosaic.version = 11 : i64} {
  func.func @_fused_patch_net_kernel(%arg0: i32, %arg1: memref<4x128x256xbf16, #tpu.memory_space<vmem>>, %arg2: memref<8x128xbf16, #tpu.memory_space<vmem>>, %arg3: memref<8x256x512xbf16, #tpu.memory_space<vmem>>, %arg4: memref<512x128xbf16, #tpu.memory_space<vmem>>, %arg5: memref<128x8xbf16, #tpu.memory_space<vmem>>, %arg6: memref<8x1xf32, #tpu.memory_space<vmem>>, %arg7: memref<1x512xf32, #tpu.memory_space<vmem>>, %arg8: memref<1x128xf32, #tpu.memory_space<vmem>>, %arg9: memref<1x8xf32, #tpu.memory_space<vmem>>, %arg10: memref<1x8xf32, #tpu.memory_space<vmem>>, %arg11: memref<4x8x256xf32, #tpu.memory_space<vmem>>) attributes {dimension_semantics = [#tpu.dimension_semantics<arbitrary>], iteration_bounds = array<i64: 1>, scalar_prefetch = 0 : i64, scratch_operands = 1 : i64, tpu.core_type = #tpu.core_type<tc>, window_params = [{pipeline_mode = #tpu.pipeline_mode<synchronous>, transform_indices = @transform_0, window_bounds = array<i64: 4, 128, 256>}, {pipeline_mode = #tpu.pipeline_mode<synchronous>, transform_indices = @transform_1, window_bounds = array<i64: 8, 128>}, {pipeline_mode = #tpu.pipeline_mode<synchronous>, transform_indices = @transform_2, window_bounds = array<i64: 8, 256, 512>}, {pipeline_mode = #tpu.pipeline_mode<synchronous>, transform_indices = @transform_3, window_bounds = array<i64: 512, 128>}, {pipeline_mode = #tpu.pipeline_mode<synchronous>, transform_indices = @transform_4, window_bounds = array<i64: 128, 8>}, {pipeline_mode = #tpu.pipeline_mode<synchronous>, transform_indices = @transform_5, window_bounds = array<i64: 8, 1>}, {pipeline_mode = #tpu.pipeline_mode<synchronous>, transform_indices = @transform_6, window_bounds = array<i64: 1, 512>}, {pipeline_mode = #tpu.pipeline_mode<synchronous>, transform_indices = @transform_7, window_bounds = array<i64: 1, 128>}, {pipeline_mode = #tpu.pipeline_mode<synchronous>, transform_indices = @transform_8, window_bounds = array<i64: 1, 8>}, {pipeline_mode = #tpu.pipeline_mode<synchronous>, transform_indices = @transform_9, window_bounds = array<i64: 1, 8>}]} {
    %c0 = arith.constant 0 : index
    %c0_0 = arith.constant 0 : index
    %0 = vector.load %arg2[%c0, %c0_0] : memref<8x128xbf16, #tpu.memory_space<vmem>>, vector<8x128xbf16>
    %c0_1 = arith.constant 0 : index
    %c0_2 = arith.constant 0 : index
    %1 = vector.load %arg6[%c0_1, %c0_2] : memref<8x1xf32, #tpu.memory_space<vmem>>, vector<8x1xf32>
    %c0_3 = arith.constant 0 : index
    %c0_4 = arith.constant 0 : index
    %c0_5 = arith.constant 0 : index
    %2 = vector.load %arg1[%c0_3, %c0_4, %c0_5] : memref<4x128x256xbf16, #tpu.memory_space<vmem>>, vector<1x128x256xbf16>
    %3 = vector.shape_cast %2 : vector<1x128x256xbf16> to vector<128x256xbf16>
    %cst = arith.constant dense<0.000000e+00> : vector<8x256xf32>
    %4 = tpu.matmul %0, %3, %cst {dimension_numbers = #tpu.dot_dimension_numbers<[1], [0], [0], [1], [0, 0, 1, 1], [], []>} : vector<8x128xbf16>, vector<128x256xbf16>, vector<8x256xf32> -> vector<8x256xf32>
    %5 = vector.broadcast %1 : vector<8x1xf32> to vector<8x256xf32>
    %6 = arith.addf %4, %5 : vector<8x256xf32>
    %cst_6 = arith.constant 0.000000e+00 : f32
    %7 = vector.broadcast %cst_6 : f32 to vector<8x256xf32>
    %8 = arith.maximumf %6, %7 : vector<8x256xf32>
    %c0_7 = arith.constant 0 : index
    %c0_8 = arith.constant 0 : index
    %c0_9 = arith.constant 0 : index
    %9 = vector.load %arg11[%c0_7, %c0_8, %c0_9] : memref<4x8x256xf32, #tpu.memory_space<vmem>>, vector<1x8x256xf32>
    %10 = vector.shape_cast %9 : vector<1x8x256xf32> to vector<8x256xf32>
    %11 = vector.shape_cast %8 : vector<8x256xf32> to vector<1x8x256xf32>
    tpu.vector_store %arg11[%c0_7, %c0_8, %c0_9], %11 {strides = array<i32>} : memref<4x8x256xf32, #tpu.memory_space<vmem>>, vector<1x8x256xf32>,
    %c1 = arith.constant 1 : index
    %c0_10 = arith.constant 0 : index
    %c0_11 = arith.constant 0 : index
    %12 = vector.load %arg1[%c1, %c0_10, %c0_11] : memref<4x128x256xbf16, #tpu.memory_space<vmem>>, vector<1x128x256xbf16>
    %13 = vector.shape_cast %12 : vector<1x128x256xbf16> to vector<128x256xbf16>
    %cst_12 = arith.constant dense<0.000000e+00> : vector<8x256xf32>
    %14 = tpu.matmul %0, %13, %cst_12 {dimension_numbers = #tpu.dot_dimension_numbers<[1], [0], [0], [1], [0, 0, 1, 1], [], []>} : vector<8x128xbf16>, vector<128x256xbf16>, vector<8x256xf32> -> vector<8x256xf32>
    %15 = vector.broadcast %1 : vector<8x1xf32> to vector<8x256xf32>
    %16 = arith.addf %14, %15 : vector<8x256xf32>
    %cst_13 = arith.constant 0.000000e+00 : f32
    %17 = vector.broadcast %cst_13 : f32 to vector<8x256xf32>
    %18 = arith.maximumf %16, %17 : vector<8x256xf32>
    %c1_14 = arith.constant 1 : index
    %c0_15 = arith.constant 0 : index
    %c0_16 = arith.constant 0 : index
    %19 = vector.load %arg11[%c1_14, %c0_15, %c0_16] : memref<4x8x256xf32, #tpu.memory_space<vmem>>, vector<1x8x256xf32>
    %20 = vector.shape_cast %19 : vector<1x8x256xf32> to vector<8x256xf32>
    %21 = vector.shape_cast %18 : vector<8x256xf32> to vector<1x8x256xf32>
    tpu.vector_store %arg11[%c1_14, %c0_15, %c0_16], %21 {strides = array<i32>} : memref<4x8x256xf32, #tpu.memory_space<vmem>>, vector<1x8x256xf32>,
    %c2 = arith.constant 2 : index
    %c0_17 = arith.constant 0 : index
    %c0_18 = arith.constant 0 : index
    %22 = vector.load %arg1[%c2, %c0_17, %c0_18] : memref<4x128x256xbf16, #tpu.memory_space<vmem>>, vector<1x128x256xbf16>
    %23 = vector.shape_cast %22 : vector<1x128x256xbf16> to vector<128x256xbf16>
    %cst_19 = arith.constant dense<0.000000e+00> : vector<8x256xf32>
    %24 = tpu.matmul %0, %23, %cst_19 {dimension_numbers = #tpu.dot_dimension_numbers<[1], [0], [0], [1], [0, 0, 1, 1], [], []>} : vector<8x128xbf16>, vector<128x256xbf16>, vector<8x256xf32> -> vector<8x256xf32>
    %25 = vector.broadcast %1 : vector<8x1xf32> to vector<8x256xf32>
    %26 = arith.addf %24, %25 : vector<8x256xf32>
    %cst_20 = arith.constant 0.000000e+00 : f32
    %27 = vector.broadcast %cst_20 : f32 to vector<8x256xf32>
    %28 = arith.maximumf %26, %27 : vector<8x256xf32>
    %c2_21 = arith.constant 2 : index
    %c0_22 = arith.constant 0 : index
    %c0_23 = arith.constant 0 : index
    %29 = vector.load %arg11[%c2_21, %c0_22, %c0_23] : memref<4x8x256xf32, #tpu.memory_space<vmem>>, vector<1x8x256xf32>
    %30 = vector.shape_cast %29 : vector<1x8x256xf32> to vector<8x256xf32>
    %31 = vector.shape_cast %28 : vector<8x256xf32> to vector<1x8x256xf32>
    tpu.vector_store %arg11[%c2_21, %c0_22, %c0_23], %31 {strides = array<i32>} : memref<4x8x256xf32, #tpu.memory_space<vmem>>, vector<1x8x256xf32>,
    %c3 = arith.constant 3 : index
    %c0_24 = arith.constant 0 : index
    %c0_25 = arith.constant 0 : index
    %32 = vector.load %arg1[%c3, %c0_24, %c0_25] : memref<4x128x256xbf16, #tpu.memory_space<vmem>>, vector<1x128x256xbf16>
    %33 = vector.shape_cast %32 : vector<1x128x256xbf16> to vector<128x256xbf16>
    %cst_26 = arith.constant dense<0.000000e+00> : vector<8x256xf32>
    %34 = tpu.matmul %0, %33, %cst_26 {dimension_numbers = #tpu.dot_dimension_numbers<[1], [0], [0], [1], [0, 0, 1, 1], [], []>} : vector<8x128xbf16>, vector<128x256xbf16>, vector<8x256xf32> -> vector<8x256xf32>
    %35 = vector.broadcast %1 : vector<8x1xf32> to vector<8x256xf32>
    %36 = arith.addf %34, %35 : vector<8x256xf32>
    %cst_27 = arith.constant 0.000000e+00 : f32
    %37 = vector.broadcast %cst_27 : f32 to vector<8x256xf32>
    %38 = arith.maximumf %36, %37 : vector<8x256xf32>
    %c3_28 = arith.constant 3 : index
    %c0_29 = arith.constant 0 : index
    %c0_30 = arith.constant 0 : index
    %39 = vector.load %arg11[%c3_28, %c0_29, %c0_30] : memref<4x8x256xf32, #tpu.memory_space<vmem>>, vector<1x8x256xf32>
    %40 = vector.shape_cast %39 : vector<1x8x256xf32> to vector<8x256xf32>
    %41 = vector.shape_cast %38 : vector<8x256xf32> to vector<1x8x256xf32>
    tpu.vector_store %arg11[%c3_28, %c0_29, %c0_30], %41 {strides = array<i32>} : memref<4x8x256xf32, #tpu.memory_space<vmem>>, vector<1x8x256xf32>,
    %cst_31 = arith.constant 0.000000e+00 : f32
    %42 = vector.broadcast %cst_31 : f32 to vector<4x512xf32>
    %c0_32 = arith.constant 0 : index
    %c0_33 = arith.constant 0 : index
    %c0_34 = arith.constant 0 : index
    %43 = vector.load %arg11[%c0_32, %c0_33, %c0_34] : memref<4x8x256xf32, #tpu.memory_space<vmem>>, vector<4x1x256xf32>
    %44 = vector.shape_cast %43 : vector<4x1x256xf32> to vector<4x256xf32>
    %45 = arith.truncf %44 : vector<4x256xf32> to vector<4x256xbf16>
    %c0_35 = arith.constant 0 : index
    %c0_36 = arith.constant 0 : index
    %c0_37 = arith.constant 0 : index
    %46 = vector.load %arg3[%c0_35, %c0_36, %c0_37] : memref<8x256x512xbf16, #tpu.memory_space<vmem>>, vector<1x256x512xbf16>
    %47 = vector.shape_cast %46 : vector<1x256x512xbf16> to vector<256x512xbf16>
    %cst_38 = arith.constant dense<0.000000e+00> : vector<4x512xf32>
    %48 = tpu.matmul %45, %47, %cst_38 {dimension_numbers = #tpu.dot_dimension_numbers<[1], [0], [0], [1], [0, 0, 1, 1], [], []>} : vector<4x256xbf16>, vector<256x512xbf16>, vector<4x512xf32> -> vector<4x512xf32>
    %49 = arith.addf %42, %48 : vector<4x512xf32>
    %c0_39 = arith.constant 0 : index
    %c1_40 = arith.constant 1 : index
    %c0_41 = arith.constant 0 : index
    %50 = vector.load %arg11[%c0_39, %c1_40, %c0_41] : memref<4x8x256xf32, #tpu.memory_space<vmem>>, vector<4x1x256xf32>
    %51 = vector.shape_cast %50 : vector<4x1x256xf32> to vector<4x256xf32>
    %52 = arith.truncf %51 : vector<4x256xf32> to vector<4x256xbf16>
    %c1_42 = arith.constant 1 : index
    %c0_43 = arith.constant 0 : index
    %c0_44 = arith.constant 0 : index
    %53 = vector.load %arg3[%c1_42, %c0_43, %c0_44] : memref<8x256x512xbf16, #tpu.memory_space<vmem>>, vector<1x256x512xbf16>
    %54 = vector.shape_cast %53 : vector<1x256x512xbf16> to vector<256x512xbf16>
    %cst_45 = arith.constant dense<0.000000e+00> : vector<4x512xf32>
    %55 = tpu.matmul %52, %54, %cst_45 {dimension_numbers = #tpu.dot_dimension_numbers<[1], [0], [0], [1], [0, 0, 1, 1], [], []>} : vector<4x256xbf16>, vector<256x512xbf16>, vector<4x512xf32> -> vector<4x512xf32>
    %56 = arith.addf %49, %55 : vector<4x512xf32>
    %c0_46 = arith.constant 0 : index
    %c2_47 = arith.constant 2 : index
    %c0_48 = arith.constant 0 : index
    %57 = vector.load %arg11[%c0_46, %c2_47, %c0_48] : memref<4x8x256xf32, #tpu.memory_space<vmem>>, vector<4x1x256xf32>
    %58 = vector.shape_cast %57 : vector<4x1x256xf32> to vector<4x256xf32>
    %59 = arith.truncf %58 : vector<4x256xf32> to vector<4x256xbf16>
    %c2_49 = arith.constant 2 : index
    %c0_50 = arith.constant 0 : index
    %c0_51 = arith.constant 0 : index
    %60 = vector.load %arg3[%c2_49, %c0_50, %c0_51] : memref<8x256x512xbf16, #tpu.memory_space<vmem>>, vector<1x256x512xbf16>
    %61 = vector.shape_cast %60 : vector<1x256x512xbf16> to vector<256x512xbf16>
    %cst_52 = arith.constant dense<0.000000e+00> : vector<4x512xf32>
    %62 = tpu.matmul %59, %61, %cst_52 {dimension_numbers = #tpu.dot_dimension_numbers<[1], [0], [0], [1], [0, 0, 1, 1], [], []>} : vector<4x256xbf16>, vector<256x512xbf16>, vector<4x512xf32> -> vector<4x512xf32>
    %63 = arith.addf %56, %62 : vector<4x512xf32>
    %c0_53 = arith.constant 0 : index
    %c3_54 = arith.constant 3 : index
    %c0_55 = arith.constant 0 : index
    %64 = vector.load %arg11[%c0_53, %c3_54, %c0_55] : memref<4x8x256xf32, #tpu.memory_space<vmem>>, vector<4x1x256xf32>
    %65 = vector.shape_cast %64 : vector<4x1x256xf32> to vector<4x256xf32>
    %66 = arith.truncf %65 : vector<4x256xf32> to vector<4x256xbf16>
    %c3_56 = arith.constant 3 : index
    %c0_57 = arith.constant 0 : index
    %c0_58 = arith.constant 0 : index
    %67 = vector.load %arg3[%c3_56, %c0_57, %c0_58] : memref<8x256x512xbf16, #tpu.memory_space<vmem>>, vector<1x256x512xbf16>
    %68 = vector.shape_cast %67 : vector<1x256x512xbf16> to vector<256x512xbf16>
    %cst_59 = arith.constant dense<0.000000e+00> : vector<4x512xf32>
    %69 = tpu.matmul %66, %68, %cst_59 {dimension_numbers = #tpu.dot_dimension_numbers<[1], [0], [0], [1], [0, 0, 1, 1], [], []>} : vector<4x256xbf16>, vector<256x512xbf16>, vector<4x512xf32> -> vector<4x512xf32>
    %70 = arith.addf %63, %69 : vector<4x512xf32>
    %c0_60 = arith.constant 0 : index
    %c4 = arith.constant 4 : index
    %c0_61 = arith.constant 0 : index
    %71 = vector.load %arg11[%c0_60, %c4, %c0_61] : memref<4x8x256xf32, #tpu.memory_space<vmem>>, vector<4x1x256xf32>
    %72 = vector.shape_cast %71 : vector<4x1x256xf32> to vector<4x256xf32>
    %73 = arith.truncf %72 : vector<4x256xf32> to vector<4x256xbf16>
    %c4_62 = arith.constant 4 : index
    %c0_63 = arith.constant 0 : index
    %c0_64 = arith.constant 0 : index
    %74 = vector.load %arg3[%c4_62, %c0_63, %c0_64] : memref<8x256x512xbf16, #tpu.memory_space<vmem>>, vector<1x256x512xbf16>
    %75 = vector.shape_cast %74 : vector<1x256x512xbf16> to vector<256x512xbf16>
    %cst_65 = arith.constant dense<0.000000e+00> : vector<4x512xf32>
    %76 = tpu.matmul %73, %75, %cst_65 {dimension_numbers = #tpu.dot_dimension_numbers<[1], [0], [0], [1], [0, 0, 1, 1], [], []>} : vector<4x256xbf16>, vector<256x512xbf16>, vector<4x512xf32> -> vector<4x512xf32>
    %77 = arith.addf %70, %76 : vector<4x512xf32>
    %c0_66 = arith.constant 0 : index
    %c5 = arith.constant 5 : index
    %c0_67 = arith.constant 0 : index
    %78 = vector.load %arg11[%c0_66, %c5, %c0_67] : memref<4x8x256xf32, #tpu.memory_space<vmem>>, vector<4x1x256xf32>
    %79 = vector.shape_cast %78 : vector<4x1x256xf32> to vector<4x256xf32>
    %80 = arith.truncf %79 : vector<4x256xf32> to vector<4x256xbf16>
    %c5_68 = arith.constant 5 : index
    %c0_69 = arith.constant 0 : index
    %c0_70 = arith.constant 0 : index
    %81 = vector.load %arg3[%c5_68, %c0_69, %c0_70] : memref<8x256x512xbf16, #tpu.memory_space<vmem>>, vector<1x256x512xbf16>
    %82 = vector.shape_cast %81 : vector<1x256x512xbf16> to vector<256x512xbf16>
    %cst_71 = arith.constant dense<0.000000e+00> : vector<4x512xf32>
    %83 = tpu.matmul %80, %82, %cst_71 {dimension_numbers = #tpu.dot_dimension_numbers<[1], [0], [0], [1], [0, 0, 1, 1], [], []>} : vector<4x256xbf16>, vector<256x512xbf16>, vector<4x512xf32> -> vector<4x512xf32>
    %84 = arith.addf %77, %83 : vector<4x512xf32>
    %c0_72 = arith.constant 0 : index
    %c6 = arith.constant 6 : index
    %c0_73 = arith.constant 0 : index
    %85 = vector.load %arg11[%c0_72, %c6, %c0_73] : memref<4x8x256xf32, #tpu.memory_space<vmem>>, vector<4x1x256xf32>
    %86 = vector.shape_cast %85 : vector<4x1x256xf32> to vector<4x256xf32>
    %87 = arith.truncf %86 : vector<4x256xf32> to vector<4x256xbf16>
    %c6_74 = arith.constant 6 : index
    %c0_75 = arith.constant 0 : index
    %c0_76 = arith.constant 0 : index
    %88 = vector.load %arg3[%c6_74, %c0_75, %c0_76] : memref<8x256x512xbf16, #tpu.memory_space<vmem>>, vector<1x256x512xbf16>
    %89 = vector.shape_cast %88 : vector<1x256x512xbf16> to vector<256x512xbf16>
    %cst_77 = arith.constant dense<0.000000e+00> : vector<4x512xf32>
    %90 = tpu.matmul %87, %89, %cst_77 {dimension_numbers = #tpu.dot_dimension_numbers<[1], [0], [0], [1], [0, 0, 1, 1], [], []>} : vector<4x256xbf16>, vector<256x512xbf16>, vector<4x512xf32> -> vector<4x512xf32>
    %91 = arith.addf %84, %90 : vector<4x512xf32>
    %c0_78 = arith.constant 0 : index
    %c7 = arith.constant 7 : index
    %c0_79 = arith.constant 0 : index
    %92 = vector.load %arg11[%c0_78, %c7, %c0_79] : memref<4x8x256xf32, #tpu.memory_space<vmem>>, vector<4x1x256xf32>
    %93 = vector.shape_cast %92 : vector<4x1x256xf32> to vector<4x256xf32>
    %94 = arith.truncf %93 : vector<4x256xf32> to vector<4x256xbf16>
    %c7_80 = arith.constant 7 : index
    %c0_81 = arith.constant 0 : index
    %c0_82 = arith.constant 0 : index
    %95 = vector.load %arg3[%c7_80, %c0_81, %c0_82] : memref<8x256x512xbf16, #tpu.memory_space<vmem>>, vector<1x256x512xbf16>
    %96 = vector.shape_cast %95 : vector<1x256x512xbf16> to vector<256x512xbf16>
    %cst_83 = arith.constant dense<0.000000e+00> : vector<4x512xf32>
    %97 = tpu.matmul %94, %96, %cst_83 {dimension_numbers = #tpu.dot_dimension_numbers<[1], [0], [0], [1], [0, 0, 1, 1], [], []>} : vector<4x256xbf16>, vector<256x512xbf16>, vector<4x512xf32> -> vector<4x512xf32>
    %98 = arith.addf %91, %97 : vector<4x512xf32>
    %c0_84 = arith.constant 0 : index
    %c0_85 = arith.constant 0 : index
    %99 = vector.load %arg7[%c0_84, %c0_85] : memref<1x512xf32, #tpu.memory_space<vmem>>, vector<1x512xf32>
    %100 = vector.broadcast %99 : vector<1x512xf32> to vector<4x512xf32>
    %101 = arith.addf %98, %100 : vector<4x512xf32>
    %cst_86 = arith.constant 0.000000e+00 : f32
    %102 = vector.broadcast %cst_86 : f32 to vector<4x512xf32>
    %103 = arith.maximumf %101, %102 : vector<4x512xf32>
    %104 = arith.truncf %103 : vector<4x512xf32> to vector<4x512xbf16>
    %c0_87 = arith.constant 0 : index
    %c0_88 = arith.constant 0 : index
    %105 = vector.load %arg4[%c0_87, %c0_88] : memref<512x128xbf16, #tpu.memory_space<vmem>>, vector<512x128xbf16>
    %cst_89 = arith.constant dense<0.000000e+00> : vector<4x128xf32>
    %106 = tpu.matmul %104, %105, %cst_89 {dimension_numbers = #tpu.dot_dimension_numbers<[1], [0], [0], [1], [0, 0, 1, 1], [], []>} : vector<4x512xbf16>, vector<512x128xbf16>, vector<4x128xf32> -> vector<4x128xf32>
    %c0_90 = arith.constant 0 : index
    %c0_91 = arith.constant 0 : index
    %107 = vector.load %arg8[%c0_90, %c0_91] : memref<1x128xf32, #tpu.memory_space<vmem>>, vector<1x128xf32>
    %108 = vector.broadcast %107 : vector<1x128xf32> to vector<4x128xf32>
    %109 = arith.addf %106, %108 : vector<4x128xf32>
    %cst_92 = arith.constant 0.000000e+00 : f32
    %110 = vector.broadcast %cst_92 : f32 to vector<4x128xf32>
    %111 = arith.maximumf %109, %110 : vector<4x128xf32>
    %112 = arith.truncf %111 : vector<4x128xf32> to vector<4x128xbf16>
    %c0_93 = arith.constant 0 : index
    %c0_94 = arith.constant 0 : index
    %113 = vector.load %arg5[%c0_93, %c0_94] : memref<128x8xbf16, #tpu.memory_space<vmem>>, vector<128x8xbf16>
    %cst_95 = arith.constant dense<0.000000e+00> : vector<4x8xf32>
    %114 = tpu.matmul %112, %113, %cst_95 {dimension_numbers = #tpu.dot_dimension_numbers<[1], [0], [0], [1], [0, 0, 1, 1], [], []>} : vector<4x128xbf16>, vector<128x8xbf16>, vector<4x8xf32> -> vector<4x8xf32>
    %c0_96 = arith.constant 0 : index
    %c0_97 = arith.constant 0 : index
    %115 = vector.load %arg9[%c0_96, %c0_97] : memref<1x8xf32, #tpu.memory_space<vmem>>, vector<1x8xf32>
    %116 = vector.broadcast %115 : vector<1x8xf32> to vector<4x8xf32>
    %117 = arith.addf %114, %116 : vector<4x8xf32>
    %cst_98 = arith.constant 0.000000e+00 : f32
    %118 = vector.broadcast %cst_98 : f32 to vector<4x8xf32>
    %119 = arith.maximumf %117, %118 : vector<4x8xf32>
    %cst_99 = arith.constant dense<0.000000e+00> : vector<8xf32>
    %120 = vector.multi_reduction <add>, %119, %cst_99 [0] : vector<4x8xf32> to vector<8xf32>
    %121 = vector.shape_cast %120 : vector<8xf32> to vector<1x8xf32>
    %cst_100 = arith.constant 4.000000e+00 : f32
    %122 = vector.broadcast %cst_100 : f32 to vector<1x8xf32>
    %123 = arith.divf %121, %122 : vector<1x8xf32>
    %c0_101 = arith.constant 0 : index
    %c0_102 = arith.constant 0 : index
    %124 = vector.load %arg10[%c0_101, %c0_102] : memref<1x8xf32, #tpu.memory_space<vmem>>, vector<1x8xf32>
    tpu.vector_store %arg10[%c0_101, %c0_102], %123 {strides = array<i32>} : memref<1x8xf32, #tpu.memory_space<vmem>>, vector<1x8xf32>,
    return
  }
  func.func @transform_0(%arg0: i32) -> (i32, i32, i32) {
    %c0_i32 = arith.constant 0 : i32
    %c0_i32_0 = arith.constant 0 : i32
    %c0_i32_1 = arith.constant 0 : i32
    %c0_i32_2 = arith.constant 0 : i32
    return %c0_i32, %c0_i32_0, %c0_i32_1 : i32, i32, i32
  }
  func.func @transform_1(%arg0: i32) -> (i32, i32) {
    %c0_i32 = arith.constant 0 : i32
    %c0_i32_0 = arith.constant 0 : i32
    %c0_i32_1 = arith.constant 0 : i32
    return %c0_i32, %c0_i32_0 : i32, i32
  }
  func.func @transform_2(%arg0: i32) -> (i32, i32, i32) {
    %c0_i32 = arith.constant 0 : i32
    %c0_i32_0 = arith.constant 0 : i32
    %c0_i32_1 = arith.constant 0 : i32
    %c0_i32_2 = arith.constant 0 : i32
    return %c0_i32, %c0_i32_0, %c0_i32_1 : i32, i32, i32
  }
  func.func @transform_3(%arg0: i32) -> (i32, i32) {
    %c0_i32 = arith.constant 0 : i32
    %c0_i32_0 = arith.constant 0 : i32
    %c0_i32_1 = arith.constant 0 : i32
    return %c0_i32, %c0_i32_0 : i32, i32
  }
  func.func @transform_4(%arg0: i32) -> (i32, i32) {
    %c0_i32 = arith.constant 0 : i32
    %c0_i32_0 = arith.constant 0 : i32
    %c0_i32_1 = arith.constant 0 : i32
    return %c0_i32, %c0_i32_0 : i32, i32
  }
  func.func @transform_5(%arg0: i32) -> (i32, i32) {
    %c0_i32 = arith.constant 0 : i32
    %c0_i32_0 = arith.constant 0 : i32
    %c0_i32_1 = arith.constant 0 : i32
    return %c0_i32, %c0_i32_0 : i32, i32
  }
  func.func @transform_6(%arg0: i32) -> (i32, i32) {
    %c0_i32 = arith.constant 0 : i32
    %c0_i32_0 = arith.constant 0 : i32
    %c0_i32_1 = arith.constant 0 : i32
    return %c0_i32, %c0_i32_0 : i32, i32
  }
  func.func @transform_7(%arg0: i32) -> (i32, i32) {
    %c0_i32 = arith.constant 0 : i32
    %c0_i32_0 = arith.constant 0 : i32
    %c0_i32_1 = arith.constant 0 : i32
    return %c0_i32, %c0_i32_0 : i32, i32
  }
  func.func @transform_8(%arg0: i32) -> (i32, i32) {
    %c0_i32 = arith.constant 0 : i32
    %c0_i32_0 = arith.constant 0 : i32
    %c0_i32_1 = arith.constant 0 : i32
    return %c0_i32, %c0_i32_0 : i32, i32
  }
  func.func @transform_9(%arg0: i32) -> (i32, i32) {
    %c0_i32 = arith.constant 0 : i32
    %c0_i32_0 = arith.constant 0 : i32
    %c0_i32_1 = arith.constant 0 : i32
    return %c0_i32, %c0_i32_0 : i32, i32
  }
}

</mosaic_0001>

<bundles_post_ra>
// kernel: patch_net_forward.1
= control target key start
LH: loop header
LB: loop body
LE: loop exit
PB: predicated region body
PF: predicated region fallthrough
CT: control target
= control target key end

     0   :  { %v7743_v2 = vmov 0   ;;  %vm876_vm0 = vcmask 1041409   ;;  %vm879_vm1 = vcmask 1042434   ;;  %vm882_vm2 = vcmask 1043459   ;;  %s10027_s0 = inlined_call_operand.vmem [shape: bf16[4,128,256], index: 0, kind: input, shape index: {}]   ;;  %s10028_s1 = inlined_call_operand.vmem [shape: bf16[8,128], index: 1, kind: input, shape index: {}]   ;;  %s10029_s2 = inlined_call_operand.vmem [shape: bf16[8,256,512], index: 2, kind: input, shape index: {}]   ;;  %s10030_s3 = inlined_call_operand.vmem [shape: bf16[512,128], index: 3, kind: input, shape index: {}]   ;;  %s10031_s4 = inlined_call_operand.vmem [shape: bf16[128,8], index: 4, kind: input, shape index: {}]   ;;  %s10032_s5 = inlined_call_operand.vmem [shape: f32[8,1], index: 5, kind: input, shape index: {}]   ;;  %s10033_s6 = inlined_call_operand.vmem [shape: f32[1,512], index: 6, kind: input, shape index: {}]   ;;  %s10034_s7 = inlined_call_operand.vmem [shape: f32[1,128], index: 7, kind: input, shape index: {}]   ;;  %s10035_s8 = inlined_call_operand.vmem [shape: f32[1,8], index: 8, kind: input, shape index: {}]   ;;  %s10036_s9 = inlined_call_operand.hbm [shape: f32[1,8], index: 9, kind: output, shape index: {}]  }
   0x1   :  { %v6817_v0 = vld [vmem:[%s10027_s0 + $0x74] ss:$8 sps:$4 sm:$0xff]   ;;  %169 = vmatprep.mubr.bf16.mxu0 %v7743_v2  ;;  %311 = vmatprep.mubr.bf16.mxu1 %v7743_v2  ;;  %v6821_v3 = vld [vmem:[%s10027_s0 + $0x70] ss:$8 sps:$4 sm:$0xff]   ;;  %v6823_v5 = vld [vmem:[%s10027_s0 + $0x64] ss:$8 sps:$4 sm:$0xff]  }
   0x2   :  { %v6819_v1 = vld [vmem:[%s10027_s0 + $0xf4] ss:$8 sps:$4 sm:$0xff]   ;;  %137 = vmatprep.subr.bf16.mxu0 %v6817_v0  ;;  %v6822_v4 = vld [vmem:[%s10027_s0 + $0xf0] ss:$8 sps:$4 sm:$0xff]   ;;  %6816 = vset.pattern.permute.xlu0 %v7743_v2  ;;  %v6825_v6 = vld [vmem:[%s10027_s0 + $0xe4] ss:$8 sps:$4 sm:$0xff]  }
   0x3   :  { %279 = vmatprep.subr.bf16.mxu1 %v6819_v1  ;;  %138 = vmatpush1.bf16.msra.mxu0 %v6821_v3  ;;  %v6827_v7 = vld [vmem:[%s10027_s0 + $0x60] ss:$8 sps:$4 sm:$0xff]   ;;  %v6829_v9 = vld [vmem:[%s10027_s0 + $0x54] ss:$8 sps:$4 sm:$0xff]   ;;  %v6833_v11 = vld [vmem:[%s10027_s0 + $0x50] ss:$8 sps:$4 sm:$0xff]  }
   0x4   :  { %280 = vmatpush1.bf16.msra.mxu1 %v6822_v4  ;;  %139 = vmatprep.subr.bf16.mxu0 %v6823_v5  ;;  %v6828_v8 = vld [vmem:[%s10027_s0 + $0xe0] ss:$8 sps:$4 sm:$0xff]   ;;  %v6831_v10 = vld [vmem:[%s10027_s0 + $0xd4] ss:$8 sps:$4 sm:$0xff]   ;;  %v6834_v12 = vld [vmem:[%s10027_s0 + $0xd0] ss:$8 sps:$4 sm:$0xff]  }
   0x5   :  { %281 = vmatprep.subr.bf16.mxu1 %v6825_v6  ;;  %v6835_v13 = vld [vmem:[%s10027_s0 + $0x44] ss:$8 sps:$4 sm:$0xff]   ;;  %v6839_v15 = vld [vmem:[%s10027_s0 + $0x40] ss:$8 sps:$4 sm:$0xff]   ;;  %v6841_v17 = vld [vmem:[%s10027_s0 + $0x34] ss:$8 sps:$4 sm:$0xff]  }
   0x6   :  { %v6837_v14 = vld [vmem:[%s10027_s0 + $0xc4] ss:$8 sps:$4 sm:$0xff]   ;;  %v6840_v16 = vld [vmem:[%s10027_s0 + $0xc0] ss:$8 sps:$4 sm:$0xff]   ;;  %v6843_v18 = vld [vmem:[%s10027_s0 + $0xb4] ss:$8 sps:$4 sm:$0xff]  }
   0x7   :  { %140 = vmatpush1.bf16.msra.mxu0 %v6827_v7  ;;  %v6845_v19 = vld [vmem:[%s10027_s0 + $0x30] ss:$8 sps:$4 sm:$0xff]   ;;  %v6847_v21 = vld [vmem:[%s10027_s0 + $0x24] ss:$8 sps:$4 sm:$0xff]   ;;  %v6851_v23 = vld [vmem:[%s10027_s0 + $0x20] ss:$8 sps:$4 sm:$0xff]  }
   0x8   :  { %282 = vmatpush1.bf16.msra.mxu1 %v6828_v8  ;;  %141 = vmatprep.subr.bf16.mxu0 %v6829_v9  ;;  %v6846_v20 = vld [vmem:[%s10027_s0 + $0xb0] ss:$8 sps:$4 sm:$0xff]   ;;  %v6849_v22 = vld [vmem:[%s10027_s0 + $0xa4] ss:$8 sps:$4 sm:$0xff]   ;;  %v6852_v24 = vld [vmem:[%s10027_s0 + $0xa0] ss:$8 sps:$4 sm:$0xff]  }
   0x9   :  { %283 = vmatprep.subr.bf16.mxu1 %v6831_v10  ;;  %v6853_v25 = vld [vmem:[%s10027_s0 + $0x14] ss:$8 sps:$4 sm:$0xff]   ;;  %v6857_v27 = vld [vmem:[%s10027_s0 + $0x10] ss:$8 sps:$4 sm:$0xff]   ;;  %v6859_v29 = vld [vmem:[%s10027_s0 + $0x4] ss:$8 sps:$4 sm:$0xff]  }
   0xa   :  { %v6855_v26 = vld [vmem:[%s10027_s0 + $0x94] ss:$8 sps:$4 sm:$0xff]   ;;  %v6858_v28 = vld [vmem:[%s10027_s0 + $0x90] ss:$8 sps:$4 sm:$0xff]   ;;  %v6861_v30 = vld [vmem:[%s10027_s0 + $0x84] ss:$8 sps:$4 sm:$0xff]  }
   0xb   :  { %142 = vmatpush1.bf16.msra.mxu0 %v6833_v11  ;;  %v6863_v31 = vld [vmem:[%s10027_s0] ss:$8 sps:$4 sm:$0xff]   ;;  %v6867_v33 = vld [vmem:[%s10027_s0 + $0x174] ss:$8 sps:$4 sm:$0xff]   ;;  %v6865_v36 = vld [vmem:[%s10027_s0 + $0x170] ss:$8 sps:$4 sm:$0xff]  }
   0xc   :  { %284 = vmatpush1.bf16.msra.mxu1 %v6834_v12  ;;  %143 = vmatprep.subr.bf16.mxu0 %v6835_v13  ;;  %v6864_v32 = vld [vmem:[%s10027_s0 + $0x80] ss:$8 sps:$4 sm:$0xff]   ;;  %v6870_v34 = vld [vmem:[%s10027_s0 + $0x1f4] ss:$8 sps:$4 sm:$0xff]   ;;  %v6868_v37 = vld [vmem:[%s10027_s0 + $0x1f0] ss:$8 sps:$4 sm:$0xff]  }
   0xd   :  { %285 = vmatprep.subr.bf16.mxu1 %v6837_v14  ;;  %v7905_v35 = vld [vmem:[%s10028_s1] sm:$0xf]  ;;  %v6873_v38 = vld [vmem:[%s10027_s0 + $0x164] ss:$8 sps:$4 sm:$0xff]   ;;  %v6879_v42 = vld [vmem:[%s10027_s0 + $0x154] ss:$8 sps:$4 sm:$0xff]  }
   0xe   :  { %v6876_v39 = vld [vmem:[%s10027_s0 + $0x1e4] ss:$8 sps:$4 sm:$0xff]   ;;  %v6871_v40 = vld [vmem:[%s10027_s0 + $0x160] ss:$8 sps:$4 sm:$0xff]   ;;  %v6882_v43 = vld [vmem:[%s10027_s0 + $0x1d4] ss:$8 sps:$4 sm:$0xff]  }
   0xf   :  { %144 = vmatpush1.bf16.msra.mxu0 %v6839_v15  ;;  %v6874_v41 = vld [vmem:[%s10027_s0 + $0x1e0] ss:$8 sps:$4 sm:$0xff]   ;;  %v6877_v44 = vld [vmem:[%s10027_s0 + $0x150] ss:$8 sps:$4 sm:$0xff]   ;;  %v6885_v46 = vld [vmem:[%s10027_s0 + $0x144] ss:$8 sps:$4 sm:$0xff]  }
  0x10   :  { %286 = vmatpush1.bf16.msra.mxu1 %v6840_v16  ;;  %145 = vmatprep.subr.bf16.mxu0 %v6841_v17  ;;  %v6880_v45 = vld [vmem:[%s10027_s0 + $0x1d0] ss:$8 sps:$4 sm:$0xff]   ;;  %v6888_v47 = vld [vmem:[%s10027_s0 + $0x1c4] ss:$8 sps:$4 sm:$0xff]   ;;  %v6883_v49 = vld [vmem:[%s10027_s0 + $0x140] ss:$8 sps:$4 sm:$0xff]  }
  0x11   :  { %287 = vmatprep.subr.bf16.mxu1 %v6843_v18  ;;  %v35_v48 = vld [vmem:[%s10032_s5] sm:$0xff]  ;;  %v6891_v51 = vld [vmem:[%s10027_s0 + $0x134] ss:$8 sps:$4 sm:$0xff]   ;;  %v6889_v53 = vld [vmem:[%s10027_s0 + $0x130] ss:$8 sps:$4 sm:$0xff]  }
  0x12   :  { %v6886_v50 = vld [vmem:[%s10027_s0 + $0x1c0] ss:$8 sps:$4 sm:$0xff]   ;;  %v6894_v52 = vld [vmem:[%s10027_s0 + $0x1b4] ss:$8 sps:$4 sm:$0xff]   ;;  %54 = vperm.xlu0 %6816, %v35_v48   ;;  %v6892_v54 = vld [vmem:[%s10027_s0 + $0x1b0] ss:$8 sps:$4 sm:$0xff]  }
  0x13   :  { %146 = vmatpush1.bf16.msra.mxu0 %v6845_v19  ;;  %v6897_v55 = vld [vmem:[%s10027_s0 + $0x124] ss:$8 sps:$4 sm:$0xff]   ;;  %v6895_v57 = vld [vmem:[%s10027_s0 + $0x120] ss:$8 sps:$4 sm:$0xff]   ;;  %v6903_v59 = vld [vmem:[%s10027_s0 + $0x114] ss:$8 sps:$4 sm:$0xff]  }
  0x14   :  { %288 = vmatpush1.bf16.msra.mxu1 %v6846_v20  ;;  %147 = vmatprep.subr.bf16.mxu0 %v6847_v21  ;;  %v6900_v56 = vld [vmem:[%s10027_s0 + $0x1a4] ss:$8 sps:$4 sm:$0xff]   ;;  %v6898_v58 = vld [vmem:[%s10027_s0 + $0x1a0] ss:$8 sps:$4 sm:$0xff]   ;;  %v6906_v60 = vld [vmem:[%s10027_s0 + $0x194] ss:$8 sps:$4 sm:$0xff]  }
  0x15   :  { %289 = vmatprep.subr.bf16.mxu1 %v6849_v22  ;;  %v6901_v61 = vld [vmem:[%s10027_s0 + $0x110] ss:$8 sps:$4 sm:$0xff]   ;;  %v6909_v63 = vld [vmem:[%s10027_s0 + $0x104] ss:$8 sps:$4 sm:$0xff]   ;;  %v6907_v1 = vld [vmem:[%s10027_s0 + $0x100] ss:$8 sps:$4 sm:$0xff]  }
  0x16   :  { %v6904_v62 = vld [vmem:[%s10027_s0 + $0x190] ss:$8 sps:$4 sm:$0xff]   ;;  %v6912_v0 = vld [vmem:[%s10027_s0 + $0x184] ss:$8 sps:$4 sm:$0xff]  }
  0x17   :  { %148 = vmatpush1.bf16.msra.mxu0 %v6851_v23  ;;  %v6915_v3 = vld [vmem:[%s10029_s2 + $0x2e4] ss:$16 sps:$4 sm:$0xff]   ;;  %v6918_v4 = vld [vmem:[%s10029_s2 + $0x2ec] ss:$16 sps:$4 sm:$0xff]   ;;  %v6913_v5 = vld [vmem:[%s10029_s2 + $0x2e0] ss:$16 sps:$4 sm:$0xff]  }
  0x18   :  { %290 = vmatpush1.bf16.msra.mxu1 %v6852_v24  ;;  %149 = vmatprep.subr.bf16.mxu0 %v6853_v25  ;;  %v6916_v6 = vld [vmem:[%s10029_s2 + $0x2e8] ss:$16 sps:$4 sm:$0xff]   ;;  %v6921_v7 = vld [vmem:[%s10029_s2 + $0x2c4] ss:$16 sps:$4 sm:$0xff]   ;;  %v6924_v8 = vld [vmem:[%s10029_s2 + $0x2cc] ss:$16 sps:$4 sm:$0xff]  }
  0x19   :  { %291 = vmatprep.subr.bf16.mxu1 %v6855_v26  ;;  %v6919_v9 = vld [vmem:[%s10029_s2 + $0x2c0] ss:$16 sps:$4 sm:$0xff]   ;;  %v6922_v10 = vld [vmem:[%s10029_s2 + $0x2c8] ss:$16 sps:$4 sm:$0xff]   ;;  %v6927_v11 = vld [vmem:[%s10029_s2 + $0x2a4] ss:$16 sps:$4 sm:$0xff]  }
  0x1a   :  { %v6930_v12 = vld [vmem:[%s10029_s2 + $0x2ac] ss:$16 sps:$4 sm:$0xff]   ;;  %v6925_v13 = vld [vmem:[%s10029_s2 + $0x2a0] ss:$16 sps:$4 sm:$0xff]   ;;  %v6928_v14 = vld [vmem:[%s10029_s2 + $0x2a8] ss:$16 sps:$4 sm:$0xff]  }
  0x1b   :  { %150 = vmatpush1.bf16.msra.mxu0 %v6857_v27  ;;  %v6933_v15 = vld [vmem:[%s10029_s2 + $0x284] ss:$16 sps:$4 sm:$0xff]   ;;  %v6936_v16 = vld [vmem:[%s10029_s2 + $0x28c] ss:$16 sps:$4 sm:$0xff]   ;;  %v6931_v17 = vld [vmem:[%s10029_s2 + $0x280] ss:$16 sps:$4 sm:$0xff]  }
  0x1c   :  { %292 = vmatpush1.bf16.msra.mxu1 %v6858_v28  ;;  %151 = vmatprep.subr.bf16.mxu0 %v6859_v29  ;;  %v6934_v18 = vld [vmem:[%s10029_s2 + $0x288] ss:$16 sps:$4 sm:$0xff]   ;;  %v6939_v19 = vld [vmem:[%s10029_s2 + $0x264] ss:$16 sps:$4 sm:$0xff]   ;;  %v6937_v20 = vld [vmem:[%s10029_s2 + $0x260] ss:$16 sps:$4 sm:$0xff]  }
  0x1d   :  { %293 = vmatprep.subr.bf16.mxu1 %v6861_v30  ;;  %v6940_v21 = vld [vmem:[%s10029_s2 + $0x268] ss:$16 sps:$4 sm:$0xff]   ;;  %v6942_v22 = vld [vmem:[%s10029_s2 + $0x26c] ss:$16 sps:$4 sm:$0xff]   ;;  %v6945_v23 = vld [vmem:[%s10029_s2 + $0x244] ss:$16 sps:$4 sm:$0xff]  }
  0x1e   :  { %v6948_v24 = vld [vmem:[%s10029_s2 + $0x24c] ss:$16 sps:$4 sm:$0xff]   ;;  %v6943_v25 = vld [vmem:[%s10029_s2 + $0x240] ss:$16 sps:$4 sm:$0xff]   ;;  %v6946_v26 = vld [vmem:[%s10029_s2 + $0x248] ss:$16 sps:$4 sm:$0xff]  }
  0x1f   :  { %152 = vmatpush1.bf16.msra.mxu0 %v6863_v31  ;;  %v6951_v27 = vld [vmem:[%s10029_s2 + $0x224] ss:$16 sps:$4 sm:$0xff]   ;;  %v6954_v28 = vld [vmem:[%s10029_s2 + $0x22c] ss:$16 sps:$4 sm:$0xff]   ;;  %v6949_v29 = vld [vmem:[%s10029_s2 + $0x220] ss:$16 sps:$4 sm:$0xff]  }
  0x20   :  { %294 = vmatpush1.bf16.msra.mxu1 %v6864_v32  ;;  %422 = vmatprep.subr.bf16.mxu0 %v6867_v33  ;;  %v6952_v30 = vld [vmem:[%s10029_s2 + $0x228] ss:$16 sps:$4 sm:$0xff]   ;;  %v6957_v31 = vld [vmem:[%s10029_s2 + $0x204] ss:$16 sps:$4 sm:$0xff]   ;;  %v6960_v32 = vld [vmem:[%s10029_s2 + $0x20c] ss:$16 sps:$4 sm:$0xff]  }
  0x21   :  { %565 = vmatprep.subr.bf16.mxu1 %v6870_v34  ;;  %v6955_v33 = vld [vmem:[%s10029_s2 + $0x200] ss:$16 sps:$4 sm:$0xff]   ;;  %v6958_v34 = vld [vmem:[%s10029_s2 + $0x208] ss:$16 sps:$4 sm:$0xff]   ;;  %v6984_v48 = vld [vmem:[%s10029_s2 + $0x38c] ss:$16 sps:$4 sm:$0xff]  }
  0x22   :  { %170 = vmatmul.mubr.bf16.vlgmr.msra.gmra.mxu0 %v7905_v35 }
  0x23   :  { %312 = vmatmul.mubr.bf16.vlgmr.msra.gmra.mxu1 %v7905_v35  ;;  %423 = vmatpush1.bf16.msra.mxu0 %v6865_v36  ;;  %v6966_v36 = vld [vmem:[%s10029_s2 + $0x3ec] ss:$16 sps:$4 sm:$0xff]  }
  0x24   :  { %566 = vmatpush1.bf16.msra.mxu1 %v6868_v37  ;;  %424 = vmatprep.subr.bf16.mxu0 %v6873_v38  ;;  %v6961_v37 = vld [vmem:[%s10029_s2 + $0x3e0] ss:$16 sps:$4 sm:$0xff]   ;;  %v6964_v38 = vld [vmem:[%s10029_s2 + $0x3e8] ss:$16 sps:$4 sm:$0xff]  }
  0x25   :  { %567 = vmatprep.subr.bf16.mxu1 %v6876_v39  ;;  %454 = vmatprep.mubr.bf16.mxu0 %v7743_v2  ;;  %v6969_v39 = vld [vmem:[%s10029_s2 + $0x3c4] ss:$16 sps:$4 sm:$0xff]  }
  0x26   :  { %597 = vmatprep.mubr.bf16.mxu1 %v7743_v2  ;;  %v6910_v2 = vld [vmem:[%s10027_s0 + $0x180] ss:$8 sps:$4 sm:$0xff]  }
  0x27   :  { %425 = vmatpush1.bf16.msra.mxu0 %v6871_v40  ;;  %v6972_v40 = vld [vmem:[%s10029_s2 + $0x3cc] ss:$16 sps:$4 sm:$0xff]  }
  0x28   :  { %568 = vmatpush1.bf16.msra.mxu1 %v6874_v41  ;;  %426 = vmatprep.subr.bf16.mxu0 %v6879_v42  ;;  %v6967_v41 = vld [vmem:[%s10029_s2 + $0x3c0] ss:$16 sps:$4 sm:$0xff]   ;;  %v6970_v42 = vld [vmem:[%s10029_s2 + $0x3c8] ss:$16 sps:$4 sm:$0xff]  }
  0x29   :  { %569 = vmatprep.subr.bf16.mxu1 %v6882_v43  ;;  %v6975_v43 = vld [vmem:[%s10029_s2 + $0x3a4] ss:$16 sps:$4 sm:$0xff]  }
  0x2b   :  { %427 = vmatpush1.bf16.msra.mxu0 %v6877_v44  ;;  %v6978_v44 = vld [vmem:[%s10029_s2 + $0x3ac] ss:$16 sps:$4 sm:$0xff]  }
  0x2c   :  { %570 = vmatpush1.bf16.msra.mxu1 %v6880_v45  ;;  %428 = vmatprep.subr.bf16.mxu0 %v6885_v46  ;;  %v6973_v45 = vld [vmem:[%s10029_s2 + $0x3a0] ss:$16 sps:$4 sm:$0xff]   ;;  %v6976_v46 = vld [vmem:[%s10029_s2 + $0x3a8] ss:$16 sps:$4 sm:$0xff]  }
  0x2d   :  { %571 = vmatprep.subr.bf16.mxu1 %v6888_v47  ;;  %v6981_v47 = vld [vmem:[%s10029_s2 + $0x384] ss:$16 sps:$4 sm:$0xff]  }
  0x2f   :  { %429 = vmatpush1.bf16.msra.mxu0 %v6883_v49  ;;  %v6979_v49 = vld [vmem:[%s10029_s2 + $0x380] ss:$16 sps:$4 sm:$0xff]  }
  0x30   :  { %572 = vmatpush1.bf16.msra.mxu1 %v6886_v50  ;;  %430 = vmatprep.subr.bf16.mxu0 %v6891_v51  ;;  %v6982_v50 = vld [vmem:[%s10029_s2 + $0x388] ss:$16 sps:$4 sm:$0xff]   ;;  %v6987_v51 = vld [vmem:[%s10029_s2 + $0x364] ss:$16 sps:$4 sm:$0xff]  }
  0x31   :  { %573 = vmatprep.subr.bf16.mxu1 %v6894_v52  ;;  %v6985_v52 = vld [vmem:[%s10029_s2 + $0x360] ss:$16 sps:$4 sm:$0xff]  }
  0x33   :  { %431 = vmatpush1.bf16.msra.mxu0 %v6889_v53  ;;  %v6988_v53 = vld [vmem:[%s10029_s2 + $0x368] ss:$16 sps:$4 sm:$0xff]  }
  0x34   :  { %574 = vmatpush1.bf16.msra.mxu1 %v6892_v54  ;;  %432 = vmatprep.subr.bf16.mxu0 %v6897_v55  ;;  %v6990_v54 = vld [vmem:[%s10029_s2 + $0x36c] ss:$16 sps:$4 sm:$0xff]   ;;  %v6993_v55 = vld [vmem:[%s10029_s2 + $0x344] ss:$16 sps:$4 sm:$0xff]  }
  0x35   :  { %575 = vmatprep.subr.bf16.mxu1 %v6900_v56  ;;  %v6996_v56 = vld [vmem:[%s10029_s2 + $0x34c] ss:$16 sps:$4 sm:$0xff]  }
  0x37   :  { %433 = vmatpush1.bf16.msra.mxu0 %v6895_v57  ;;  %v6991_v57 = vld [vmem:[%s10029_s2 + $0x340] ss:$16 sps:$4 sm:$0xff]  }
  0x38   :  { %576 = vmatpush1.bf16.msra.mxu1 %v6898_v58  ;;  %434 = vmatprep.subr.bf16.mxu0 %v6903_v59  ;;  %v6994_v58 = vld [vmem:[%s10029_s2 + $0x348] ss:$16 sps:$4 sm:$0xff]   ;;  %v6999_v59 = vld [vmem:[%s10029_s2 + $0x324] ss:$16 sps:$4 sm:$0xff]  }
  0x39   :  { %577 = vmatprep.subr.bf16.mxu1 %v6906_v60  ;;  %v7002_v60 = vld [vmem:[%s10029_s2 + $0x32c] ss:$16 sps:$4 sm:$0xff]  }
  0x3b   :  { %435 = vmatpush1.bf16.msra.mxu0 %v6901_v61  ;;  %v6997_v61 = vld [vmem:[%s10029_s2 + $0x320] ss:$16 sps:$4 sm:$0xff]  }
  0x3c   :  { %578 = vmatpush1.bf16.msra.mxu1 %v6904_v62  ;;  %436 = vmatprep.subr.bf16.mxu0 %v6909_v63  ;;  %v7000_v62 = vld [vmem:[%s10029_s2 + $0x328] ss:$16 sps:$4 sm:$0xff]   ;;  %v7005_v63 = vld [vmem:[%s10029_s2 + $0x304] ss:$16 sps:$4 sm:$0xff]  }
  0x3d   :  { %579 = vmatprep.subr.bf16.mxu1 %v6912_v0  ;;  %v7008_v0 = vld [vmem:[%s10029_s2 + $0x30c] ss:$16 sps:$4 sm:$0xff]  }
  0x3f   :  { %437 = vmatpush1.bf16.msra.mxu0 %v6907_v1  ;;  %v7003_v1 = vld [vmem:[%s10029_s2 + $0x300] ss:$16 sps:$4 sm:$0xff]  }
  0x40   :  { %580 = vmatpush1.bf16.msra.mxu1 %v6910_v2  ;;  %1214 = vmatprep.subr.bf16.mxu0 %v6915_v3  ;;  %v7006_v2 = vld [vmem:[%s10029_s2 + $0x308] ss:$16 sps:$4 sm:$0xff]   ;;  %v7011_v3 = vld [vmem:[%s10029_s2 + $0xe4] ss:$16 sps:$4 sm:$0xff]  }
  0x41   :  { %1255 = vmatprep.subr.bf16.mxu1 %v6918_v4  ;;  %v7014_v4 = vld [vmem:[%s10029_s2 + $0xec] ss:$16 sps:$4 sm:$0xff]  }
  0x42   :  { %455 = vmatmul.mubr.bf16.vlgmr.msra.gmra.mxu0 %v7905_v35 }
  0x43   :  { %598 = vmatmul.mubr.bf16.vlgmr.msra.gmra.mxu1 %v7905_v35  ;;  %1215 = vmatpush1.bf16.msra.mxu0 %v6913_v5  ;;  %v6963_v35 = vld [vmem:[%s10029_s2 + $0x3e4] ss:$16 sps:$4 sm:$0xff]  }
  0x44   :  { %1256 = vmatpush1.bf16.msra.mxu1 %v6916_v6  ;;  %1216 = vmatprep.subr.bf16.mxu0 %v6921_v7 }
  0x45   :  { %1257 = vmatprep.subr.bf16.mxu1 %v6924_v8 }
  0x47   :  { %1217 = vmatpush1.bf16.msra.mxu0 %v6919_v9 }
  0x48   :  { %1258 = vmatpush1.bf16.msra.mxu1 %v6922_v10  ;;  %1218 = vmatprep.subr.bf16.mxu0 %v6927_v11 }
  0x49   :  { %1259 = vmatprep.subr.bf16.mxu1 %v6930_v12  ;;  %v622_v12 = vlaneseq }
  0x4b   :  { %1219 = vmatpush1.bf16.msra.mxu0 %v6925_v13 }
  0x4c   :  { %1260 = vmatpush1.bf16.msra.mxu1 %v6928_v14  ;;  %1220 = vmatprep.subr.bf16.mxu0 %v6933_v15 }
  0x4d   :  { %1261 = vmatprep.subr.bf16.mxu1 %v6936_v16 }
  0x4f   :  { %1221 = vmatpush1.bf16.msra.mxu0 %v6931_v17 }
  0x50   :  { %1262 = vmatpush1.bf16.msra.mxu1 %v6934_v18  ;;  %1222 = vmatprep.subr.bf16.mxu0 %v6939_v19 }
  0x51   :  { %1263 = vmatprep.subr.bf16.mxu1 %v6942_v22 }
  0x53   :  { %1223 = vmatpush1.bf16.msra.mxu0 %v6937_v20 }
  0x54   :  { %1264 = vmatpush1.bf16.msra.mxu1 %v6940_v21  ;;  %1224 = vmatprep.subr.bf16.mxu0 %v6945_v23  ;;  %v8210_v23 = vshrl.u32 %v622_v12, 7 }
  0x55   :  { %1265 = vmatprep.subr.bf16.mxu1 %v6948_v24 }
  0x56   :  { %v8213_v24 = vsub.s32 0, %v8210_v23 }
  0x57   :  { %1225 = vmatpush1.bf16.msra.mxu0 %v6943_v25  ;;  %v8216_v25 = vsub.s32 1, %v8210_v23 }
  0x58   :  { %1266 = vmatpush1.bf16.msra.mxu1 %v6946_v26  ;;  %1226 = vmatprep.subr.bf16.mxu0 %v6951_v27 }
  0x59   :  { %1267 = vmatprep.subr.bf16.mxu1 %v6954_v28 }
  0x5b   :  { %1227 = vmatpush1.bf16.msra.mxu0 %v6949_v29 }
  0x5c   :  { %1268 = vmatpush1.bf16.msra.mxu1 %v6952_v30  ;;  %1228 = vmatprep.subr.bf16.mxu0 %v6957_v31 }
  0x5d   :  { %1269 = vmatprep.subr.bf16.mxu1 %v6960_v32 }
  0x5f   :  { %1229 = vmatpush1.bf16.msra.mxu0 %v6955_v33 }
  0x60   :  { %1270 = vmatpush1.bf16.msra.mxu1 %v6958_v34  ;;  %1230 = vmatprep.subr.bf16.mxu0 %v6963_v35 }
  0x61   :  { %1271 = vmatprep.subr.bf16.mxu1 %v6966_v36 }
  0x63   :  { %1231 = vmatpush2.bf16.msra.mxu0 %v6961_v37 }
  0x64   :  { %1272 = vmatpush2.bf16.msra.mxu1 %v6964_v38  ;;  %1232 = vmatprep.subr.bf16.mxu0 %v6969_v39 }
  0x65   :  { %1273 = vmatprep.subr.bf16.mxu1 %v6972_v40 }
  0x67   :  { %1233 = vmatpush2.bf16.msra.mxu0 %v6967_v41 }
  0x68   :  { %1274 = vmatpush2.bf16.msra.mxu1 %v6970_v42  ;;  %1234 = vmatprep.subr.bf16.mxu0 %v6975_v43 }
  0x69   :  { %1275 = vmatprep.subr.bf16.mxu1 %v6978_v44 }
  0x6b   :  { %1235 = vmatpush2.bf16.msra.mxu0 %v6973_v45 }
  0x6c   :  { %1276 = vmatpush2.bf16.msra.mxu1 %v6976_v46  ;;  %1236 = vmatprep.subr.bf16.mxu0 %v6981_v47 }
  0x6d   :  { %1277 = vmatprep.subr.bf16.mxu1 %v6984_v48 }
  0x6f   :  { %1237 = vmatpush2.bf16.msra.mxu0 %v6979_v49 }
  0x70   :  { %1278 = vmatpush2.bf16.msra.mxu1 %v6982_v50  ;;  %1238 = vmatprep.subr.bf16.mxu0 %v6987_v51 }
  0x71   :  { %1279 = vmatprep.subr.bf16.mxu1 %v6990_v54 }
  0x73   :  { %1239 = vmatpush2.bf16.msra.mxu0 %v6985_v52 }
  0x74   :  { %1280 = vmatpush2.bf16.msra.mxu1 %v6988_v53  ;;  %1240 = vmatprep.subr.bf16.mxu0 %v6993_v55 }
  0x75   :  { %1281 = vmatprep.subr.bf16.mxu1 %v6996_v56 }
  0x77   :  { %1241 = vmatpush2.bf16.msra.mxu0 %v6991_v57 }
  0x78   :  { %1282 = vmatpush2.bf16.msra.mxu1 %v6994_v58  ;;  %1242 = vmatprep.subr.bf16.mxu0 %v6999_v59 }
  0x79   :  { %1283 = vmatprep.subr.bf16.mxu1 %v7002_v60 }
  0x7b   :  { %1243 = vmatpush2.bf16.msra.mxu0 %v6997_v61 }
  0x7c   :  { %1284 = vmatpush2.bf16.msra.mxu1 %v7000_v62  ;;  %1244 = vmatprep.subr.bf16.mxu0 %v7005_v63 }
  0x7d   :  { %1285 = vmatprep.subr.bf16.mxu1 %v7008_v0 }
  0x7f   :  { %1245 = vmatpush2.bf16.msra.mxu0 %v7003_v1 }
  0x80   :  { %1286 = vmatpush2.bf16.msra.mxu1 %v7006_v2  ;;  %1648 = vmatprep.subr.bf16.mxu0 %v7011_v3 }
  0x81   :  { %1689 = vmatprep.subr.bf16.mxu1 %v7014_v4 }
  0x8d   :  { %v8204_v5 = vpop.permute.xlu0 %54 }
  0xe2   :  { %v171_v6 = vpop.f32.mrf.mxu0 }
  0xe3   :  { %v313_v7 = vpop.f32.mrf.mxu1  ;;  %v172_v8 = vadd.f32 %v171_v6, %v8204_v5 }
  0xe4   :  { %v314_v9 = vadd.f32 %v313_v7, %v8204_v5  ;;  %v173_v10 = vpop.f32.mrf.mxu0 }
  0xe5   :  { %v315_v11 = vpop.f32.mrf.mxu1  ;;  %v178_v13 = vmax.f32 %v172_v8, 0.0  ;;  %v174_v15 = vadd.f32 %v173_v10, %v8204_v5 }
  0xe6   :  { %v320_v14 = vmax.f32 %v314_v9, 0.0  ;;  %v316_v16 = vadd.f32 %v315_v11, %v8204_v5  ;;  %v175_v17 = vpop.f32.mrf.mxu0 }
  0xe7   :  { %v317_v18 = vpop.f32.mrf.mxu1  ;;  %180 = vst [vmem:[#allocation2] sm:$0xff] %v178_v13  ;;  %v179_v19 = vmax.f32 %v174_v15, 0.0 }
  0xe8   :  { %323 = vst [vmem:[#allocation2 + $0x10] sm:$0xff] %v320_v14  ;;  %v321_v20 = vmax.f32 %v316_v16, 0.0  ;;  %v176_v21 = vpop.f32.mrf.mxu0 }
  0xe9   :  { %v318_v22 = vpop.f32.mrf.mxu1  ;;  %181 = vst [vmem:[#allocation2 + $0x8] sm:$0xff] %v179_v19 }
  0xea   :  { %324 = vst [vmem:[#allocation2 + $0x18] sm:$0xff] %v321_v20 }
  0xf0   :  { %v735_v26 = vld [vmem:[#allocation2 + $0x1] ss:$8 sm:$0x3]  ;;  %v611_v35 = vld [vmem:[#allocation2] ss:$8 sm:$0x3] }
  0xf1   :  { %v737_v27 = vld [vmem:[#allocation2 + $0x11] ss:$8 sm:$0x3]  ;;  %v613_v30 = vld [vmem:[#allocation2 + $0x10] ss:$8 sm:$0x3]  ;;  %v749_v33 = vrot.slane %v735_v26, %v8213_v24  ;;  %v753_v34 = vrot.slane %v735_v26, %v8216_v25  ;;  %v625_v40 = vrot.slane %v611_v35, %v8213_v24  ;;  %v629_v41 = vrot.slane %v611_v35, %v8216_v25 }
  0xf2   :  { %v757_v28 = vrot.slane %v737_v27, %v8213_v24  ;;  %v761_v29 = vrot.slane %v737_v27, %v8216_v25  ;;  %v633_v31 = vrot.slane %v613_v30, %v8213_v24  ;;  %v637_v32 = vrot.slane %v613_v30, %v8216_v25  ;;  %v1731_v42 = vld [vmem:[#allocation2 + $0x2] ss:$8 sm:$0x3]  ;;  %v1733_v45 = vld [vmem:[#allocation2 + $0x12] ss:$8 sm:$0x3] }
  0xf3   :  { %v786_v43 = vpack.c.bf16 %v749_v33, %v749_v33  ;;  %v787_v44 = vpack.c.bf16 %v753_v34, %v753_v34  ;;  %v1745_v50 = vrot.slane %v1731_v42, %v8213_v24  ;;  %v1749_v51 = vrot.slane %v1731_v42, %v8216_v25  ;;  %v2296_v52 = vld [vmem:[#allocation2 + $0x13] ss:$8 sm:$0x3]  ;;  %v2294_v59 = vld [vmem:[#allocation2 + $0x3] ss:$8 sm:$0x3] }
  0xf4   :  { %v788_v36 = vpack.c.bf16 %v757_v28, %v757_v28  ;;  %v789_v37 = vpack.c.bf16 %v761_v29, %v761_v29  ;;  %v664_v38 = vpack.c.bf16 %v633_v31, %v633_v31  ;;  %v665_v39 = vpack.c.bf16 %v637_v32, %v637_v32  ;;  %v2859_v0 = vld [vmem:[#allocation2 + $0x14] ss:$8 sm:$0x3]  ;;  %v2857_v18 = vld [vmem:[#allocation2 + $0x4] ss:$8 sm:$0x3] }
  0xf5   :  { %v662_v53 = vpack.c.bf16 %v625_v40, %v625_v40  ;;  %v663_v54 = vpack.c.bf16 %v629_v41, %v629_v41  ;;  %v1753_v55 = vrot.slane %v1733_v45, %v8213_v24  ;;  %v1757_v56 = vrot.slane %v1733_v45, %v8216_v25  ;;  %v3420_v26 = vld [vmem:[#allocation2 + $0x5] ss:$8 sm:$0x3] }
  0xf6   :  { %v870_v46 = vunpack.c.l.b16 %v789_v37  ;;  %v869_v47 = vunpack.c.l.b16 %v788_v36  ;;  %v1307_v48 = vunpack.c.l.b16 %v665_v39  ;;  %v1306_v49 = vunpack.c.l.b16 %v664_v38 }
  0xf7   :  { %v868_v57 = vunpack.c.l.b16 %v787_v44  ;;  %v867_v58 = vunpack.c.l.b16 %v786_v43  ;;  %v2316_v62 = vrot.slane %v2296_v52, %v8213_v24  ;;  %v2320_v63 = vrot.slane %v2296_v52, %v8216_v25  ;;  %v3422_v43 = vld [vmem:[#allocation2 + $0x15] ss:$8 sm:$0x3] }
  0xf8   :  { %v884_v60 = vrot.slane %v870_v46, 7  ;;  %v875_v61 = vrot.slane %v869_v47, 7  ;;  %v1318_v1 = vrot.slane %v1307_v48, 7  ;;  %v1312_v2 = vrot.slane %v1306_v49, 7 }
  0xf9   :  { %v1782_v3 = vpack.c.bf16 %v1745_v50, %v1745_v50  ;;  %v1783_v4 = vpack.c.bf16 %v1749_v51, %v1749_v51  ;;  %v1305_v6 = vunpack.c.l.b16 %v663_v54  ;;  %v1304_v7 = vunpack.c.l.b16 %v662_v53  ;;  %v3983_v54 = vld [vmem:[#allocation2 + $0x6] ss:$8 sm:$0x3] }
  0xfa   :  { %v1784_v8 = vpack.c.bf16 %v1753_v55, %v1753_v55  ;;  %v1785_v9 = vpack.c.bf16 %v1757_v56, %v1757_v56  ;;  %v2308_v10 = vrot.slane %v2294_v59, %v8213_v24  ;;  %v2312_v11 = vrot.slane %v2294_v59, %v8216_v25 }
  0xfb   :  { %v2879_v12 = vrot.slane %v2859_v0, %v8213_v24  ;;  %v2883_v13 = vrot.slane %v2859_v0, %v8216_v25  ;;  %v8237_v14 = vsel %vm876_vm0, %v884_v60, %v868_v57  ;;  %v8240_v15 = vsel %vm876_vm0, %v875_v61, %v867_v58  ;;  %v3985_v0 = vld [vmem:[#allocation2 + $0x16] ss:$8 sm:$0x3] }
  0xfc   :  { %v2347_v16 = vpack.c.bf16 %v2316_v62, %v2316_v62  ;;  %v2348_v17 = vpack.c.bf16 %v2320_v63, %v2320_v63  ;;  %v8243_v19 = vsel %vm876_vm0, %v1318_v1, %v1305_v6  ;;  %v8246_v20 = vsel %vm876_vm0, %v1312_v2, %v1304_v7 }
  0xfd   :  { %v8248_v21 = vunpack.c.l.b16 %v1783_v4  ;;  %v8250_v22 = vunpack.c.l.b16 %v1782_v3  ;;  %v1866_v29 = vunpack.c.l.b16 %v1785_v9  ;;  %v1865_v30 = vunpack.c.l.b16 %v1784_v8 }
  0xfe   :  { %v2910_v31 = vpack.c.bf16 %v2879_v12, %v2879_v12  ;;  %v2911_v32 = vpack.c.bf16 %v2883_v13, %v2883_v13  ;;  %v2345_v35 = vpack.c.bf16 %v2308_v10, %v2308_v10  ;;  %v2346_v36 = vpack.c.bf16 %v2312_v11, %v2312_v11 }
  0xff   :  { %v2429_v39 = vunpack.c.l.b16 %v2348_v17  ;;  %v2428_v40 = vunpack.c.l.b16 %v2347_v16  ;;  %v2871_v41 = vrot.slane %v2857_v18, %v8213_v24  ;;  %v2875_v42 = vrot.slane %v2857_v18, %v8216_v25 }
 0x100   :  { %v2992_v50 = vunpack.c.l.b16 %v2911_v32  ;;  %v2991_v51 = vunpack.c.l.b16 %v2910_v31  ;;  %v3434_v52 = vrot.slane %v3420_v26, %v8213_v24  ;;  %v3438_v53 = vrot.slane %v3420_v26, %v8216_v25  ;;  %v4546_v31 = vld [vmem:[#allocation2 + $0x7] ss:$8 sm:$0x3] }
 0x101   :  { %v3442_v57 = vrot.slane %v3422_v43, %v8213_v24  ;;  %v3446_v58 = vrot.slane %v3422_v43, %v8216_v25  ;;  %v1871_v61 = vrot.slane %v1865_v30, 7  ;;  %v2908_v62 = vpack.c.bf16 %v2871_v41, %v2871_v41 }
 0x102   :  { %v456_v27 = vpop.f32.mrf.mxu0  ;;  %v2909_v63 = vpack.c.bf16 %v2875_v42, %v2875_v42  ;;  %v2427_v1 = vunpack.c.l.b16 %v2346_v36  ;;  %v2440_v2 = vrot.slane %v2429_v39, 7  ;;  %v2426_v3 = vunpack.c.l.b16 %v2345_v35 }
 0x103   :  { %v599_v28 = vpop.f32.mrf.mxu1  ;;  %v457_v33 = vadd.f32 %v456_v27, %v8204_v5  ;;  %v2434_v4 = vrot.slane %v2428_v40, 7  ;;  %v3003_v6 = vrot.slane %v2992_v50, 7  ;;  %v2997_v7 = vrot.slane %v2991_v51, 7 }
 0x104   :  { %v600_v34 = vadd.f32 %v599_v28, %v8204_v5  ;;  %v458_v37 = vpop.f32.mrf.mxu0  ;;  %v3471_v8 = vpack.c.bf16 %v3434_v52, %v3434_v52  ;;  %v3472_v9 = vpack.c.bf16 %v3438_v53, %v3438_v53  ;;  %v3473_v10 = vpack.c.bf16 %v3442_v57, %v3442_v57 }
 0x105   :  { %v601_v38 = vpop.f32.mrf.mxu1  ;;  %v463_v44 = vmax.f32 %v457_v33, 0.0  ;;  %v459_v46 = vadd.f32 %v458_v37, %v8204_v5  ;;  %v3474_v11 = vpack.c.bf16 %v3446_v58, %v3446_v58  ;;  %v8263_v12 = vrot.slane %v3983_v54, %v8213_v24 }
 0x106   :  { %v606_v45 = vmax.f32 %v600_v34, 0.0  ;;  %v602_v47 = vadd.f32 %v601_v38, %v8204_v5  ;;  %v460_v48 = vpop.f32.mrf.mxu0  ;;  %v1877_v5 = vrot.slane %v1866_v29, 7  ;;  %v8266_v13 = vrot.slane %v3983_v54, %v8216_v25 }
 0x107   :  { %v603_v49 = vpop.f32.mrf.mxu1  ;;  %466 = vst [vmem:[#allocation2 + $0x20] sm:$0xff] %v463_v44  ;;  %v464_v55 = vmax.f32 %v459_v46, 0.0  ;;  %v2990_v16 = vunpack.c.l.b16 %v2909_v63  ;;  %v2989_v17 = vunpack.c.l.b16 %v2908_v62  ;;  %v8269_v18 = vrot.slane %v3985_v0, %v8213_v24 }
 0x108   :  { %609 = vst [vmem:[#allocation2 + $0x30] sm:$0xff] %v606_v45  ;;  %v607_v56 = vmax.f32 %v602_v47, 0.0  ;;  %v461_v59 = vpop.f32.mrf.mxu0  ;;  %v8272_v26 = vrot.slane %v3985_v0, %v8216_v25  ;;  %v8276_v27 = vsel %vm876_vm0, %v1877_v5, %v8248_v21  ;;  %v8280_v28 = vsel %vm876_vm0, %v1871_v61, %v8250_v22 }
 0x109   :  { %v604_v60 = vpop.f32.mrf.mxu1  ;;  %467 = vst [vmem:[#allocation2 + $0x28] sm:$0xff] %v464_v55  ;;  %v8283_v29 = vsel %vm876_vm0, %v2440_v2, %v2427_v1  ;;  %v8286_v30 = vsel %vm876_vm0, %v2434_v4, %v2426_v3  ;;  %v8289_v32 = vsel %vm876_vm0, %v3003_v6, %v2990_v16  ;;  %v8292_v33 = vsel %vm876_vm0, %v2997_v7, %v2989_v17 }
 0x10a   :  { %610 = vst [vmem:[#allocation2 + $0x38] sm:$0xff] %v607_v56  ;;  %v8294_v21 = vunpack.c.l.b16 %v3472_v9  ;;  %v8296_v34 = vunpack.c.l.b16 %v3471_v8  ;;  %v8298_v22 = vunpack.c.l.b16 %v3474_v11  ;;  %v8300_v35 = vunpack.c.l.b16 %v3473_v10 }
 0x10b   :  { %v4034_v36 = vpack.c.bf16 %v8263_v12, %v8263_v12  ;;  %v4035_v37 = vpack.c.bf16 %v8266_v13, %v8266_v13  ;;  %v4036_v40 = vpack.c.bf16 %v8269_v18, %v8269_v18  ;;  %v4037_v41 = vpack.c.bf16 %v8272_v26, %v8272_v26  ;;  %v7041_v26 = vld [vmem:[%s10029_s2 + $0x44] ss:$16 sps:$4 sm:$0xff]   ;;  %v7051_v12 = vld [vmem:[%s10029_s2] ss:$16 sps:$4 sm:$0xff]  }
 0x10c   :  { %v8311_v42 = vrot.slane %v4546_v31, %v8213_v24  ;;  %v8314_v43 = vrot.slane %v4546_v31, %v8216_v25 }
 0x10d   :  { %v8446_v13 = vunpack.c.l.b16 %v4037_v41 }
 0x110   :  { %v739_v38 = vld [vmem:[#allocation2 + $0x21] ss:$8 sm:$0x3]  ;;  %v615_v48 = vld [vmem:[#allocation2 + $0x20] ss:$8 sm:$0x3] }
 0x111   :  { %v741_v39 = vld [vmem:[#allocation2 + $0x31] ss:$8 sm:$0x3]  ;;  %v765_v44 = vrot.slane %v739_v38, %v8213_v24  ;;  %v769_v45 = vrot.slane %v739_v38, %v8216_v25  ;;  %v617_v49 = vld [vmem:[#allocation2 + $0x30] ss:$8 sm:$0x3]  ;;  %v641_v50 = vrot.slane %v615_v48, %v8213_v24  ;;  %v645_v51 = vrot.slane %v615_v48, %v8216_v25 }
 0x112   :  { %v773_v46 = vrot.slane %v741_v39, %v8213_v24  ;;  %v777_v47 = vrot.slane %v741_v39, %v8216_v25  ;;  %v649_v52 = vrot.slane %v617_v49, %v8213_v24  ;;  %v653_v53 = vrot.slane %v617_v49, %v8216_v25  ;;  %v1735_v6 = vld [vmem:[#allocation2 + $0x22] ss:$8 sm:$0x3] }
 0x113   :  { %v790_v54 = vpack.c.bf16 %v765_v44, %v765_v44  ;;  %v791_v55 = vpack.c.bf16 %v769_v45, %v769_v45  ;;  %v666_v58 = vpack.c.bf16 %v641_v50, %v641_v50  ;;  %v667_v59 = vpack.c.bf16 %v645_v51, %v645_v51  ;;  %v1737_v44 = vld [vmem:[#allocation2 + $0x32] ss:$8 sm:$0x3]  ;;  %v2298_v51 = vld [vmem:[#allocation2 + $0x23] ss:$8 sm:$0x3] }
 0x114   :  { %v792_v56 = vpack.c.bf16 %v773_v46, %v773_v46  ;;  %v793_v57 = vpack.c.bf16 %v777_v47, %v777_v47  ;;  %v668_v60 = vpack.c.bf16 %v649_v52, %v649_v52  ;;  %v669_v5 = vpack.c.bf16 %v653_v53, %v653_v53  ;;  %v8330_v47 = vld [vmem:[#allocation2 + $0x17] ss:$8 sm:$0x3]  ;;  %v7012_v53 = vld [vmem:[%s10029_s2 + $0xe8] ss:$16 sps:$4 sm:$0xff]  }
 0x115   :  { %v872_v61 = vunpack.c.l.b16 %v791_v55  ;;  %v871_v63 = vunpack.c.l.b16 %v790_v54  ;;  %v1309_v1 = vunpack.c.l.b16 %v667_v59  ;;  %v1308_v3 = vunpack.c.l.b16 %v666_v58  ;;  %v2300_v59 = vld [vmem:[#allocation2 + $0x33] ss:$8 sm:$0x3] }
 0x116   :  { %v874_v62 = vunpack.c.l.b16 %v793_v57  ;;  %v873_v0 = vunpack.c.l.b16 %v792_v56  ;;  %v1311_v2 = vunpack.c.l.b16 %v669_v5  ;;  %v1310_v4 = vunpack.c.l.b16 %v668_v60  ;;  %v7020_v5 = vld [vmem:[%s10029_s2 + $0xcc] ss:$16 sps:$4 sm:$0xff]  }
 0x117   :  { %v886_v7 = vrot.slane %v872_v61, 6  ;;  %v878_v9 = vrot.slane %v871_v63, 6  ;;  %v1320_v11 = vrot.slane %v1309_v1, 6  ;;  %v1314_v17 = vrot.slane %v1308_v3, 6 }
 0x118   :  { %v888_v8 = vrot.slane %v874_v62, 5  ;;  %v881_v10 = vrot.slane %v873_v0, 5  ;;  %v1322_v16 = vrot.slane %v1311_v2, 5  ;;  %v1316_v31 = vrot.slane %v1310_v4, 5 }
 0x119   :  { %v887_v38 = vsel %vm879_vm1, %v886_v7, %v8237_v14  ;;  %v880_v39 = vsel %vm879_vm1, %v878_v9, %v8240_v15  ;;  %v1761_v45 = vrot.slane %v1735_v6, %v8213_v24  ;;  %v1765_v46 = vrot.slane %v1735_v6, %v8216_v25  ;;  %v7009_v15 = vld [vmem:[%s10029_s2 + $0xe0] ss:$16 sps:$4 sm:$0xff]   ;;  %v7018_v7 = vld [vmem:[%s10029_s2 + $0xc8] ss:$16 sps:$4 sm:$0xff]  }
 0x11a   :  { %v889_v48 = vsel %vm882_vm2, %v888_v8, %v887_v38  ;;  %v883_v49 = vsel %vm882_vm2, %v881_v10, %v880_v39  ;;  %v1321_v50 = vsel %vm879_vm1, %v1320_v11, %v8243_v19  ;;  %v1315_v14 = vsel %vm879_vm1, %v1314_v17, %v8246_v20  ;;  %v7017_v20 = vld [vmem:[%s10029_s2 + $0xc4] ss:$16 sps:$4 sm:$0xff]   ;;  %v7015_v6 = vld [vmem:[%s10029_s2 + $0xc0] ss:$16 sps:$4 sm:$0xff]  }
 0x11b   :  { %v891_v52 = vpack.c.b16 %v889_v48, %v889_v48  ;;  %v890_v54 = vpack.c.b16 %v883_v49, %v883_v49  ;;  %v1323_v55 = vsel %vm882_vm2, %v1322_v16, %v1321_v50  ;;  %v8346_v56 = vsel %vm882_vm2, %v1316_v31, %v1315_v14  ;;  %v7026_v16 = vld [vmem:[%s10029_s2 + $0xac] ss:$16 sps:$4 sm:$0xff]  }
 0x11c   :  { %v1325_v19 = vpack.c.b16 %v1323_v55, %v1323_v55  ;;  %v1769_v57 = vrot.slane %v1737_v44, %v8213_v24  ;;  %v1773_v58 = vrot.slane %v1737_v44, %v8216_v25  ;;  %v8355_v60 = vrot.slane %v8330_v47, %v8213_v24  ;;  %v7021_v44 = vld [vmem:[%s10029_s2 + $0xa0] ss:$16 sps:$4 sm:$0xff]   ;;  %v2861_v14 = vld [vmem:[#allocation2 + $0x24] ss:$8 sm:$0x3] }
 0x11d   :  { %1246 = vmatprep.mubr.bf16.mxu0 %v891_v52  ;;  %1287 = vmatprep.mubr.bf16.mxu1 %v891_v52  ;;  %v1786_v61 = vpack.c.bf16 %v1761_v45, %v1761_v45  ;;  %v1787_v62 = vpack.c.bf16 %v1765_v46, %v1765_v46  ;;  %v2324_v63 = vrot.slane %v2298_v51, %v8213_v24  ;;  %v3566_v0 = vrot.slane %v8298_v22, 7  ;;  %v7023_v22 = vld [vmem:[%s10029_s2 + $0xa4] ss:$16 sps:$4 sm:$0xff]   ;;  %v7024_v45 = vld [vmem:[%s10029_s2 + $0xa8] ss:$16 sps:$4 sm:$0xff]  }
 0x11e   :  { %1247 = vmatmul.mubr.bf16.vlgmr.msra.gmra.mxu0 %v890_v54  ;;  %1288 = vmatmul.mubr.bf16.vlgmr.msra.gmra.mxu1 %v890_v54  ;;  %v1788_v1 = vpack.c.bf16 %v1769_v57, %v1769_v57  ;;  %v1789_v2 = vpack.c.bf16 %v1773_v58, %v1773_v58  ;;  %v2328_v3 = vrot.slane %v2298_v51, %v8216_v25  ;;  %v3560_v4 = vrot.slane %v8300_v35, 7  ;;  %v7029_v51 = vld [vmem:[%s10029_s2 + $0x84] ss:$16 sps:$4 sm:$0xff]   ;;  %v7032_v52 = vld [vmem:[%s10029_s2 + $0x8c] ss:$16 sps:$4 sm:$0xff]  }
 0x11f   :  { %1649 = vmatpush1.bf16.msra.mxu0 %v7009_v15  ;;  %1690 = vmatpush1.bf16.msra.mxu1 %v7012_v53  ;;  %v1868_v8 = vunpack.c.l.b16 %v1787_v62  ;;  %v1867_v9 = vunpack.c.l.b16 %v1786_v61  ;;  %v2332_v10 = vrot.slane %v2300_v59, %v8213_v24  ;;  %v2336_v11 = vrot.slane %v2300_v59, %v8216_v25 }
 0x120   :  { %1680 = vmatprep.mubr.bf16.mxu0 %v1325_v19  ;;  %1721 = vmatprep.mubr.bf16.mxu1 %v1325_v19  ;;  %v1870_v17 = vunpack.c.l.b16 %v1789_v2  ;;  %v1869_v31 = vunpack.c.l.b16 %v1788_v1  ;;  %v2349_v38 = vpack.c.bf16 %v2324_v63, %v2324_v63  ;;  %v2350_v39 = vpack.c.bf16 %v2328_v3, %v2328_v3  ;;  %v2863_v19 = vld [vmem:[#allocation2 + $0x34] ss:$8 sm:$0x3]  ;;  %v3424_v1 = vld [vmem:[#allocation2 + $0x25] ss:$8 sm:$0x3] }
 0x121   :  { %1650 = vmatprep.subr.bf16.mxu0 %v7017_v20  ;;  %1691 = vmatprep.subr.bf16.mxu1 %v7020_v5  ;;  %v1879_v46 = vrot.slane %v1868_v8, 6  ;;  %v1873_v48 = vrot.slane %v1867_v9, 6  ;;  %v2351_v49 = vpack.c.bf16 %v2332_v10, %v2332_v10  ;;  %v2352_v50 = vpack.c.bf16 %v2336_v11, %v2336_v11 }
 0x122   :  { %v1881_v15 = vrot.slane %v1870_v17, 5  ;;  %v1875_v53 = vrot.slane %v1869_v31, 5  ;;  %v2431_v54 = vunpack.c.l.b16 %v2350_v39  ;;  %v2430_v55 = vunpack.c.l.b16 %v2349_v38  ;;  %v7033_v38 = vld [vmem:[%s10029_s2 + $0x60] ss:$16 sps:$4 sm:$0xff]   ;;  %v7036_v39 = vld [vmem:[%s10029_s2 + $0x68] ss:$16 sps:$4 sm:$0xff]  }
 0x123   :  { %1651 = vmatpush1.bf16.msra.mxu0 %v7015_v6  ;;  %1692 = vmatpush1.bf16.msra.mxu1 %v7018_v7  ;;  %v1880_v20 = vsel %vm879_vm1, %v1879_v46, %v8276_v27  ;;  %v1874_v57 = vsel %vm879_vm1, %v1873_v48, %v8280_v28  ;;  %v2433_v58 = vunpack.c.l.b16 %v2352_v50  ;;  %v2432_v59 = vunpack.c.l.b16 %v2351_v49  ;;  %v7027_v27 = vld [vmem:[%s10029_s2 + $0x80] ss:$16 sps:$4 sm:$0xff]   ;;  %v7030_v28 = vld [vmem:[%s10029_s2 + $0x88] ss:$16 sps:$4 sm:$0xff]  }
 0x124   :  { %1652 = vmatprep.subr.bf16.mxu0 %v7023_v22  ;;  %1693 = vmatprep.subr.bf16.mxu1 %v7026_v16  ;;  %v8395_v5 = vsel %vm882_vm2, %v1881_v15, %v1880_v20  ;;  %v8398_v61 = vsel %vm882_vm2, %v1875_v53, %v1874_v57  ;;  %v2442_v62 = vrot.slane %v2431_v54, 6  ;;  %v2436_v63 = vrot.slane %v2430_v55, 6  ;;  %v3426_v6 = vld [vmem:[#allocation2 + $0x35] ss:$8 sm:$0x3] }
 0x125   :  { %v2444_v2 = vrot.slane %v2433_v58, 5  ;;  %v2438_v3 = vrot.slane %v2432_v59, 5  ;;  %v8408_v7 = vsel %vm876_vm0, %v3566_v0, %v8294_v21  ;;  %v8412_v22 = vrot.slane %v8330_v47, %v8216_v25  ;;  %v7038_v0 = vld [vmem:[%s10029_s2 + $0x6c] ss:$16 sps:$4 sm:$0xff]   ;;  %v7039_v20 = vld [vmem:[%s10029_s2 + $0x40] ss:$16 sps:$4 sm:$0xff]  }
 0x126   :  { %v2443_v8 = vsel %vm879_vm1, %v2442_v62, %v8283_v29  ;;  %v2437_v9 = vsel %vm879_vm1, %v2436_v63, %v8286_v30  ;;  %v2887_v10 = vrot.slane %v2861_v14, %v8213_v24  ;;  %v2891_v11 = vrot.slane %v2861_v14, %v8216_v25  ;;  %v7035_v30 = vld [vmem:[%s10029_s2 + $0x64] ss:$16 sps:$4 sm:$0xff]   ;;  %v7042_v57 = vld [vmem:[%s10029_s2 + $0x48] ss:$16 sps:$4 sm:$0xff]  }
 0x127   :  { %1653 = vmatpush1.bf16.msra.mxu0 %v7021_v44  ;;  %1694 = vmatpush1.bf16.msra.mxu1 %v7024_v45  ;;  %v8421_v16 = vsel %vm882_vm2, %v2444_v2, %v2443_v8  ;;  %v8424_v21 = vsel %vm882_vm2, %v2438_v3, %v2437_v9  ;;  %v2895_v47 = vrot.slane %v2863_v19, %v8213_v24  ;;  %v8430_v29 = vunpack.c.l.b16 %v4035_v37 }
 0x128   :  { %1654 = vmatprep.subr.bf16.mxu0 %v7029_v51  ;;  %1695 = vmatprep.subr.bf16.mxu1 %v7032_v52  ;;  %v2899_v17 = vrot.slane %v2863_v19, %v8216_v25  ;;  %v3561_v31 = vsel %vm876_vm0, %v3560_v4, %v8296_v34  ;;  %v4599_v37 = vpack.c.bf16 %v8355_v60, %v8355_v60  ;;  %v7044_v52 = vld [vmem:[%s10029_s2 + $0x4c] ss:$16 sps:$4 sm:$0xff]  }
 0x129   :  { %v2912_v44 = vpack.c.bf16 %v2887_v10, %v2887_v10  ;;  %v2913_v35 = vpack.c.bf16 %v2891_v11, %v2891_v11  ;;  %v2914_v45 = vpack.c.bf16 %v2895_v47, %v2895_v47  ;;  %v3450_v34 = vrot.slane %v3424_v1, %v8213_v24  ;;  %v3987_v19 = vld [vmem:[#allocation2 + $0x26] ss:$8 sm:$0x3] }
 0x12a   :  { %v2915_v41 = vpack.c.bf16 %v2899_v17, %v2899_v17  ;;  %v3454_v4 = vrot.slane %v3424_v1, %v8216_v25  ;;  %v3458_v46 = vrot.slane %v3426_v6, %v8213_v24  ;;  %v3462_v48 = vrot.slane %v3426_v6, %v8216_v25  ;;  %v3989_v1 = vld [vmem:[#allocation2 + $0x36] ss:$8 sm:$0x3]  ;;  %v7045_v17 = vld [vmem:[%s10029_s2 + $0x20] ss:$16 sps:$4 sm:$0xff]  }
 0x12b   :  { %1655 = vmatpush1.bf16.msra.mxu0 %v7027_v27  ;;  %1696 = vmatpush1.bf16.msra.mxu1 %v7030_v28  ;;  %v2994_v49 = vunpack.c.l.b16 %v2913_v35  ;;  %v2993_v50 = vunpack.c.l.b16 %v2912_v44  ;;  %v2995_v14 = vunpack.c.l.b16 %v2914_v45  ;;  %v3475_v51 = vpack.c.bf16 %v3450_v34, %v3450_v34  ;;  %v7047_v11 = vld [vmem:[%s10029_s2 + $0x24] ss:$16 sps:$4 sm:$0xff]   ;;  %v7050_v47 = vld [vmem:[%s10029_s2 + $0x2c] ss:$16 sps:$4 sm:$0xff]  }
 0x12c   :  { %1656 = vmatprep.subr.bf16.mxu0 %v7035_v30  ;;  %1697 = vmatprep.subr.bf16.mxu1 %v7038_v0  ;;  %v2996_v15 = vunpack.c.l.b16 %v2915_v41  ;;  %v3476_v53 = vpack.c.bf16 %v3454_v4, %v3454_v4  ;;  %v3477_v54 = vpack.c.bf16 %v3458_v46, %v3458_v46  ;;  %v3478_v55 = vpack.c.bf16 %v3462_v48, %v3462_v48  ;;  %v4550_v41 = vld [vmem:[#allocation2 + $0x27] ss:$8 sm:$0x3] }
 0x12d   :  { %v3005_v58 = vrot.slane %v2994_v49, 6  ;;  %v2999_v59 = vrot.slane %v2993_v50, 6  ;;  %v3001_v62 = vrot.slane %v2995_v14, 5  ;;  %v3556_v63 = vunpack.c.l.b16 %v3475_v51  ;;  %v7053_v4 = vld [vmem:[%s10029_s2 + $0x4] ss:$16 sps:$4 sm:$0xff]  }
 0x12e   :  { %v3007_v27 = vrot.slane %v2996_v15, 5  ;;  %v3557_v28 = vunpack.c.l.b16 %v3476_v53  ;;  %v3559_v2 = vunpack.c.l.b16 %v3478_v55  ;;  %v3558_v3 = vunpack.c.l.b16 %v3477_v54  ;;  %v4552_v51 = vld [vmem:[#allocation2 + $0x37] ss:$8 sm:$0x3] }
 0x12f   :  { %1657 = vmatpush1.bf16.msra.mxu0 %v7033_v38  ;;  %1698 = vmatpush1.bf16.msra.mxu1 %v7036_v39  ;;  %v3006_v6 = vsel %vm879_vm1, %v3005_v58, %v8289_v32  ;;  %v3000_v8 = vsel %vm879_vm1, %v2999_v59, %v8292_v33  ;;  %v3562_v9 = vrot.slane %v3556_v63, 6  ;;  %v4013_v10 = vrot.slane %v3987_v19, %v8213_v24  ;;  %v7048_v38 = vld [vmem:[%s10029_s2 + $0x28] ss:$16 sps:$4 sm:$0xff]  }
 0x130   :  { %1658 = vmatprep.subr.bf16.mxu0 %v7041_v26  ;;  %1699 = vmatprep.subr.bf16.mxu1 %v7044_v52  ;;  %v8484_v30 = vsel %vm882_vm2, %v3007_v27, %v3006_v6  ;;  %v8487_v32 = vsel %vm882_vm2, %v3001_v62, %v3000_v8  ;;  %v4017_v33 = vrot.slane %v3987_v19, %v8216_v25  ;;  %v4117_v0 = vunpack.c.l.b16 %v4036_v40 }
 0x131   :  { %v3568_v39 = vrot.slane %v3557_v28, 6  ;;  %v3570_v44 = vrot.slane %v3559_v2, 5  ;;  %v4129_v35 = vrot.slane %v8446_v13, 7  ;;  %v4600_v45 = vpack.c.bf16 %v8412_v22, %v8412_v22  ;;  %v7057_v2 = vld [vmem:[%s10029_s2 + $0x1e0] ss:$16 sps:$4 sm:$0xff]  }
 0x132   :  { %v3563_v34 = vsel %vm879_vm1, %v3562_v9, %v3561_v31  ;;  %v3564_v26 = vrot.slane %v3558_v3, 5  ;;  %v4021_v18 = vrot.slane %v3989_v1, %v8213_v24  ;;  %v4025_v40 = vrot.slane %v3989_v1, %v8216_v25  ;;  %v7056_v31 = vld [vmem:[%s10029_s2 + $0xc] ss:$16 sps:$4 sm:$0xff]   ;;  %v7060_v3 = vld [vmem:[%s10029_s2 + $0x1e8] ss:$16 sps:$4 sm:$0xff]  }
 0x133   :  { %1659 = vmatpush1.bf16.msra.mxu0 %v7039_v20  ;;  %1700 = vmatpush1.bf16.msra.mxu1 %v7042_v57  ;;  %v3569_v13 = vsel %vm879_vm1, %v3568_v39, %v8408_v7  ;;  %v4038_v46 = vpack.c.bf16 %v4013_v10, %v4013_v10  ;;  %v4039_v48 = vpack.c.bf16 %v4017_v33, %v4017_v33  ;;  %v4115_v22 = vunpack.c.l.b16 %v4034_v36  ;;  %v7054_v36 = vld [vmem:[%s10029_s2 + $0x8] ss:$16 sps:$4 sm:$0xff]   ;;  %v7068_v39 = vld [vmem:[%s10029_s2 + $0x1cc] ss:$16 sps:$4 sm:$0xff]  }
 0x134   :  { %1660 = vmatprep.subr.bf16.mxu0 %v7047_v11  ;;  %1701 = vmatprep.subr.bf16.mxu1 %v7050_v47  ;;  %v8517_v49 = vsel %vm882_vm2, %v3570_v44, %v3569_v13  ;;  %v8520_v50 = vsel %vm882_vm2, %v3564_v26, %v3563_v34  ;;  %v4040_v14 = vpack.c.bf16 %v4021_v18, %v4021_v18  ;;  %v4123_v7 = vrot.slane %v4117_v0, 7  ;;  %v7063_v26 = vld [vmem:[%s10029_s2 + $0x1c0] ss:$16 sps:$4 sm:$0xff]   ;;  %v7066_v18 = vld [vmem:[%s10029_s2 + $0x1c8] ss:$16 sps:$4 sm:$0xff]  }
 0x135   :  { %v4041_v52 = vpack.c.bf16 %v4025_v40, %v4025_v40  ;;  %v4120_v15 = vunpack.c.l.b16 %v4039_v48  ;;  %v4597_v53 = vpack.c.bf16 %v8311_v42, %v8311_v42  ;;  %v4598_v54 = vpack.c.bf16 %v8314_v43, %v8314_v43  ;;  %v7059_v42 = vld [vmem:[%s10029_s2 + $0x1e4] ss:$16 sps:$4 sm:$0xff]   ;;  %v7062_v43 = vld [vmem:[%s10029_s2 + $0x1ec] ss:$16 sps:$4 sm:$0xff]  }
 0x136   :  { %v4130_v55 = vsel %vm876_vm0, %v4129_v35, %v8430_v29  ;;  %v4119_v19 = vunpack.c.l.b16 %v4038_v46  ;;  %v4121_v20 = vunpack.c.l.b16 %v4040_v14  ;;  %v4681_v57 = vunpack.c.l.b16 %v4600_v45 }
 0x137   :  { %1661 = vmatpush1.bf16.msra.mxu0 %v7045_v17  ;;  %1702 = vmatpush1.bf16.msra.mxu1 %v7048_v38  ;;  %v4122_v58 = vunpack.c.l.b16 %v4041_v52  ;;  %v4131_v59 = vrot.slane %v4120_v15, 6  ;;  %v4576_v62 = vrot.slane %v4550_v41, %v8213_v24  ;;  %v4580_v63 = vrot.slane %v4550_v41, %v8216_v25  ;;  %v7065_v38 = vld [vmem:[%s10029_s2 + $0x1c4] ss:$16 sps:$4 sm:$0xff]   ;;  %v7069_v52 = vld [vmem:[%s10029_s2 + $0x1a0] ss:$16 sps:$4 sm:$0xff]  }
 0x138   :  { %1662 = vmatprep.subr.bf16.mxu0 %v7053_v4  ;;  %1703 = vmatprep.subr.bf16.mxu1 %v7056_v31  ;;  %v4124_v29 = vsel %vm876_vm0, %v4123_v7, %v4115_v22  ;;  %v4584_v1 = vrot.slane %v4552_v51, %v8213_v24  ;;  %v4588_v27 = vrot.slane %v4552_v51, %v8216_v25  ;;  %v4680_v28 = vunpack.c.l.b16 %v4599_v37  ;;  %v7071_v7 = vld [vmem:[%s10029_s2 + $0x1a4] ss:$16 sps:$4 sm:$0xff]   ;;  %v7074_v51 = vld [vmem:[%s10029_s2 + $0x1ac] ss:$16 sps:$4 sm:$0xff]   ;;  %v7072_v15 = vld [vmem:[%s10029_s2 + $0x1a8] ss:$16 sps:$4 sm:$0xff]  }
 0x139   :  { %v4132_v6 = vsel %vm879_vm1, %v4131_v59, %v4130_v55  ;;  %v4133_v8 = vrot.slane %v4122_v58, 5  ;;  %v4125_v9 = vrot.slane %v4119_v19, 6  ;;  %v4127_v10 = vrot.slane %v4121_v20, 5  ;;  %v7077_v19 = vld [vmem:[%s10029_s2 + $0x184] ss:$16 sps:$4 sm:$0xff]  }
 0x13a   :  { %v4601_v11 = vpack.c.bf16 %v4576_v62, %v4576_v62  ;;  %v4602_v47 = vpack.c.bf16 %v4580_v63, %v4580_v63  ;;  %v4603_v33 = vpack.c.bf16 %v4584_v1, %v4584_v1  ;;  %v4604_v0 = vpack.c.bf16 %v4588_v27, %v4588_v27  ;;  %v7080_v20 = vld [vmem:[%s10029_s2 + $0x18c] ss:$16 sps:$4 sm:$0xff]   ;;  %v7078_v58 = vld [vmem:[%s10029_s2 + $0x188] ss:$16 sps:$4 sm:$0xff]   ;;  %v7083_v59 = vld [vmem:[%s10029_s2 + $0x164] ss:$16 sps:$4 sm:$0xff]  }
 0x13b   :  { %1663 = vmatpush1.bf16.msra.mxu0 %v7051_v12  ;;  %1704 = vmatpush1.bf16.msra.mxu1 %v7054_v36  ;;  %v8556_v60 = vsel %vm882_vm2, %v4133_v8, %v4132_v6  ;;  %v4126_v37 = vsel %vm879_vm1, %v4125_v9, %v4124_v29  ;;  %v4692_v17 = vrot.slane %v4681_v57, 7  ;;  %v4686_v34 = vrot.slane %v4680_v28, 7  ;;  %v7075_v57 = vld [vmem:[%s10029_s2 + $0x180] ss:$16 sps:$4 sm:$0xff]   ;;  %v7086_v62 = vld [vmem:[%s10029_s2 + $0x16c] ss:$16 sps:$4 sm:$0xff]  }
 0x13c   :  { %1664 = vmatprep.subr.bf16.mxu0 %v7059_v42  ;;  %1705 = vmatprep.subr.bf16.mxu1 %v7062_v43  ;;  %v8566_v44 = vsel %vm882_vm2, %v4127_v10, %v4126_v37  ;;  %v4683_v35 = vunpack.c.l.b16 %v4602_v47  ;;  %v4685_v45 = vunpack.c.l.b16 %v4604_v0  ;;  %v4679_v40 = vunpack.c.l.b16 %v4598_v54  ;;  %v7081_v63 = vld [vmem:[%s10029_s2 + $0x160] ss:$16 sps:$4 sm:$0xff]   ;;  %v7084_v42 = vld [vmem:[%s10029_s2 + $0x168] ss:$16 sps:$4 sm:$0xff]   ;;  %v7089_v43 = vld [vmem:[%s10029_s2 + $0x144] ss:$16 sps:$4 sm:$0xff]  }
 0x13d   :  { %v4682_v41 = vunpack.c.l.b16 %v4601_v11  ;;  %v4684_v4 = vunpack.c.l.b16 %v4603_v33  ;;  %v4678_v48 = vunpack.c.l.b16 %v4597_v53  ;;  %v7092_v29 = vld [vmem:[%s10029_s2 + $0x14c] ss:$16 sps:$4 sm:$0xff]   ;;  %v7087_v1 = vld [vmem:[%s10029_s2 + $0x140] ss:$16 sps:$4 sm:$0xff]   ;;  %v7090_v27 = vld [vmem:[%s10029_s2 + $0x148] ss:$16 sps:$4 sm:$0xff]  }
 0x13e   :  { %v4694_v13 = vrot.slane %v4683_v35, 6  ;;  %v4696_v46 = vrot.slane %v4685_v45, 5  ;;  %v4693_v22 = vsel %vm876_vm0, %v4692_v17, %v4679_v40  ;;  %v7095_v28 = vld [vmem:[%s10029_s2 + $0x124] ss:$16 sps:$4 sm:$0xff]   ;;  %v7096_v6 = vld [vmem:[%s10029_s2 + $0x128] ss:$16 sps:$4 sm:$0xff]  }
 0x13f   :  { %1665 = vmatpush2.bf16.msra.mxu0 %v7057_v2  ;;  %1706 = vmatpush2.bf16.msra.mxu1 %v7060_v3  ;;  %v4688_v31 = vrot.slane %v4682_v41, 6  ;;  %v4690_v14 = vrot.slane %v4684_v4, 5  ;;  %v4687_v36 = vsel %vm876_vm0, %v4686_v34, %v4678_v48  ;;  %v7098_v2 = vld [vmem:[%s10029_s2 + $0x12c] ss:$16 sps:$4 sm:$0xff]   ;;  %v7093_v3 = vld [vmem:[%s10029_s2 + $0x120] ss:$16 sps:$4 sm:$0xff]  }
 0x140   :  { %1666 = vmatprep.subr.bf16.mxu0 %v7065_v38  ;;  %1707 = vmatprep.subr.bf16.mxu1 %v7068_v39  ;;  %v4695_v12 = vsel %vm879_vm1, %v4694_v13, %v4693_v22  ;;  %v7101_v8 = vld [vmem:[%s10029_s2 + $0x104] ss:$16 sps:$4 sm:$0xff]   ;;  %v7104_v9 = vld [vmem:[%s10029_s2 + $0x10c] ss:$16 sps:$4 sm:$0xff]   ;;  %v7099_v10 = vld [vmem:[%s10029_s2 + $0x100] ss:$16 sps:$4 sm:$0xff]  }
 0x141   :  { %v8590_v53 = vsel %vm882_vm2, %v4696_v46, %v4695_v12  ;;  %v4689_v54 = vsel %vm879_vm1, %v4688_v31, %v4687_v36  ;;  %v7102_v11 = vld [vmem:[%s10029_s2 + $0x108] ss:$16 sps:$4 sm:$0xff]   ;;  %v7107_v47 = vld [vmem:[%s10029_s2 + $0x4e4] ss:$16 sps:$4 sm:$0xff]   ;;  %v7110_v33 = vld [vmem:[%s10029_s2 + $0x4ec] ss:$16 sps:$4 sm:$0xff]  }
 0x142   :  { %v8594_v55 = vsel %vm882_vm2, %v4690_v14, %v4689_v54  ;;  %v7105_v0 = vld [vmem:[%s10029_s2 + $0x4e0] ss:$16 sps:$4 sm:$0xff]  }
 0x143   :  { %1667 = vmatpush2.bf16.msra.mxu0 %v7063_v26  ;;  %1708 = vmatpush2.bf16.msra.mxu1 %v7066_v18 }
 0x144   :  { %1668 = vmatprep.subr.bf16.mxu0 %v7071_v7  ;;  %1709 = vmatprep.subr.bf16.mxu1 %v7074_v51 }
 0x147   :  { %1669 = vmatpush2.bf16.msra.mxu0 %v7069_v52  ;;  %1710 = vmatpush2.bf16.msra.mxu1 %v7072_v15 }
 0x148   :  { %1670 = vmatprep.subr.bf16.mxu0 %v7077_v19  ;;  %1711 = vmatprep.subr.bf16.mxu1 %v7080_v20 }
 0x14b   :  { %1671 = vmatpush2.bf16.msra.mxu0 %v7075_v57  ;;  %1712 = vmatpush2.bf16.msra.mxu1 %v7078_v58 }
 0x14c   :  { %1672 = vmatprep.subr.bf16.mxu0 %v7083_v59  ;;  %1713 = vmatprep.subr.bf16.mxu1 %v7086_v62 }
 0x14f   :  { %1673 = vmatpush2.bf16.msra.mxu0 %v7081_v63  ;;  %1714 = vmatpush2.bf16.msra.mxu1 %v7084_v42 }
 0x150   :  { %1674 = vmatprep.subr.bf16.mxu0 %v7089_v43  ;;  %1715 = vmatprep.subr.bf16.mxu1 %v7092_v29 }
 0x153   :  { %1675 = vmatpush2.bf16.msra.mxu0 %v7087_v1  ;;  %1716 = vmatpush2.bf16.msra.mxu1 %v7090_v27 }
 0x154   :  { %1676 = vmatprep.subr.bf16.mxu0 %v7095_v28  ;;  %1717 = vmatprep.subr.bf16.mxu1 %v7098_v2 }
 0x157   :  { %1677 = vmatpush2.bf16.msra.mxu0 %v7093_v3  ;;  %1718 = vmatpush2.bf16.msra.mxu1 %v7096_v6 }
 0x158   :  { %1678 = vmatprep.subr.bf16.mxu0 %v7101_v8  ;;  %1719 = vmatprep.subr.bf16.mxu1 %v7104_v9 }
 0x15b   :  { %1679 = vmatpush2.bf16.msra.mxu0 %v7099_v10  ;;  %1720 = vmatpush2.bf16.msra.mxu1 %v7102_v11 }
 0x15c   :  { %14 = vsyncpa [#allocation4], 0  ;;  %v1324_v37 = vpack.c.b16 %v8346_v56, %v8346_v56  ;;  %2207 = vmatprep.subr.bf16.mxu0 %v7107_v47  ;;  %v7108_v17 = vld [vmem:[%s10029_s2 + $0x4e8] ss:$16 sps:$4 sm:$0xff]   ;;  %2248 = vmatprep.subr.bf16.mxu1 %v7110_v33  ;;  %v1884_v38 = vpack.c.b16 %v8395_v5, %v8395_v5  ;;  %v7113_v39 = vld [vmem:[%s10029_s2 + $0x4c4] ss:$16 sps:$4 sm:$0xff]  }
 0x15d   :  { %v7116_v35 = vld [vmem:[%s10029_s2 + $0x4cc] ss:$16 sps:$4 sm:$0xff]   ;;  %v7111_v56 = vld [vmem:[%s10029_s2 + $0x4c0] ss:$16 sps:$4 sm:$0xff]   ;;  %v7114_v5 = vld [vmem:[%s10029_s2 + $0x4c8] ss:$16 sps:$4 sm:$0xff]  }
 0x15e   :  { %1681 = vmatmul.mubr.bf16.vlgmr.msra.gmra.mxu0 %v1324_v37  ;;  %1722 = vmatmul.mubr.bf16.vlgmr.msra.gmra.mxu1 %v1324_v37  ;;  %v7119_v45 = vld [vmem:[%s10029_s2 + $0x4a4] ss:$16 sps:$4 sm:$0xff]   ;;  %v7122_v34 = vld [vmem:[%s10029_s2 + $0x4ac] ss:$16 sps:$4 sm:$0xff]   ;;  %v7117_v26 = vld [vmem:[%s10029_s2 + $0x4a0] ss:$16 sps:$4 sm:$0xff]  }
 0x15f   :  { %2208 = vmatpush1.bf16.msra.mxu0 %v7105_v0  ;;  %2239 = vmatprep.mubr.bf16.mxu0 %v1884_v38  ;;  %v7120_v18 = vld [vmem:[%s10029_s2 + $0x4a8] ss:$16 sps:$4 sm:$0xff]   ;;  %v7125_v40 = vld [vmem:[%s10029_s2 + $0x484] ss:$16 sps:$4 sm:$0xff]   ;;  %v7128_v41 = vld [vmem:[%s10029_s2 + $0x48c] ss:$16 sps:$4 sm:$0xff]  }
 0x160   :  { %2249 = vmatpush1.bf16.msra.mxu1 %v7108_v17  ;;  %2280 = vmatprep.mubr.bf16.mxu1 %v1884_v38  ;;  %v7123_v4 = vld [vmem:[%s10029_s2 + $0x480] ss:$16 sps:$4 sm:$0xff]   ;;  %v7126_v13 = vld [vmem:[%s10029_s2 + $0x488] ss:$16 sps:$4 sm:$0xff]   ;;  %v7131_v46 = vld [vmem:[%s10029_s2 + $0x464] ss:$16 sps:$4 sm:$0xff]  }
 0x161   :  { %2209 = vmatprep.subr.bf16.mxu0 %v7113_v39  ;;  %2250 = vmatprep.subr.bf16.mxu1 %v7116_v35  ;;  %v7134_v48 = vld [vmem:[%s10029_s2 + $0x46c] ss:$16 sps:$4 sm:$0xff]   ;;  %v7129_v22 = vld [vmem:[%s10029_s2 + $0x460] ss:$16 sps:$4 sm:$0xff]   ;;  %v7132_v31 = vld [vmem:[%s10029_s2 + $0x468] ss:$16 sps:$4 sm:$0xff]  }
 0x162   :  { %v7137_v14 = vld [vmem:[%s10029_s2 + $0x444] ss:$16 sps:$4 sm:$0xff]   ;;  %v7140_v7 = vld [vmem:[%s10029_s2 + $0x44c] ss:$16 sps:$4 sm:$0xff]   ;;  %v7135_v51 = vld [vmem:[%s10029_s2 + $0x440] ss:$16 sps:$4 sm:$0xff]  }
 0x163   :  { %2210 = vmatpush1.bf16.msra.mxu0 %v7111_v56  ;;  %v7138_v12 = vld [vmem:[%s10029_s2 + $0x448] ss:$16 sps:$4 sm:$0xff]   ;;  %v7143_v36 = vld [vmem:[%s10029_s2 + $0x424] ss:$16 sps:$4 sm:$0xff]   ;;  %v7146_v52 = vld [vmem:[%s10029_s2 + $0x42c] ss:$16 sps:$4 sm:$0xff]  }
 0x164   :  { %2251 = vmatpush1.bf16.msra.mxu1 %v7114_v5  ;;  %2211 = vmatprep.subr.bf16.mxu0 %v7119_v45  ;;  %v7141_v15 = vld [vmem:[%s10029_s2 + $0x420] ss:$16 sps:$4 sm:$0xff]   ;;  %v7144_v54 = vld [vmem:[%s10029_s2 + $0x428] ss:$16 sps:$4 sm:$0xff]   ;;  %v7149_v19 = vld [vmem:[%s10029_s2 + $0x404] ss:$16 sps:$4 sm:$0xff]  }
 0x165   :  { %2252 = vmatprep.subr.bf16.mxu1 %v7122_v34  ;;  %v7152_v20 = vld [vmem:[%s10029_s2 + $0x40c] ss:$16 sps:$4 sm:$0xff]   ;;  %v7147_v57 = vld [vmem:[%s10029_s2 + $0x400] ss:$16 sps:$4 sm:$0xff]   ;;  %v7150_v58 = vld [vmem:[%s10029_s2 + $0x408] ss:$16 sps:$4 sm:$0xff]  }
 0x166   :  { %v7155_v59 = vld [vmem:[%s10029_s2 + $0x5e4] ss:$16 sps:$4 sm:$0xff]   ;;  %v7158_v62 = vld [vmem:[%s10029_s2 + $0x5ec] ss:$16 sps:$4 sm:$0xff]   ;;  %v7153_v63 = vld [vmem:[%s10029_s2 + $0x5e0] ss:$16 sps:$4 sm:$0xff]  }
 0x167   :  { %2212 = vmatpush1.bf16.msra.mxu0 %v7117_v26  ;;  %v7156_v42 = vld [vmem:[%s10029_s2 + $0x5e8] ss:$16 sps:$4 sm:$0xff]   ;;  %v7161_v43 = vld [vmem:[%s10029_s2 + $0x5c4] ss:$16 sps:$4 sm:$0xff]   ;;  %v7164_v29 = vld [vmem:[%s10029_s2 + $0x5cc] ss:$16 sps:$4 sm:$0xff]  }
 0x168   :  { %2253 = vmatpush1.bf16.msra.mxu1 %v7120_v18  ;;  %2213 = vmatprep.subr.bf16.mxu0 %v7125_v40  ;;  %v7159_v1 = vld [vmem:[%s10029_s2 + $0x5c0] ss:$16 sps:$4 sm:$0xff]   ;;  %v7162_v27 = vld [vmem:[%s10029_s2 + $0x5c8] ss:$16 sps:$4 sm:$0xff]   ;;  %v7167_v28 = vld [vmem:[%s10029_s2 + $0x5a4] ss:$16 sps:$4 sm:$0xff]  }
 0x169   :  { %2254 = vmatprep.subr.bf16.mxu1 %v7128_v41  ;;  %v7170_v2 = vld [vmem:[%s10029_s2 + $0x5ac] ss:$16 sps:$4 sm:$0xff]   ;;  %v7165_v3 = vld [vmem:[%s10029_s2 + $0x5a0] ss:$16 sps:$4 sm:$0xff]   ;;  %v7168_v6 = vld [vmem:[%s10029_s2 + $0x5a8] ss:$16 sps:$4 sm:$0xff]  }
 0x16a   :  { %v7173_v8 = vld [vmem:[%s10029_s2 + $0x584] ss:$16 sps:$4 sm:$0xff]   ;;  %v7176_v9 = vld [vmem:[%s10029_s2 + $0x58c] ss:$16 sps:$4 sm:$0xff]   ;;  %v7171_v10 = vld [vmem:[%s10029_s2 + $0x580] ss:$16 sps:$4 sm:$0xff]  }
 0x16b   :  { %2214 = vmatpush1.bf16.msra.mxu0 %v7123_v4  ;;  %v7174_v11 = vld [vmem:[%s10029_s2 + $0x588] ss:$16 sps:$4 sm:$0xff]   ;;  %v7179_v47 = vld [vmem:[%s10029_s2 + $0x564] ss:$16 sps:$4 sm:$0xff]   ;;  %v7182_v33 = vld [vmem:[%s10029_s2 + $0x56c] ss:$16 sps:$4 sm:$0xff]  }
 0x16c   :  { %2255 = vmatpush1.bf16.msra.mxu1 %v7126_v13  ;;  %2215 = vmatprep.subr.bf16.mxu0 %v7131_v46  ;;  %v7177_v0 = vld [vmem:[%s10029_s2 + $0x560] ss:$16 sps:$4 sm:$0xff]   ;;  %v7180_v37 = vld [vmem:[%s10029_s2 + $0x568] ss:$16 sps:$4 sm:$0xff]   ;;  %v7185_v17 = vld [vmem:[%s10029_s2 + $0x544] ss:$16 sps:$4 sm:$0xff]  }
 0x16d   :  { %2256 = vmatprep.subr.bf16.mxu1 %v7134_v48  ;;  %v7188_v38 = vld [vmem:[%s10029_s2 + $0x54c] ss:$16 sps:$4 sm:$0xff]   ;;  %v7183_v39 = vld [vmem:[%s10029_s2 + $0x540] ss:$16 sps:$4 sm:$0xff]   ;;  %v7186_v35 = vld [vmem:[%s10029_s2 + $0x548] ss:$16 sps:$4 sm:$0xff]   ;;  %v1883_v48 = vpack.c.b16 %v8398_v61, %v8398_v61 }
 0x16e   :  { %v7191_v56 = vld [vmem:[%s10029_s2 + $0x524] ss:$16 sps:$4 sm:$0xff]   ;;  %v7194_v5 = vld [vmem:[%s10029_s2 + $0x52c] ss:$16 sps:$4 sm:$0xff]   ;;  %v7189_v45 = vld [vmem:[%s10029_s2 + $0x520] ss:$16 sps:$4 sm:$0xff]  }
 0x16f   :  { %2216 = vmatpush1.bf16.msra.mxu0 %v7129_v22  ;;  %v7192_v34 = vld [vmem:[%s10029_s2 + $0x528] ss:$16 sps:$4 sm:$0xff]   ;;  %v7197_v26 = vld [vmem:[%s10029_s2 + $0x504] ss:$16 sps:$4 sm:$0xff]   ;;  %v7200_v18 = vld [vmem:[%s10029_s2 + $0x50c] ss:$16 sps:$4 sm:$0xff]  }
 0x170   :  { %2257 = vmatpush1.bf16.msra.mxu1 %v7132_v31  ;;  %2217 = vmatprep.subr.bf16.mxu0 %v7137_v14  ;;  %v7195_v40 = vld [vmem:[%s10029_s2 + $0x500] ss:$16 sps:$4 sm:$0xff]   ;;  %v7198_v41 = vld [vmem:[%s10029_s2 + $0x508] ss:$16 sps:$4 sm:$0xff]   ;;  %v7203_v4 = vld [vmem:[%s10029_s2 + $0x6e4] ss:$16 sps:$4 sm:$0xff]   ;;  %v2447_v14 = vpack.c.b16 %v8421_v16, %v8421_v16 }
 0x171   :  { %2258 = vmatprep.subr.bf16.mxu1 %v7140_v7  ;;  %v7206_v13 = vld [vmem:[%s10029_s2 + $0x6ec] ss:$16 sps:$4 sm:$0xff]   ;;  %v7201_v46 = vld [vmem:[%s10029_s2 + $0x6e0] ss:$16 sps:$4 sm:$0xff]   ;;  %v7204_v22 = vld [vmem:[%s10029_s2 + $0x6e8] ss:$16 sps:$4 sm:$0xff]  }
 0x172   :  { %v7209_v31 = vld [vmem:[%s10029_s2 + $0x6c4] ss:$16 sps:$4 sm:$0xff]   ;;  %v7212_v7 = vld [vmem:[%s10029_s2 + $0x6cc] ss:$16 sps:$4 sm:$0xff]   ;;  %v7207_v61 = vld [vmem:[%s10029_s2 + $0x6c0] ss:$16 sps:$4 sm:$0xff]  }
 0x173   :  { %2218 = vmatpush1.bf16.msra.mxu0 %v7135_v51  ;;  %v7210_v51 = vld [vmem:[%s10029_s2 + $0x6c8] ss:$16 sps:$4 sm:$0xff]   ;;  %v7215_v16 = vld [vmem:[%s10029_s2 + $0x6a4] ss:$16 sps:$4 sm:$0xff]   ;;  %vm7745_vm3 = vmmov 0   ;;  %vm5599_vm4 = vcmask 60416  }
 0x174   :  { %2259 = vmatpush1.bf16.msra.mxu1 %v7138_v12  ;;  %2219 = vmatprep.subr.bf16.mxu0 %v7143_v36  ;;  %v7218_v12 = vld [vmem:[%s10029_s2 + $0x6ac] ss:$16 sps:$4 sm:$0xff]   ;;  %v7213_v36 = vld [vmem:[%s10029_s2 + $0x6a0] ss:$16 sps:$4 sm:$0xff]   ;;  %vm5609_vm5 = vcmask 57344  }
 0x175   :  { %2260 = vmatprep.subr.bf16.mxu1 %v7146_v52  ;;  %v7216_v52 = vld [vmem:[%s10029_s2 + $0x6a8] ss:$16 sps:$4 sm:$0xff]  }
 0x177   :  { %2220 = vmatpush1.bf16.msra.mxu0 %v7141_v15  ;;  %v7221_v15 = vld [vmem:[%s10029_s2 + $0x684] ss:$16 sps:$4 sm:$0xff]  }
 0x178   :  { %2261 = vmatpush1.bf16.msra.mxu1 %v7144_v54  ;;  %2221 = vmatprep.subr.bf16.mxu0 %v7149_v19  ;;  %v7224_v54 = vld [vmem:[%s10029_s2 + $0x68c] ss:$16 sps:$4 sm:$0xff]   ;;  %v7219_v19 = vld [vmem:[%s10029_s2 + $0x680] ss:$16 sps:$4 sm:$0xff]  }
 0x179   :  { %2262 = vmatprep.subr.bf16.mxu1 %v7152_v20  ;;  %v7222_v20 = vld [vmem:[%s10029_s2 + $0x688] ss:$16 sps:$4 sm:$0xff]  }
 0x17b   :  { %2222 = vmatpush1.bf16.msra.mxu0 %v7147_v57  ;;  %v7227_v57 = vld [vmem:[%s10029_s2 + $0x664] ss:$16 sps:$4 sm:$0xff]  }
 0x17c   :  { %2263 = vmatpush1.bf16.msra.mxu1 %v7150_v58  ;;  %2223 = vmatprep.subr.bf16.mxu0 %v7155_v59  ;;  %v7230_v58 = vld [vmem:[%s10029_s2 + $0x66c] ss:$16 sps:$4 sm:$0xff]   ;;  %v7225_v59 = vld [vmem:[%s10029_s2 + $0x660] ss:$16 sps:$4 sm:$0xff]  }
 0x17d   :  { %2264 = vmatprep.subr.bf16.mxu1 %v7158_v62  ;;  %v7228_v62 = vld [vmem:[%s10029_s2 + $0x668] ss:$16 sps:$4 sm:$0xff]  }
 0x17f   :  { %2224 = vmatpush2.bf16.msra.mxu0 %v7153_v63  ;;  %v7233_v63 = vld [vmem:[%s10029_s2 + $0x644] ss:$16 sps:$4 sm:$0xff]  }
 0x180   :  { %2265 = vmatpush2.bf16.msra.mxu1 %v7156_v42  ;;  %2225 = vmatprep.subr.bf16.mxu0 %v7161_v43  ;;  %v7236_v42 = vld [vmem:[%s10029_s2 + $0x64c] ss:$16 sps:$4 sm:$0xff]   ;;  %v7231_v43 = vld [vmem:[%s10029_s2 + $0x640] ss:$16 sps:$4 sm:$0xff]  }
 0x181   :  { %2266 = vmatprep.subr.bf16.mxu1 %v7164_v29  ;;  %v7234_v29 = vld [vmem:[%s10029_s2 + $0x648] ss:$16 sps:$4 sm:$0xff]  }
 0x183   :  { %2226 = vmatpush2.bf16.msra.mxu0 %v7159_v1  ;;  %v7239_v1 = vld [vmem:[%s10029_s2 + $0x624] ss:$16 sps:$4 sm:$0xff]  }
 0x184   :  { %2267 = vmatpush2.bf16.msra.mxu1 %v7162_v27  ;;  %2227 = vmatprep.subr.bf16.mxu0 %v7167_v28  ;;  %v7242_v27 = vld [vmem:[%s10029_s2 + $0x62c] ss:$16 sps:$4 sm:$0xff]   ;;  %v7237_v28 = vld [vmem:[%s10029_s2 + $0x620] ss:$16 sps:$4 sm:$0xff]  }
 0x185   :  { %2268 = vmatprep.subr.bf16.mxu1 %v7170_v2  ;;  %v7240_v2 = vld [vmem:[%s10029_s2 + $0x628] ss:$16 sps:$4 sm:$0xff]  }
 0x187   :  { %2228 = vmatpush2.bf16.msra.mxu0 %v7165_v3  ;;  %v7245_v3 = vld [vmem:[%s10029_s2 + $0x604] ss:$16 sps:$4 sm:$0xff]  }
 0x188   :  { %2269 = vmatpush2.bf16.msra.mxu1 %v7168_v6  ;;  %2229 = vmatprep.subr.bf16.mxu0 %v7173_v8  ;;  %v7248_v6 = vld [vmem:[%s10029_s2 + $0x60c] ss:$16 sps:$4 sm:$0xff]   ;;  %v7243_v8 = vld [vmem:[%s10029_s2 + $0x600] ss:$16 sps:$4 sm:$0xff]  }
 0x189   :  { %2270 = vmatprep.subr.bf16.mxu1 %v7176_v9  ;;  %v7246_v9 = vld [vmem:[%s10029_s2 + $0x608] ss:$16 sps:$4 sm:$0xff]  }
 0x18b   :  { %2230 = vmatpush2.bf16.msra.mxu0 %v7171_v10  ;;  %v7251_v10 = vld [vmem:[%s10029_s2 + $0x7e4] ss:$16 sps:$4 sm:$0xff]  }
 0x18c   :  { %2271 = vmatpush2.bf16.msra.mxu1 %v7174_v11  ;;  %2231 = vmatprep.subr.bf16.mxu0 %v7179_v47  ;;  %v7254_v11 = vld [vmem:[%s10029_s2 + $0x7ec] ss:$16 sps:$4 sm:$0xff]   ;;  %v7249_v47 = vld [vmem:[%s10029_s2 + $0x7e0] ss:$16 sps:$4 sm:$0xff]  }
 0x18d   :  { %2272 = vmatprep.subr.bf16.mxu1 %v7182_v33  ;;  %v7252_v33 = vld [vmem:[%s10029_s2 + $0x7e8] ss:$16 sps:$4 sm:$0xff]  }
 0x18f   :  { %2232 = vmatpush2.bf16.msra.mxu0 %v7177_v0  ;;  %v7257_v0 = vld [vmem:[%s10029_s2 + $0x7c4] ss:$16 sps:$4 sm:$0xff]  }
 0x190   :  { %2273 = vmatpush2.bf16.msra.mxu1 %v7180_v37  ;;  %2233 = vmatprep.subr.bf16.mxu0 %v7185_v17  ;;  %v7260_v37 = vld [vmem:[%s10029_s2 + $0x7cc] ss:$16 sps:$4 sm:$0xff]   ;;  %v7255_v17 = vld [vmem:[%s10029_s2 + $0x7c0] ss:$16 sps:$4 sm:$0xff]  }
 0x191   :  { %2274 = vmatprep.subr.bf16.mxu1 %v7188_v38  ;;  %v7258_v38 = vld [vmem:[%s10029_s2 + $0x7c8] ss:$16 sps:$4 sm:$0xff]  }
 0x193   :  { %2234 = vmatpush2.bf16.msra.mxu0 %v7183_v39  ;;  %v7263_v39 = vld [vmem:[%s10029_s2 + $0x7a4] ss:$16 sps:$4 sm:$0xff]  }
 0x194   :  { %2275 = vmatpush2.bf16.msra.mxu1 %v7186_v35  ;;  %2235 = vmatprep.subr.bf16.mxu0 %v7191_v56  ;;  %v7266_v35 = vld [vmem:[%s10029_s2 + $0x7ac] ss:$16 sps:$4 sm:$0xff]   ;;  %v7261_v56 = vld [vmem:[%s10029_s2 + $0x7a0] ss:$16 sps:$4 sm:$0xff]  }
 0x195   :  { %2276 = vmatprep.subr.bf16.mxu1 %v7194_v5  ;;  %v7264_v5 = vld [vmem:[%s10029_s2 + $0x7a8] ss:$16 sps:$4 sm:$0xff]  }
 0x197   :  { %2236 = vmatpush2.bf16.msra.mxu0 %v7189_v45  ;;  %v7269_v45 = vld [vmem:[%s10029_s2 + $0x784] ss:$16 sps:$4 sm:$0xff]  }
 0x198   :  { %2277 = vmatpush2.bf16.msra.mxu1 %v7192_v34  ;;  %2237 = vmatprep.subr.bf16.mxu0 %v7197_v26  ;;  %v7272_v34 = vld [vmem:[%s10029_s2 + $0x78c] ss:$16 sps:$4 sm:$0xff]   ;;  %v7267_v26 = vld [vmem:[%s10029_s2 + $0x780] ss:$16 sps:$4 sm:$0xff]  }
 0x199   :  { %2278 = vmatprep.subr.bf16.mxu1 %v7200_v18  ;;  %v7270_v18 = vld [vmem:[%s10029_s2 + $0x788] ss:$16 sps:$4 sm:$0xff]  }
 0x19b   :  { %2238 = vmatpush2.bf16.msra.mxu0 %v7195_v40  ;;  %v7275_v40 = vld [vmem:[%s10029_s2 + $0x764] ss:$16 sps:$4 sm:$0xff]  }
 0x19c   :  { %2279 = vmatpush2.bf16.msra.mxu1 %v7198_v41  ;;  %2770 = vmatprep.subr.bf16.mxu0 %v7203_v4  ;;  %v7278_v41 = vld [vmem:[%s10029_s2 + $0x76c] ss:$16 sps:$4 sm:$0xff]   ;;  %v7273_v4 = vld [vmem:[%s10029_s2 + $0x760] ss:$16 sps:$4 sm:$0xff]  }
 0x19d   :  { %2811 = vmatprep.subr.bf16.mxu1 %v7206_v13  ;;  %v7276_v13 = vld [vmem:[%s10029_s2 + $0x768] ss:$16 sps:$4 sm:$0xff]  }
 0x19e   :  { %2240 = vmatmul.mubr.bf16.vlgmr.msra.gmra.mxu0 %v1883_v48 }
 0x19f   :  { %2281 = vmatmul.mubr.bf16.vlgmr.msra.gmra.mxu1 %v1883_v48  ;;  %2771 = vmatpush1.bf16.msra.mxu0 %v7201_v46  ;;  %v7281_v46 = vld [vmem:[%s10029_s2 + $0x744] ss:$16 sps:$4 sm:$0xff]   ;;  %v7284_v48 = vld [vmem:[%s10029_s2 + $0x74c] ss:$16 sps:$4 sm:$0xff]  }
 0x1a0   :  { %2802 = vmatprep.mubr.bf16.mxu0 %v2447_v14  ;;  %2812 = vmatpush1.bf16.msra.mxu1 %v7204_v22  ;;  %v7279_v22 = vld [vmem:[%s10029_s2 + $0x740] ss:$16 sps:$4 sm:$0xff]  }
 0x1a1   :  { %2843 = vmatprep.mubr.bf16.mxu1 %v2447_v14  ;;  %2772 = vmatprep.subr.bf16.mxu0 %v7209_v31  ;;  %v7282_v31 = vld [vmem:[%s10029_s2 + $0x748] ss:$16 sps:$4 sm:$0xff]   ;;  %v7287_v14 = vld [vmem:[%s10029_s2 + $0x724] ss:$16 sps:$4 sm:$0xff]  }
 0x1a2   :  { %2813 = vmatprep.subr.bf16.mxu1 %v7212_v7  ;;  %v7290_v7 = vld [vmem:[%s10029_s2 + $0x72c] ss:$16 sps:$4 sm:$0xff]  }
 0x1a3   :  { %2773 = vmatpush1.bf16.msra.mxu0 %v7207_v61  ;;  %v7285_v61 = vld [vmem:[%s10029_s2 + $0x720] ss:$16 sps:$4 sm:$0xff]  }
 0x1a4   :  { %2814 = vmatpush1.bf16.msra.mxu1 %v7210_v51  ;;  %2774 = vmatprep.subr.bf16.mxu0 %v7215_v16  ;;  %v7288_v51 = vld [vmem:[%s10029_s2 + $0x728] ss:$16 sps:$4 sm:$0xff]   ;;  %v7293_v16 = vld [vmem:[%s10029_s2 + $0x704] ss:$16 sps:$4 sm:$0xff]  }
 0x1a5   :  { %2815 = vmatprep.subr.bf16.mxu1 %v7218_v12  ;;  %v7296_v12 = vld [vmem:[%s10029_s2 + $0x70c] ss:$16 sps:$4 sm:$0xff]  }
 0x1a7   :  { %2775 = vmatpush1.bf16.msra.mxu0 %v7213_v36  ;;  %v7291_v36 = vld [vmem:[%s10029_s2 + $0x700] ss:$16 sps:$4 sm:$0xff]  }
 0x1a8   :  { %2816 = vmatpush1.bf16.msra.mxu1 %v7216_v52  ;;  %2776 = vmatprep.subr.bf16.mxu0 %v7221_v15  ;;  %v7294_v52 = vld [vmem:[%s10029_s2 + $0x708] ss:$16 sps:$4 sm:$0xff]   ;;  %v7299_v15 = vld [vmem:[%s10029_s2 + $0x8e4] ss:$16 sps:$4 sm:$0xff]  }
 0x1a9   :  { %2817 = vmatprep.subr.bf16.mxu1 %v7224_v54  ;;  %v7302_v54 = vld [vmem:[%s10029_s2 + $0x8ec] ss:$16 sps:$4 sm:$0xff]  }
 0x1ab   :  { %2777 = vmatpush1.bf16.msra.mxu0 %v7219_v19  ;;  %v7297_v19 = vld [vmem:[%s10029_s2 + $0x8e0] ss:$16 sps:$4 sm:$0xff]  }
 0x1ac   :  { %2818 = vmatpush1.bf16.msra.mxu1 %v7222_v20  ;;  %2778 = vmatprep.subr.bf16.mxu0 %v7227_v57  ;;  %v2446_v20 = vpack.c.b16 %v8424_v21, %v8424_v21  ;;  %v7300_v57 = vld [vmem:[%s10029_s2 + $0x8e8] ss:$16 sps:$4 sm:$0xff]   ;;  %v7308_v21 = vld [vmem:[%s10029_s2 + $0x8cc] ss:$16 sps:$4 sm:$0xff]  }
 0x1ad   :  { %2819 = vmatprep.subr.bf16.mxu1 %v7230_v58  ;;  %v7305_v58 = vld [vmem:[%s10029_s2 + $0x8c4] ss:$16 sps:$4 sm:$0xff]  }
 0x1af   :  { %2779 = vmatpush1.bf16.msra.mxu0 %v7225_v59 }
 0x1b0   :  { %2820 = vmatpush1.bf16.msra.mxu1 %v7228_v62  ;;  %2780 = vmatprep.subr.bf16.mxu0 %v7233_v63  ;;  %v3010_v63 = vpack.c.b16 %v8484_v30, %v8484_v30  ;;  %v7306_v30 = vld [vmem:[%s10029_s2 + $0x8c8] ss:$16 sps:$4 sm:$0xff]  }
 0x1b1   :  { %2821 = vmatprep.subr.bf16.mxu1 %v7236_v42  ;;  %v7303_v42 = vld [vmem:[%s10029_s2 + $0x8c0] ss:$16 sps:$4 sm:$0xff]  }
 0x1b3   :  { %2781 = vmatpush1.bf16.msra.mxu0 %v7231_v43 }
 0x1b4   :  { %2822 = vmatpush1.bf16.msra.mxu1 %v7234_v29  ;;  %2782 = vmatprep.subr.bf16.mxu0 %v7239_v1  ;;  %v7311_v1 = vld [vmem:[%s10029_s2 + $0x8a4] ss:$16 sps:$4 sm:$0xff]  }
 0x1b5   :  { %2823 = vmatprep.subr.bf16.mxu1 %v7242_v27  ;;  %v7314_v27 = vld [vmem:[%s10029_s2 + $0x8ac] ss:$16 sps:$4 sm:$0xff]  }
 0x1b7   :  { %2783 = vmatpush1.bf16.msra.mxu0 %v7237_v28 }
 0x1b8   :  { %2824 = vmatpush1.bf16.msra.mxu1 %v7240_v2  ;;  %2784 = vmatprep.subr.bf16.mxu0 %v7245_v3  ;;  %v7309_v3 = vld [vmem:[%s10029_s2 + $0x8a0] ss:$16 sps:$4 sm:$0xff]  }
 0x1b9   :  { %2825 = vmatprep.subr.bf16.mxu1 %v7248_v6 }
 0x1bb   :  { %2785 = vmatpush1.bf16.msra.mxu0 %v7243_v8 }
 0x1bc   :  { %2826 = vmatpush1.bf16.msra.mxu1 %v7246_v9  ;;  %2786 = vmatprep.subr.bf16.mxu0 %v7251_v10  ;;  %v7312_v9 = vld [vmem:[%s10029_s2 + $0x8a8] ss:$16 sps:$4 sm:$0xff]   ;;  %v7317_v10 = vld [vmem:[%s10029_s2 + $0x884] ss:$16 sps:$4 sm:$0xff]  }
 0x1bd   :  { %2827 = vmatprep.subr.bf16.mxu1 %v7254_v11  ;;  %v7320_v11 = vld [vmem:[%s10029_s2 + $0x88c] ss:$16 sps:$4 sm:$0xff]  }
 0x1bf   :  { %2787 = vmatpush2.bf16.msra.mxu0 %v7249_v47  ;;  %v7315_v47 = vld [vmem:[%s10029_s2 + $0x880] ss:$16 sps:$4 sm:$0xff]  }
 0x1c0   :  { %2828 = vmatpush2.bf16.msra.mxu1 %v7252_v33  ;;  %2788 = vmatprep.subr.bf16.mxu0 %v7257_v0  ;;  %v7318_v33 = vld [vmem:[%s10029_s2 + $0x888] ss:$16 sps:$4 sm:$0xff]   ;;  %v7323_v0 = vld [vmem:[%s10029_s2 + $0x864] ss:$16 sps:$4 sm:$0xff]  }
 0x1c1   :  { %2829 = vmatprep.subr.bf16.mxu1 %v7260_v37  ;;  %v7326_v37 = vld [vmem:[%s10029_s2 + $0x86c] ss:$16 sps:$4 sm:$0xff]  }
 0x1c3   :  { %2789 = vmatpush2.bf16.msra.mxu0 %v7255_v17  ;;  %v7321_v17 = vld [vmem:[%s10029_s2 + $0x860] ss:$16 sps:$4 sm:$0xff]  }
 0x1c4   :  { %2830 = vmatpush2.bf16.msra.mxu1 %v7258_v38  ;;  %2790 = vmatprep.subr.bf16.mxu0 %v7263_v39  ;;  %v7324_v38 = vld [vmem:[%s10029_s2 + $0x868] ss:$16 sps:$4 sm:$0xff]   ;;  %v7329_v39 = vld [vmem:[%s10029_s2 + $0x844] ss:$16 sps:$4 sm:$0xff]  }
 0x1c5   :  { %2831 = vmatprep.subr.bf16.mxu1 %v7266_v35  ;;  %v7332_v35 = vld [vmem:[%s10029_s2 + $0x84c] ss:$16 sps:$4 sm:$0xff]  }
 0x1c7   :  { %2791 = vmatpush2.bf16.msra.mxu0 %v7261_v56  ;;  %v7327_v56 = vld [vmem:[%s10029_s2 + $0x840] ss:$16 sps:$4 sm:$0xff]  }
 0x1c8   :  { %2832 = vmatpush2.bf16.msra.mxu1 %v7264_v5  ;;  %2792 = vmatprep.subr.bf16.mxu0 %v7269_v45  ;;  %v7330_v5 = vld [vmem:[%s10029_s2 + $0x848] ss:$16 sps:$4 sm:$0xff]   ;;  %v7335_v45 = vld [vmem:[%s10029_s2 + $0x824] ss:$16 sps:$4 sm:$0xff]  }
 0x1c9   :  { %2833 = vmatprep.subr.bf16.mxu1 %v7272_v34  ;;  %v7338_v34 = vld [vmem:[%s10029_s2 + $0x82c] ss:$16 sps:$4 sm:$0xff]  }
 0x1cb   :  { %2793 = vmatpush2.bf16.msra.mxu0 %v7267_v26  ;;  %v7333_v26 = vld [vmem:[%s10029_s2 + $0x820] ss:$16 sps:$4 sm:$0xff]  }
 0x1cc   :  { %2834 = vmatpush2.bf16.msra.mxu1 %v7270_v18  ;;  %2794 = vmatprep.subr.bf16.mxu0 %v7275_v40  ;;  %v7336_v18 = vld [vmem:[%s10029_s2 + $0x828] ss:$16 sps:$4 sm:$0xff]   ;;  %v7341_v40 = vld [vmem:[%s10029_s2 + $0x804] ss:$16 sps:$4 sm:$0xff]  }
 0x1cd   :  { %2835 = vmatprep.subr.bf16.mxu1 %v7278_v41  ;;  %v7344_v41 = vld [vmem:[%s10029_s2 + $0x80c] ss:$16 sps:$4 sm:$0xff]  }
 0x1cf   :  { %2795 = vmatpush2.bf16.msra.mxu0 %v7273_v4  ;;  %v7339_v4 = vld [vmem:[%s10029_s2 + $0x800] ss:$16 sps:$4 sm:$0xff]  }
 0x1d0   :  { %2836 = vmatpush2.bf16.msra.mxu1 %v7276_v13  ;;  %2796 = vmatprep.subr.bf16.mxu0 %v7281_v46  ;;  %v7342_v13 = vld [vmem:[%s10029_s2 + $0x808] ss:$16 sps:$4 sm:$0xff]   ;;  %v7347_v46 = vld [vmem:[%s10029_s2 + $0x9e4] ss:$16 sps:$4 sm:$0xff]  }
 0x1d1   :  { %2837 = vmatprep.subr.bf16.mxu1 %v7284_v48  ;;  %v7350_v48 = vld [vmem:[%s10029_s2 + $0x9ec] ss:$16 sps:$4 sm:$0xff]  }
 0x1d3   :  { %2797 = vmatpush2.bf16.msra.mxu0 %v7279_v22  ;;  %v7345_v22 = vld [vmem:[%s10029_s2 + $0x9e0] ss:$16 sps:$4 sm:$0xff]  }
 0x1d4   :  { %2838 = vmatpush2.bf16.msra.mxu1 %v7282_v31  ;;  %2798 = vmatprep.subr.bf16.mxu0 %v7287_v14  ;;  %v7348_v31 = vld [vmem:[%s10029_s2 + $0x9e8] ss:$16 sps:$4 sm:$0xff]   ;;  %v7353_v14 = vld [vmem:[%s10029_s2 + $0x9c4] ss:$16 sps:$4 sm:$0xff]  }
 0x1d5   :  { %2839 = vmatprep.subr.bf16.mxu1 %v7290_v7  ;;  %v7356_v7 = vld [vmem:[%s10029_s2 + $0x9cc] ss:$16 sps:$4 sm:$0xff]  }
 0x1d7   :  { %2799 = vmatpush2.bf16.msra.mxu0 %v7285_v61  ;;  %v7351_v61 = vld [vmem:[%s10029_s2 + $0x9c0] ss:$16 sps:$4 sm:$0xff]  }
 0x1d8   :  { %2840 = vmatpush2.bf16.msra.mxu1 %v7288_v51  ;;  %2800 = vmatprep.subr.bf16.mxu0 %v7293_v16  ;;  %v7354_v51 = vld [vmem:[%s10029_s2 + $0x9c8] ss:$16 sps:$4 sm:$0xff]   ;;  %v7359_v16 = vld [vmem:[%s10029_s2 + $0x9a4] ss:$16 sps:$4 sm:$0xff]  }
 0x1d9   :  { %2841 = vmatprep.subr.bf16.mxu1 %v7296_v12  ;;  %v7362_v12 = vld [vmem:[%s10029_s2 + $0x9ac] ss:$16 sps:$4 sm:$0xff]  }
 0x1db   :  { %2801 = vmatpush2.bf16.msra.mxu0 %v7291_v36  ;;  %v7357_v36 = vld [vmem:[%s10029_s2 + $0x9a0] ss:$16 sps:$4 sm:$0xff]  }
 0x1dc   :  { %2842 = vmatpush2.bf16.msra.mxu1 %v7294_v52  ;;  %3333 = vmatprep.subr.bf16.mxu0 %v7299_v15  ;;  %v7360_v52 = vld [vmem:[%s10029_s2 + $0x9a8] ss:$16 sps:$4 sm:$0xff]   ;;  %v7365_v15 = vld [vmem:[%s10029_s2 + $0x984] ss:$16 sps:$4 sm:$0xff]  }
 0x1dd   :  { %3374 = vmatprep.subr.bf16.mxu1 %v7302_v54  ;;  %v7368_v54 = vld [vmem:[%s10029_s2 + $0x98c] ss:$16 sps:$4 sm:$0xff]  }
 0x1de   :  { %2803 = vmatmul.mubr.bf16.vlgmr.msra.gmra.mxu0 %v2446_v20  ;;  %v9065_v59 = vpop.f32.mrf.mxu0  ;;  %v9067_v62 = vpop.f32.mrf.mxu1 }
 0x1df   :  { %2844 = vmatmul.mubr.bf16.vlgmr.msra.gmra.mxu1 %v2446_v20  ;;  %3334 = vmatpush1.bf16.msra.mxu0 %v7297_v19  ;;  %v7363_v19 = vld [vmem:[%s10029_s2 + $0x980] ss:$16 sps:$4 sm:$0xff]   ;;  %v7366_v20 = vld [vmem:[%s10029_s2 + $0x988] ss:$16 sps:$4 sm:$0xff]  }
 0x1e0   :  { %3365 = vmatprep.mubr.bf16.mxu0 %v3010_v63  ;;  %3375 = vmatpush1.bf16.msra.mxu1 %v7300_v57  ;;  %v9077_v43 = vpop.f32.mrf.mxu0  ;;  %v9079_v29 = vpop.f32.mrf.mxu1  ;;  %v7371_v57 = vld [vmem:[%s10029_s2 + $0x964] ss:$16 sps:$4 sm:$0xff]  }
 0x1e1   :  { %3406 = vmatprep.mubr.bf16.mxu1 %v3010_v63  ;;  %3335 = vmatprep.subr.bf16.mxu0 %v7305_v58  ;;  %v7374_v58 = vld [vmem:[%s10029_s2 + $0x96c] ss:$16 sps:$4 sm:$0xff]   ;;  %v7369_v63 = vld [vmem:[%s10029_s2 + $0x960] ss:$16 sps:$4 sm:$0xff]  }
 0x1e2   :  { %3376 = vmatprep.subr.bf16.mxu1 %v7308_v21  ;;  %v1252_v28 = vpop.f32.mrf.mxu0  ;;  %v1293_v2 = vpop.f32.mrf.mxu1  ;;  %v7372_v21 = vld [vmem:[%s10029_s2 + $0x968] ss:$16 sps:$4 sm:$0xff]  }
 0x1e3   :  { %3336 = vmatpush1.bf16.msra.mxu0 %v7303_v42  ;;  %v7377_v42 = vld [vmem:[%s10029_s2 + $0x944] ss:$16 sps:$4 sm:$0xff]   ;;  %v7386_v2 = vld [vmem:[%s10029_s2 + $0x92c] ss:$16 sps:$4 sm:$0xff]  }
 0x1e4   :  { %3377 = vmatpush1.bf16.msra.mxu1 %v7306_v30  ;;  %v1253_v6 = vpop.f32.mrf.mxu0  ;;  %v1294_v8 = vpop.f32.mrf.mxu1  ;;  %3337 = vmatprep.subr.bf16.mxu0 %v7311_v1  ;;  %v7380_v30 = vld [vmem:[%s10029_s2 + $0x94c] ss:$16 sps:$4 sm:$0xff]   ;;  %v7375_v1 = vld [vmem:[%s10029_s2 + $0x940] ss:$16 sps:$4 sm:$0xff]   ;;  %v7383_v28 = vld [vmem:[%s10029_s2 + $0x924] ss:$16 sps:$4 sm:$0xff]  }
 0x1e5   :  { %3378 = vmatprep.subr.bf16.mxu1 %v7314_v27  ;;  %v7378_v27 = vld [vmem:[%s10029_s2 + $0x948] ss:$16 sps:$4 sm:$0xff]   ;;  %v7389_v8 = vld [vmem:[%s10029_s2 + $0x904] ss:$16 sps:$4 sm:$0xff]  }
 0x1e6   :  { %v7384_v6 = vld [vmem:[%s10029_s2 + $0x928] ss:$16 sps:$4 sm:$0xff]  }
 0x1e7   :  { %3338 = vmatpush1.bf16.msra.mxu0 %v7309_v3  ;;  %v7381_v3 = vld [vmem:[%s10029_s2 + $0x920] ss:$16 sps:$4 sm:$0xff]  }
 0x1e8   :  { %3379 = vmatpush1.bf16.msra.mxu1 %v7312_v9  ;;  %3339 = vmatprep.subr.bf16.mxu0 %v7317_v10  ;;  %v7392_v9 = vld [vmem:[%s10029_s2 + $0x90c] ss:$16 sps:$4 sm:$0xff]   ;;  %v7387_v10 = vld [vmem:[%s10029_s2 + $0x900] ss:$16 sps:$4 sm:$0xff]  }
 0x1e9   :  { %3380 = vmatprep.subr.bf16.mxu1 %v7320_v11  ;;  %v7390_v11 = vld [vmem:[%s10029_s2 + $0x908] ss:$16 sps:$4 sm:$0xff]  }
 0x1eb   :  { %3340 = vmatpush1.bf16.msra.mxu0 %v7315_v47  ;;  %v7395_v47 = vld [vmem:[%s10029_s2 + $0xae4] ss:$16 sps:$4 sm:$0xff]  }
 0x1ec   :  { %3381 = vmatpush1.bf16.msra.mxu1 %v7318_v33  ;;  %3341 = vmatprep.subr.bf16.mxu0 %v7323_v0  ;;  %v7398_v33 = vld [vmem:[%s10029_s2 + $0xaec] ss:$16 sps:$4 sm:$0xff]   ;;  %v7393_v0 = vld [vmem:[%s10029_s2 + $0xae0] ss:$16 sps:$4 sm:$0xff]  }
 0x1ed   :  { %3382 = vmatprep.subr.bf16.mxu1 %v7326_v37  ;;  %v3009_v37 = vpack.c.b16 %v8487_v32, %v8487_v32  ;;  %v7404_v32 = vld [vmem:[%s10029_s2 + $0xacc] ss:$16 sps:$4 sm:$0xff]  }
 0x1ef   :  { %3342 = vmatpush1.bf16.msra.mxu0 %v7321_v17  ;;  %v7396_v17 = vld [vmem:[%s10029_s2 + $0xae8] ss:$16 sps:$4 sm:$0xff]  }
 0x1f0   :  { %3383 = vmatpush1.bf16.msra.mxu1 %v7324_v38  ;;  %3343 = vmatprep.subr.bf16.mxu0 %v7329_v39  ;;  %v7401_v38 = vld [vmem:[%s10029_s2 + $0xac4] ss:$16 sps:$4 sm:$0xff]  }
 0x1f1   :  { %3384 = vmatprep.subr.bf16.mxu1 %v7332_v35 }
 0x1f3   :  { %3344 = vmatpush1.bf16.msra.mxu0 %v7327_v56  ;;  %v3573_v56 = vpack.c.b16 %v8517_v49, %v8517_v49 }
 0x1f4   :  { %3385 = vmatpush1.bf16.msra.mxu1 %v7330_v5  ;;  %3345 = vmatprep.subr.bf16.mxu0 %v7335_v45 }
 0x1f5   :  { %3386 = vmatprep.subr.bf16.mxu1 %v7338_v34  ;;  %v7399_v34 = vld [vmem:[%s10029_s2 + $0xac0] ss:$16 sps:$4 sm:$0xff]  }
 0x1f7   :  { %3346 = vmatpush1.bf16.msra.mxu0 %v7333_v26 }
 0x1f8   :  { %3387 = vmatpush1.bf16.msra.mxu1 %v7336_v18  ;;  %3347 = vmatprep.subr.bf16.mxu0 %v7341_v40  ;;  %v7402_v18 = vld [vmem:[%s10029_s2 + $0xac8] ss:$16 sps:$4 sm:$0xff]  }
 0x1f9   :  { %3388 = vmatprep.subr.bf16.mxu1 %v7344_v41  ;;  %v7410_v41 = vld [vmem:[%s10029_s2 + $0xaac] ss:$16 sps:$4 sm:$0xff]  }
 0x1fb   :  { %3348 = vmatpush1.bf16.msra.mxu0 %v7339_v4 }
 0x1fc   :  { %3389 = vmatpush1.bf16.msra.mxu1 %v7342_v13  ;;  %3349 = vmatprep.subr.bf16.mxu0 %v7347_v46  ;;  %v7405_v46 = vld [vmem:[%s10029_s2 + $0xaa0] ss:$16 sps:$4 sm:$0xff]  }
 0x1fd   :  { %3390 = vmatprep.subr.bf16.mxu1 %v7350_v48 }
 0x1ff   :  { %3350 = vmatpush2.bf16.msra.mxu0 %v7345_v22  ;;  %v7413_v22 = vld [vmem:[%s10029_s2 + $0xa84] ss:$16 sps:$4 sm:$0xff]  }
 0x200   :  { %3391 = vmatpush2.bf16.msra.mxu1 %v7348_v31  ;;  %3351 = vmatprep.subr.bf16.mxu0 %v7353_v14  ;;  %v7416_v31 = vld [vmem:[%s10029_s2 + $0xa8c] ss:$16 sps:$4 sm:$0xff]   ;;  %v7411_v14 = vld [vmem:[%s10029_s2 + $0xa80] ss:$16 sps:$4 sm:$0xff]  }
 0x201   :  { %3392 = vmatprep.subr.bf16.mxu1 %v7356_v7  ;;  %v7414_v7 = vld [vmem:[%s10029_s2 + $0xa88] ss:$16 sps:$4 sm:$0xff]  }
 0x203   :  { %3352 = vmatpush2.bf16.msra.mxu0 %v7351_v61  ;;  %v7419_v61 = vld [vmem:[%s10029_s2 + $0xa64] ss:$16 sps:$4 sm:$0xff]  }
 0x204   :  { %3393 = vmatpush2.bf16.msra.mxu1 %v7354_v51  ;;  %3353 = vmatprep.subr.bf16.mxu0 %v7359_v16  ;;  %v7422_v51 = vld [vmem:[%s10029_s2 + $0xa6c] ss:$16 sps:$4 sm:$0xff]   ;;  %v7417_v16 = vld [vmem:[%s10029_s2 + $0xa60] ss:$16 sps:$4 sm:$0xff]  }
 0x205   :  { %3394 = vmatprep.subr.bf16.mxu1 %v7362_v12  ;;  %v7420_v12 = vld [vmem:[%s10029_s2 + $0xa68] ss:$16 sps:$4 sm:$0xff]  }
 0x207   :  { %3354 = vmatpush2.bf16.msra.mxu0 %v7357_v36  ;;  %v7425_v36 = vld [vmem:[%s10029_s2 + $0xa44] ss:$16 sps:$4 sm:$0xff]  }
 0x208   :  { %3395 = vmatpush2.bf16.msra.mxu1 %v7360_v52  ;;  %3355 = vmatprep.subr.bf16.mxu0 %v7365_v15  ;;  %v7428_v52 = vld [vmem:[%s10029_s2 + $0xa4c] ss:$16 sps:$4 sm:$0xff]   ;;  %v7423_v15 = vld [vmem:[%s10029_s2 + $0xa40] ss:$16 sps:$4 sm:$0xff]  }
 0x209   :  { %3396 = vmatprep.subr.bf16.mxu1 %v7368_v54  ;;  %v7426_v54 = vld [vmem:[%s10029_s2 + $0xa48] ss:$16 sps:$4 sm:$0xff]  }
 0x20b   :  { %3356 = vmatpush2.bf16.msra.mxu0 %v7363_v19  ;;  %v7431_v19 = vld [vmem:[%s10029_s2 + $0xa24] ss:$16 sps:$4 sm:$0xff]  }
 0x20c   :  { %3397 = vmatpush2.bf16.msra.mxu1 %v7366_v20  ;;  %3357 = vmatprep.subr.bf16.mxu0 %v7371_v57  ;;  %v7434_v20 = vld [vmem:[%s10029_s2 + $0xa2c] ss:$16 sps:$4 sm:$0xff]   ;;  %v7429_v57 = vld [vmem:[%s10029_s2 + $0xa20] ss:$16 sps:$4 sm:$0xff]  }
 0x20d   :  { %3398 = vmatprep.subr.bf16.mxu1 %v7374_v58  ;;  %v7432_v58 = vld [vmem:[%s10029_s2 + $0xa28] ss:$16 sps:$4 sm:$0xff]  }
 0x20f   :  { %3358 = vmatpush2.bf16.msra.mxu0 %v7369_v63  ;;  %v7437_v63 = vld [vmem:[%s10029_s2 + $0xa04] ss:$16 sps:$4 sm:$0xff]  }
 0x210   :  { %3399 = vmatpush2.bf16.msra.mxu1 %v7372_v21  ;;  %3359 = vmatprep.subr.bf16.mxu0 %v7377_v42  ;;  %v7440_v21 = vld [vmem:[%s10029_s2 + $0xa0c] ss:$16 sps:$4 sm:$0xff]   ;;  %v7435_v42 = vld [vmem:[%s10029_s2 + $0xa00] ss:$16 sps:$4 sm:$0xff]  }
 0x211   :  { %3400 = vmatprep.subr.bf16.mxu1 %v7380_v30  ;;  %v7438_v30 = vld [vmem:[%s10029_s2 + $0xa08] ss:$16 sps:$4 sm:$0xff]  }
 0x213   :  { %3360 = vmatpush2.bf16.msra.mxu0 %v7375_v1  ;;  %v7443_v1 = vld [vmem:[%s10029_s2 + $0xbe4] ss:$16 sps:$4 sm:$0xff]  }
 0x214   :  { %3401 = vmatpush2.bf16.msra.mxu1 %v7378_v27  ;;  %3361 = vmatprep.subr.bf16.mxu0 %v7383_v28  ;;  %v7446_v27 = vld [vmem:[%s10029_s2 + $0xbec] ss:$16 sps:$4 sm:$0xff]   ;;  %v7441_v28 = vld [vmem:[%s10029_s2 + $0xbe0] ss:$16 sps:$4 sm:$0xff]  }
 0x215   :  { %3402 = vmatprep.subr.bf16.mxu1 %v7386_v2  ;;  %v7444_v2 = vld [vmem:[%s10029_s2 + $0xbe8] ss:$16 sps:$4 sm:$0xff]  }
 0x217   :  { %3362 = vmatpush2.bf16.msra.mxu0 %v7381_v3  ;;  %v7449_v3 = vld [vmem:[%s10029_s2 + $0xbc4] ss:$16 sps:$4 sm:$0xff]  }
 0x218   :  { %3403 = vmatpush2.bf16.msra.mxu1 %v7384_v6  ;;  %3363 = vmatprep.subr.bf16.mxu0 %v7389_v8  ;;  %v7452_v6 = vld [vmem:[%s10029_s2 + $0xbcc] ss:$16 sps:$4 sm:$0xff]   ;;  %v7447_v8 = vld [vmem:[%s10029_s2 + $0xbc0] ss:$16 sps:$4 sm:$0xff]  }
 0x219   :  { %3404 = vmatprep.subr.bf16.mxu1 %v7392_v9  ;;  %v7450_v9 = vld [vmem:[%s10029_s2 + $0xbc8] ss:$16 sps:$4 sm:$0xff]  }
 0x21b   :  { %3364 = vmatpush2.bf16.msra.mxu0 %v7387_v10  ;;  %v7455_v10 = vld [vmem:[%s10029_s2 + $0xba4] ss:$16 sps:$4 sm:$0xff]  }
 0x21c   :  { %3405 = vmatpush2.bf16.msra.mxu1 %v7390_v11  ;;  %3896 = vmatprep.subr.bf16.mxu0 %v7395_v47  ;;  %v7458_v11 = vld [vmem:[%s10029_s2 + $0xbac] ss:$16 sps:$4 sm:$0xff]   ;;  %v7453_v47 = vld [vmem:[%s10029_s2 + $0xba0] ss:$16 sps:$4 sm:$0xff]  }
 0x21d   :  { %3937 = vmatprep.subr.bf16.mxu1 %v7398_v33  ;;  %v7456_v33 = vld [vmem:[%s10029_s2 + $0xba8] ss:$16 sps:$4 sm:$0xff]  }
 0x21e   :  { %v1682_v39 = vpop.f32.mrf.mxu0  ;;  %v1723_v35 = vpop.f32.mrf.mxu1  ;;  %3366 = vmatmul.mubr.bf16.vlgmr.msra.gmra.mxu0 %v3009_v37 }
 0x21f   :  { %v9275_v5 = vadd.f32 %v1682_v39, %v9065_v59  ;;  %v9278_v45 = vadd.f32 %v1723_v35, %v9067_v62  ;;  %3407 = vmatmul.mubr.bf16.vlgmr.msra.gmra.mxu1 %v3009_v37  ;;  %3897 = vmatpush1.bf16.msra.mxu0 %v7393_v0  ;;  %v7407_v59 = vld [vmem:[%s10029_s2 + $0xaa4] ss:$16 sps:$4 sm:$0xff]   ;;  %v7464_v37 = vld [vmem:[%s10029_s2 + $0xb8c] ss:$16 sps:$4 sm:$0xff]  }
 0x220   :  { %3928 = vmatprep.mubr.bf16.mxu0 %v3573_v56  ;;  %3938 = vmatpush1.bf16.msra.mxu1 %v7396_v17  ;;  %v1684_v26 = vpop.f32.mrf.mxu0  ;;  %v1725_v49 = vpop.f32.mrf.mxu1  ;;  %v7461_v0 = vld [vmem:[%s10029_s2 + $0xb84] ss:$16 sps:$4 sm:$0xff]   ;;  %v7459_v17 = vld [vmem:[%s10029_s2 + $0xb80] ss:$16 sps:$4 sm:$0xff]   ;;  %v7470_v35 = vld [vmem:[%s10029_s2 + $0xb6c] ss:$16 sps:$4 sm:$0xff]  }
 0x221   :  { %3969 = vmatprep.mubr.bf16.mxu1 %v3573_v56  ;;  %v9290_v62 = vadd.f32 %v1684_v26, %v9077_v43  ;;  %v9293_v40 = vadd.f32 %v1725_v49, %v9079_v29  ;;  %3898 = vmatprep.subr.bf16.mxu0 %v7401_v38  ;;  %v7408_v29 = vld [vmem:[%s10029_s2 + $0xaa8] ss:$16 sps:$4 sm:$0xff]   ;;  %v7467_v39 = vld [vmem:[%s10029_s2 + $0xb64] ss:$16 sps:$4 sm:$0xff]   ;;  %v7465_v56 = vld [vmem:[%s10029_s2 + $0xb60] ss:$16 sps:$4 sm:$0xff]  }
 0x222   :  { %v1686_v4 = vpop.f32.mrf.mxu0  ;;  %v1727_v13 = vpop.f32.mrf.mxu1  ;;  %3939 = vmatprep.subr.bf16.mxu1 %v7404_v32  ;;  %v7462_v38 = vld [vmem:[%s10029_s2 + $0xb88] ss:$16 sps:$4 sm:$0xff]   ;;  %v7476_v26 = vld [vmem:[%s10029_s2 + $0xb4c] ss:$16 sps:$4 sm:$0xff]   ;;  %v7471_v49 = vld [vmem:[%s10029_s2 + $0xb40] ss:$16 sps:$4 sm:$0xff]  }
 0x223   :  { %3899 = vmatpush1.bf16.msra.mxu0 %v7399_v34  ;;  %v7468_v32 = vld [vmem:[%s10029_s2 + $0xb68] ss:$16 sps:$4 sm:$0xff]   ;;  %v7473_v34 = vld [vmem:[%s10029_s2 + $0xb44] ss:$16 sps:$4 sm:$0xff]   ;;  %v7477_v4 = vld [vmem:[%s10029_s2 + $0xb20] ss:$16 sps:$4 sm:$0xff]  }
 0x224   :  { %3940 = vmatpush1.bf16.msra.mxu1 %v7402_v18  ;;  %v1687_v48 = vpop.f32.mrf.mxu0  ;;  %v1728_v43 = vpop.f32.mrf.mxu1  ;;  %3900 = vmatprep.subr.bf16.mxu0 %v7407_v59  ;;  %v7474_v18 = vld [vmem:[%s10029_s2 + $0xb48] ss:$16 sps:$4 sm:$0xff]   ;;  %v7479_v59 = vld [vmem:[%s10029_s2 + $0xb24] ss:$16 sps:$4 sm:$0xff]  }
 0x225   :  { %3941 = vmatprep.subr.bf16.mxu1 %v7410_v41  ;;  %v7482_v41 = vld [vmem:[%s10029_s2 + $0xb2c] ss:$16 sps:$4 sm:$0xff]   ;;  %v7480_v13 = vld [vmem:[%s10029_s2 + $0xb28] ss:$16 sps:$4 sm:$0xff]   ;;  %v7483_v43 = vld [vmem:[%s10029_s2 + $0xb00] ss:$16 sps:$4 sm:$0xff]  }
 0x226   :  { %v7488_v48 = vld [vmem:[%s10029_s2 + $0xb0c] ss:$16 sps:$4 sm:$0xff]  }
 0x227   :  { %3901 = vmatpush1.bf16.msra.mxu0 %v7405_v46  ;;  %v7485_v46 = vld [vmem:[%s10029_s2 + $0xb04] ss:$16 sps:$4 sm:$0xff]  }
 0x228   :  { %3942 = vmatpush1.bf16.msra.mxu1 %v7408_v29  ;;  %3902 = vmatprep.subr.bf16.mxu0 %v7413_v22  ;;  %v7486_v29 = vld [vmem:[%s10029_s2 + $0xb08] ss:$16 sps:$4 sm:$0xff]   ;;  %v7491_v22 = vld [vmem:[%s10029_s2 + $0xce4] ss:$16 sps:$4 sm:$0xff]  }
 0x229   :  { %3943 = vmatprep.subr.bf16.mxu1 %v7416_v31  ;;  %v7494_v31 = vld [vmem:[%s10029_s2 + $0xcec] ss:$16 sps:$4 sm:$0xff]  }
 0x22b   :  { %3903 = vmatpush1.bf16.msra.mxu0 %v7411_v14  ;;  %v7489_v14 = vld [vmem:[%s10029_s2 + $0xce0] ss:$16 sps:$4 sm:$0xff]  }
 0x22c   :  { %3944 = vmatpush1.bf16.msra.mxu1 %v7414_v7  ;;  %3904 = vmatprep.subr.bf16.mxu0 %v7419_v61  ;;  %v3572_v7 = vpack.c.b16 %v8520_v50, %v8520_v50  ;;  %v7492_v61 = vld [vmem:[%s10029_s2 + $0xce8] ss:$16 sps:$4 sm:$0xff]  }
 0x22d   :  { %3945 = vmatprep.subr.bf16.mxu1 %v7422_v51  ;;  %v7497_v51 = vld [vmem:[%s10029_s2 + $0xcc4] ss:$16 sps:$4 sm:$0xff]  }
 0x22f   :  { %3905 = vmatpush1.bf16.msra.mxu0 %v7417_v16 }
 0x230   :  { %3946 = vmatpush1.bf16.msra.mxu1 %v7420_v12  ;;  %3906 = vmatprep.subr.bf16.mxu0 %v7425_v36  ;;  %v4136_v12 = vpack.c.b16 %v8556_v60, %v8556_v60  ;;  %v7500_v36 = vld [vmem:[%s10029_s2 + $0xccc] ss:$16 sps:$4 sm:$0xff]  }
 0x231   :  { %3947 = vmatprep.subr.bf16.mxu1 %v7428_v52 }
 0x233   :  { %3907 = vmatpush1.bf16.msra.mxu0 %v7423_v15  ;;  %v7495_v15 = vld [vmem:[%s10029_s2 + $0xcc0] ss:$16 sps:$4 sm:$0xff]  }
 0x234   :  { %3948 = vmatpush1.bf16.msra.mxu1 %v7426_v54  ;;  %3908 = vmatprep.subr.bf16.mxu0 %v7431_v19  ;;  %v7498_v19 = vld [vmem:[%s10029_s2 + $0xcc8] ss:$16 sps:$4 sm:$0xff]  }
 0x235   :  { %3949 = vmatprep.subr.bf16.mxu1 %v7434_v20 }
 0x237   :  { %3909 = vmatpush1.bf16.msra.mxu0 %v7429_v57 }
 0x238   :  { %3950 = vmatpush1.bf16.msra.mxu1 %v7432_v58  ;;  %3910 = vmatprep.subr.bf16.mxu0 %v7437_v63 }
 0x239   :  { %3951 = vmatprep.subr.bf16.mxu1 %v7440_v21 }
 0x23b   :  { %3911 = vmatpush1.bf16.msra.mxu0 %v7435_v42  ;;  %v7501_v42 = vld [vmem:[%s10029_s2 + $0xca0] ss:$16 sps:$4 sm:$0xff]  }
 0x23c   :  { %3952 = vmatpush1.bf16.msra.mxu1 %v7438_v30  ;;  %3912 = vmatprep.subr.bf16.mxu0 %v7443_v1  ;;  %v7504_v30 = vld [vmem:[%s10029_s2 + $0xca8] ss:$16 sps:$4 sm:$0xff]  }
 0x23d   :  { %3953 = vmatprep.subr.bf16.mxu1 %v7446_v27  ;;  %v7512_v27 = vld [vmem:[%s10029_s2 + $0xc8c] ss:$16 sps:$4 sm:$0xff]  }
 0x23f   :  { %3913 = vmatpush2.bf16.msra.mxu0 %v7441_v28  ;;  %v7507_v28 = vld [vmem:[%s10029_s2 + $0xc80] ss:$16 sps:$4 sm:$0xff]  }
 0x240   :  { %3954 = vmatpush2.bf16.msra.mxu1 %v7444_v2  ;;  %3914 = vmatprep.subr.bf16.mxu0 %v7449_v3  ;;  %v7510_v2 = vld [vmem:[%s10029_s2 + $0xc88] ss:$16 sps:$4 sm:$0xff]   ;;  %v7515_v3 = vld [vmem:[%s10029_s2 + $0xc64] ss:$16 sps:$4 sm:$0xff]  }
 0x241   :  { %3955 = vmatprep.subr.bf16.mxu1 %v7452_v6  ;;  %v7518_v6 = vld [vmem:[%s10029_s2 + $0xc6c] ss:$16 sps:$4 sm:$0xff]  }
 0x243   :  { %3915 = vmatpush2.bf16.msra.mxu0 %v7447_v8  ;;  %v7513_v8 = vld [vmem:[%s10029_s2 + $0xc60] ss:$16 sps:$4 sm:$0xff]  }
 0x244   :  { %3956 = vmatpush2.bf16.msra.mxu1 %v7450_v9  ;;  %3916 = vmatprep.subr.bf16.mxu0 %v7455_v10  ;;  %v7516_v9 = vld [vmem:[%s10029_s2 + $0xc68] ss:$16 sps:$4 sm:$0xff]   ;;  %v7521_v10 = vld [vmem:[%s10029_s2 + $0xc44] ss:$16 sps:$4 sm:$0xff]  }
 0x245   :  { %3957 = vmatprep.subr.bf16.mxu1 %v7458_v11  ;;  %v7524_v11 = vld [vmem:[%s10029_s2 + $0xc4c] ss:$16 sps:$4 sm:$0xff]  }
 0x247   :  { %3917 = vmatpush2.bf16.msra.mxu0 %v7453_v47  ;;  %v7519_v47 = vld [vmem:[%s10029_s2 + $0xc40] ss:$16 sps:$4 sm:$0xff]  }
 0x248   :  { %3958 = vmatpush2.bf16.msra.mxu1 %v7456_v33  ;;  %3918 = vmatprep.subr.bf16.mxu0 %v7461_v0  ;;  %v7522_v33 = vld [vmem:[%s10029_s2 + $0xc48] ss:$16 sps:$4 sm:$0xff]   ;;  %v7527_v0 = vld [vmem:[%s10029_s2 + $0xc24] ss:$16 sps:$4 sm:$0xff]  }
 0x249   :  { %3959 = vmatprep.subr.bf16.mxu1 %v7464_v37  ;;  %v7530_v37 = vld [vmem:[%s10029_s2 + $0xc2c] ss:$16 sps:$4 sm:$0xff]  }
 0x24b   :  { %3919 = vmatpush2.bf16.msra.mxu0 %v7459_v17  ;;  %v7525_v17 = vld [vmem:[%s10029_s2 + $0xc20] ss:$16 sps:$4 sm:$0xff]  }
 0x24c   :  { %3960 = vmatpush2.bf16.msra.mxu1 %v7462_v38  ;;  %3920 = vmatprep.subr.bf16.mxu0 %v7467_v39  ;;  %v7528_v38 = vld [vmem:[%s10029_s2 + $0xc28] ss:$16 sps:$4 sm:$0xff]   ;;  %v7533_v39 = vld [vmem:[%s10029_s2 + $0xc04] ss:$16 sps:$4 sm:$0xff]  }
 0x24d   :  { %3961 = vmatprep.subr.bf16.mxu1 %v7470_v35  ;;  %v7536_v35 = vld [vmem:[%s10029_s2 + $0xc0c] ss:$16 sps:$4 sm:$0xff]  }
 0x24f   :  { %3921 = vmatpush2.bf16.msra.mxu0 %v7465_v56  ;;  %v7531_v56 = vld [vmem:[%s10029_s2 + $0xc00] ss:$16 sps:$4 sm:$0xff]  }
 0x250   :  { %3962 = vmatpush2.bf16.msra.mxu1 %v7468_v32  ;;  %3922 = vmatprep.subr.bf16.mxu0 %v7473_v34  ;;  %v7534_v32 = vld [vmem:[%s10029_s2 + $0xc08] ss:$16 sps:$4 sm:$0xff]   ;;  %v7539_v34 = vld [vmem:[%s10029_s2 + $0xde4] ss:$16 sps:$4 sm:$0xff]  }
 0x251   :  { %3963 = vmatprep.subr.bf16.mxu1 %v7476_v26  ;;  %v7542_v26 = vld [vmem:[%s10029_s2 + $0xdec] ss:$16 sps:$4 sm:$0xff]  }
 0x253   :  { %3923 = vmatpush2.bf16.msra.mxu0 %v7471_v49  ;;  %v7537_v49 = vld [vmem:[%s10029_s2 + $0xde0] ss:$16 sps:$4 sm:$0xff]  }
 0x254   :  { %3964 = vmatpush2.bf16.msra.mxu1 %v7474_v18  ;;  %3924 = vmatprep.subr.bf16.mxu0 %v7479_v59  ;;  %v7540_v18 = vld [vmem:[%s10029_s2 + $0xde8] ss:$16 sps:$4 sm:$0xff]   ;;  %v7545_v59 = vld [vmem:[%s10029_s2 + $0xdc4] ss:$16 sps:$4 sm:$0xff]  }
 0x255   :  { %3965 = vmatprep.subr.bf16.mxu1 %v7482_v41  ;;  %v7548_v41 = vld [vmem:[%s10029_s2 + $0xdcc] ss:$16 sps:$4 sm:$0xff]  }
 0x257   :  { %3925 = vmatpush2.bf16.msra.mxu0 %v7477_v4  ;;  %v7543_v4 = vld [vmem:[%s10029_s2 + $0xdc0] ss:$16 sps:$4 sm:$0xff]  }
 0x258   :  { %3966 = vmatpush2.bf16.msra.mxu1 %v7480_v13  ;;  %3926 = vmatprep.subr.bf16.mxu0 %v7485_v46  ;;  %v7546_v13 = vld [vmem:[%s10029_s2 + $0xdc8] ss:$16 sps:$4 sm:$0xff]   ;;  %v7551_v46 = vld [vmem:[%s10029_s2 + $0xda4] ss:$16 sps:$4 sm:$0xff]  }
 0x259   :  { %3967 = vmatprep.subr.bf16.mxu1 %v7488_v48  ;;  %v7554_v48 = vld [vmem:[%s10029_s2 + $0xdac] ss:$16 sps:$4 sm:$0xff]  }
 0x25b   :  { %3927 = vmatpush2.bf16.msra.mxu0 %v7483_v43  ;;  %v7549_v43 = vld [vmem:[%s10029_s2 + $0xda0] ss:$16 sps:$4 sm:$0xff]  }
 0x25c   :  { %3968 = vmatpush2.bf16.msra.mxu1 %v7486_v29  ;;  %4459 = vmatprep.subr.bf16.mxu0 %v7491_v22  ;;  %v7552_v29 = vld [vmem:[%s10029_s2 + $0xda8] ss:$16 sps:$4 sm:$0xff]   ;;  %v7557_v22 = vld [vmem:[%s10029_s2 + $0xd84] ss:$16 sps:$4 sm:$0xff]  }
 0x25d   :  { %4500 = vmatprep.subr.bf16.mxu1 %v7494_v31  ;;  %v7560_v31 = vld [vmem:[%s10029_s2 + $0xd8c] ss:$16 sps:$4 sm:$0xff]  }
 0x25e   :  { %v2241_v16 = vpop.f32.mrf.mxu0  ;;  %3929 = vmatmul.mubr.bf16.vlgmr.msra.gmra.mxu0 %v3572_v7 }
 0x25f   :  { %v9483_v50 = vadd.f32 %v2241_v16, %v9275_v5  ;;  %v2282_v52 = vpop.f32.mrf.mxu1  ;;  %3970 = vmatmul.mubr.bf16.vlgmr.msra.gmra.mxu1 %v3572_v7  ;;  %4460 = vmatpush1.bf16.msra.mxu0 %v7489_v14  ;;  %v7503_v5 = vld [vmem:[%s10029_s2 + $0xca4] ss:$16 sps:$4 sm:$0xff]   ;;  %v7555_v14 = vld [vmem:[%s10029_s2 + $0xd80] ss:$16 sps:$4 sm:$0xff]   ;;  %v7558_v7 = vld [vmem:[%s10029_s2 + $0xd88] ss:$16 sps:$4 sm:$0xff]  }
 0x260   :  { %v9489_v54 = vadd.f32 %v2282_v52, %v9278_v45  ;;  %4491 = vmatprep.mubr.bf16.mxu0 %v4136_v12  ;;  %4501 = vmatpush1.bf16.msra.mxu1 %v7492_v61  ;;  %v2243_v60 = vpop.f32.mrf.mxu0  ;;  %v7506_v45 = vld [vmem:[%s10029_s2 + $0xcac] ss:$16 sps:$4 sm:$0xff]   ;;  %v7563_v61 = vld [vmem:[%s10029_s2 + $0xd64] ss:$16 sps:$4 sm:$0xff]   ;;  %v7561_v16 = vld [vmem:[%s10029_s2 + $0xd60] ss:$16 sps:$4 sm:$0xff]  }
 0x261   :  { %4532 = vmatprep.mubr.bf16.mxu1 %v4136_v12  ;;  %v9498_v20 = vadd.f32 %v2243_v60, %v9290_v62  ;;  %v2284_v57 = vpop.f32.mrf.mxu1  ;;  %4461 = vmatprep.subr.bf16.mxu0 %v7497_v51  ;;  %v7566_v51 = vld [vmem:[%s10029_s2 + $0xd6c] ss:$16 sps:$4 sm:$0xff]   ;;  %v7564_v12 = vld [vmem:[%s10029_s2 + $0xd68] ss:$16 sps:$4 sm:$0xff]  }
 0x262   :  { %v9504_v58 = vadd.f32 %v2284_v57, %v9293_v40  ;;  %v2245_v63 = vpop.f32.mrf.mxu0  ;;  %4502 = vmatprep.subr.bf16.mxu1 %v7500_v36  ;;  %v7509_v40 = vld [vmem:[%s10029_s2 + $0xc84] ss:$16 sps:$4 sm:$0xff]   ;;  %v7572_v52 = vld [vmem:[%s10029_s2 + $0xd4c] ss:$16 sps:$4 sm:$0xff]   ;;  %v7570_v60 = vld [vmem:[%s10029_s2 + $0xd48] ss:$16 sps:$4 sm:$0xff]  }
 0x263   :  { %v2286_v21 = vpop.f32.mrf.mxu1  ;;  %4462 = vmatpush1.bf16.msra.mxu0 %v7495_v15  ;;  %v7569_v36 = vld [vmem:[%s10029_s2 + $0xd44] ss:$16 sps:$4 sm:$0xff]   ;;  %v7567_v15 = vld [vmem:[%s10029_s2 + $0xd40] ss:$16 sps:$4 sm:$0xff]  }
 0x264   :  { %4503 = vmatpush1.bf16.msra.mxu1 %v7498_v19  ;;  %v2246_v62 = vpop.f32.mrf.mxu0  ;;  %4463 = vmatprep.subr.bf16.mxu0 %v7503_v5  ;;  %v7575_v19 = vld [vmem:[%s10029_s2 + $0xd24] ss:$16 sps:$4 sm:$0xff]   ;;  %v7578_v5 = vld [vmem:[%s10029_s2 + $0xd2c] ss:$16 sps:$4 sm:$0xff]   ;;  %v7573_v57 = vld [vmem:[%s10029_s2 + $0xd20] ss:$16 sps:$4 sm:$0xff]  }
 0x265   :  { %v2287_v1 = vpop.f32.mrf.mxu1  ;;  %4504 = vmatprep.subr.bf16.mxu1 %v7506_v45  ;;  %v7576_v45 = vld [vmem:[%s10029_s2 + $0xd28] ss:$16 sps:$4 sm:$0xff]   ;;  %v7581_v63 = vld [vmem:[%s10029_s2 + $0xd04] ss:$16 sps:$4 sm:$0xff]   ;;  %v7584_v21 = vld [vmem:[%s10029_s2 + $0xd0c] ss:$16 sps:$4 sm:$0xff]  }
 0x266   :  { %v7582_v62 = vld [vmem:[%s10029_s2 + $0xd08] ss:$16 sps:$4 sm:$0xff]   ;;  %v7585_v1 = vld [vmem:[%s10029_s2 + $0xee0] ss:$16 sps:$4 sm:$0xff]  }
 0x267   :  { %4464 = vmatpush1.bf16.msra.mxu0 %v7501_v42  ;;  %v7579_v42 = vld [vmem:[%s10029_s2 + $0xd00] ss:$16 sps:$4 sm:$0xff]  }
 0x268   :  { %4505 = vmatpush1.bf16.msra.mxu1 %v7504_v30  ;;  %4465 = vmatprep.subr.bf16.mxu0 %v7509_v40  ;;  %v7587_v30 = vld [vmem:[%s10029_s2 + $0xee4] ss:$16 sps:$4 sm:$0xff]   ;;  %v7590_v40 = vld [vmem:[%s10029_s2 + $0xeec] ss:$16 sps:$4 sm:$0xff]  }
 0x269   :  { %4506 = vmatprep.subr.bf16.mxu1 %v7512_v27  ;;  %v4135_v27 = vpack.c.b16 %v8566_v44, %v8566_v44 }
 0x26b   :  { %4466 = vmatpush1.bf16.msra.mxu0 %v7507_v28  ;;  %v7588_v28 = vld [vmem:[%s10029_s2 + $0xee8] ss:$16 sps:$4 sm:$0xff]  }
 0x26c   :  { %4507 = vmatpush1.bf16.msra.mxu1 %v7510_v2  ;;  %4467 = vmatprep.subr.bf16.mxu0 %v7515_v3  ;;  %v7593_v2 = vld [vmem:[%s10029_s2 + $0xec4] ss:$16 sps:$4 sm:$0xff]  }
 0x26d   :  { %4508 = vmatprep.subr.bf16.mxu1 %v7518_v6  ;;  %v4699_v6 = vpack.c.b16 %v8590_v53, %v8590_v53 }
 0x26f   :  { %4468 = vmatpush1.bf16.msra.mxu0 %v7513_v8  ;;  %v7596_v8 = vld [vmem:[%s10029_s2 + $0xecc] ss:$16 sps:$4 sm:$0xff]  }
 0x270   :  { %4509 = vmatpush1.bf16.msra.mxu1 %v7516_v9  ;;  %4469 = vmatprep.subr.bf16.mxu0 %v7521_v10  ;;  %v7591_v10 = vld [vmem:[%s10029_s2 + $0xec0] ss:$16 sps:$4 sm:$0xff]  }
 0x271   :  { %4510 = vmatprep.subr.bf16.mxu1 %v7524_v11 }
 0x273   :  { %4470 = vmatpush1.bf16.msra.mxu0 %v7519_v47  ;;  %v7594_v47 = vld [vmem:[%s10029_s2 + $0xec8] ss:$16 sps:$4 sm:$0xff]  }
 0x274   :  { %4511 = vmatpush1.bf16.msra.mxu1 %v7522_v33  ;;  %4471 = vmatprep.subr.bf16.mxu0 %v7527_v0 }
 0x275   :  { %4512 = vmatprep.subr.bf16.mxu1 %v7530_v37 }
 0x277   :  { %4472 = vmatpush1.bf16.msra.mxu0 %v7525_v17 }
 0x278   :  { %4513 = vmatpush1.bf16.msra.mxu1 %v7528_v38  ;;  %4473 = vmatprep.subr.bf16.mxu0 %v7533_v39  ;;  %v7597_v39 = vld [vmem:[%s10029_s2 + $0xea0] ss:$16 sps:$4 sm:$0xff]  }
 0x279   :  { %4514 = vmatprep.subr.bf16.mxu1 %v7536_v35  ;;  %v7600_v35 = vld [vmem:[%s10029_s2 + $0xea8] ss:$16 sps:$4 sm:$0xff]  }
 0x27b   :  { %4474 = vmatpush1.bf16.msra.mxu0 %v7531_v56 }
 0x27c   :  { %4515 = vmatpush1.bf16.msra.mxu1 %v7534_v32  ;;  %4475 = vmatprep.subr.bf16.mxu0 %v7539_v34  ;;  %v7608_v32 = vld [vmem:[%s10029_s2 + $0xe8c] ss:$16 sps:$4 sm:$0xff]   ;;  %v7603_v34 = vld [vmem:[%s10029_s2 + $0xe80] ss:$16 sps:$4 sm:$0xff]  }
 0x27d   :  { %4516 = vmatprep.subr.bf16.mxu1 %v7542_v26  ;;  %v7606_v26 = vld [vmem:[%s10029_s2 + $0xe88] ss:$16 sps:$4 sm:$0xff]  }
 0x27f   :  { %4476 = vmatpush2.bf16.msra.mxu0 %v7537_v49  ;;  %v7611_v49 = vld [vmem:[%s10029_s2 + $0xe64] ss:$16 sps:$4 sm:$0xff]  }
 0x280   :  { %4517 = vmatpush2.bf16.msra.mxu1 %v7540_v18  ;;  %4477 = vmatprep.subr.bf16.mxu0 %v7545_v59  ;;  %v7614_v18 = vld [vmem:[%s10029_s2 + $0xe6c] ss:$16 sps:$4 sm:$0xff]   ;;  %v7609_v59 = vld [vmem:[%s10029_s2 + $0xe60] ss:$16 sps:$4 sm:$0xff]  }
 0x281   :  { %4518 = vmatprep.subr.bf16.mxu1 %v7548_v41  ;;  %v7612_v41 = vld [vmem:[%s10029_s2 + $0xe68] ss:$16 sps:$4 sm:$0xff]  }
 0x283   :  { %4478 = vmatpush2.bf16.msra.mxu0 %v7543_v4  ;;  %v7617_v4 = vld [vmem:[%s10029_s2 + $0xe44] ss:$16 sps:$4 sm:$0xff]  }
 0x284   :  { %4519 = vmatpush2.bf16.msra.mxu1 %v7546_v13  ;;  %4479 = vmatprep.subr.bf16.mxu0 %v7551_v46  ;;  %v7620_v13 = vld [vmem:[%s10029_s2 + $0xe4c] ss:$16 sps:$4 sm:$0xff]   ;;  %v7615_v46 = vld [vmem:[%s10029_s2 + $0xe40] ss:$16 sps:$4 sm:$0xff]  }
 0x285   :  { %4520 = vmatprep.subr.bf16.mxu1 %v7554_v48  ;;  %v7618_v48 = vld [vmem:[%s10029_s2 + $0xe48] ss:$16 sps:$4 sm:$0xff]  }
 0x287   :  { %4480 = vmatpush2.bf16.msra.mxu0 %v7549_v43  ;;  %v7623_v43 = vld [vmem:[%s10029_s2 + $0xe24] ss:$16 sps:$4 sm:$0xff]  }
 0x288   :  { %4521 = vmatpush2.bf16.msra.mxu1 %v7552_v29  ;;  %4481 = vmatprep.subr.bf16.mxu0 %v7557_v22  ;;  %v7626_v29 = vld [vmem:[%s10029_s2 + $0xe2c] ss:$16 sps:$4 sm:$0xff]   ;;  %v7621_v22 = vld [vmem:[%s10029_s2 + $0xe20] ss:$16 sps:$4 sm:$0xff]  }
 0x289   :  { %4522 = vmatprep.subr.bf16.mxu1 %v7560_v31  ;;  %v7624_v31 = vld [vmem:[%s10029_s2 + $0xe28] ss:$16 sps:$4 sm:$0xff]  }
 0x28b   :  { %4482 = vmatpush2.bf16.msra.mxu0 %v7555_v14  ;;  %v7629_v14 = vld [vmem:[%s10029_s2 + $0xe04] ss:$16 sps:$4 sm:$0xff]  }
 0x28c   :  { %4523 = vmatpush2.bf16.msra.mxu1 %v7558_v7  ;;  %4483 = vmatprep.subr.bf16.mxu0 %v7563_v61  ;;  %v7632_v7 = vld [vmem:[%s10029_s2 + $0xe0c] ss:$16 sps:$4 sm:$0xff]   ;;  %v7627_v61 = vld [vmem:[%s10029_s2 + $0xe00] ss:$16 sps:$4 sm:$0xff]  }
 0x28d   :  { %4524 = vmatprep.subr.bf16.mxu1 %v7566_v51  ;;  %v7630_v51 = vld [vmem:[%s10029_s2 + $0xe08] ss:$16 sps:$4 sm:$0xff]  }
 0x28f   :  { %4484 = vmatpush2.bf16.msra.mxu0 %v7561_v16  ;;  %v7635_v16 = vld [vmem:[%s10029_s2 + $0xfe4] ss:$16 sps:$4 sm:$0xff]  }
 0x290   :  { %4525 = vmatpush2.bf16.msra.mxu1 %v7564_v12  ;;  %4485 = vmatprep.subr.bf16.mxu0 %v7569_v36  ;;  %v7638_v12 = vld [vmem:[%s10029_s2 + $0xfec] ss:$16 sps:$4 sm:$0xff]   ;;  %v7633_v36 = vld [vmem:[%s10029_s2 + $0xfe0] ss:$16 sps:$4 sm:$0xff]  }
 0x291   :  { %4526 = vmatprep.subr.bf16.mxu1 %v7572_v52  ;;  %v7636_v52 = vld [vmem:[%s10029_s2 + $0xfe8] ss:$16 sps:$4 sm:$0xff]  }
 0x293   :  { %4486 = vmatpush2.bf16.msra.mxu0 %v7567_v15  ;;  %v7641_v15 = vld [vmem:[%s10029_s2 + $0xfc4] ss:$16 sps:$4 sm:$0xff]  }
 0x294   :  { %4527 = vmatpush2.bf16.msra.mxu1 %v7570_v60  ;;  %4487 = vmatprep.subr.bf16.mxu0 %v7575_v19  ;;  %v7644_v60 = vld [vmem:[%s10029_s2 + $0xfcc] ss:$16 sps:$4 sm:$0xff]   ;;  %v7639_v19 = vld [vmem:[%s10029_s2 + $0xfc0] ss:$16 sps:$4 sm:$0xff]  }
 0x295   :  { %4528 = vmatprep.subr.bf16.mxu1 %v7578_v5  ;;  %v7642_v5 = vld [vmem:[%s10029_s2 + $0xfc8] ss:$16 sps:$4 sm:$0xff]  }
 0x297   :  { %4488 = vmatpush2.bf16.msra.mxu0 %v7573_v57  ;;  %v7647_v57 = vld [vmem:[%s10029_s2 + $0xfa4] ss:$16 sps:$4 sm:$0xff]  }
 0x298   :  { %4529 = vmatpush2.bf16.msra.mxu1 %v7576_v45  ;;  %4489 = vmatprep.subr.bf16.mxu0 %v7581_v63  ;;  %v7650_v45 = vld [vmem:[%s10029_s2 + $0xfac] ss:$16 sps:$4 sm:$0xff]   ;;  %v7645_v63 = vld [vmem:[%s10029_s2 + $0xfa0] ss:$16 sps:$4 sm:$0xff]  }
 0x299   :  { %4530 = vmatprep.subr.bf16.mxu1 %v7584_v21  ;;  %v7648_v21 = vld [vmem:[%s10029_s2 + $0xfa8] ss:$16 sps:$4 sm:$0xff]  }
 0x29b   :  { %4490 = vmatpush2.bf16.msra.mxu0 %v7579_v42  ;;  %v7653_v42 = vld [vmem:[%s10029_s2 + $0xf84] ss:$16 sps:$4 sm:$0xff]  }
 0x29c   :  { %4531 = vmatpush2.bf16.msra.mxu1 %v7582_v62  ;;  %5022 = vmatprep.subr.bf16.mxu0 %v7587_v30  ;;  %v7656_v62 = vld [vmem:[%s10029_s2 + $0xf8c] ss:$16 sps:$4 sm:$0xff]   ;;  %v7651_v30 = vld [vmem:[%s10029_s2 + $0xf80] ss:$16 sps:$4 sm:$0xff]  }
 0x29d   :  { %5063 = vmatprep.subr.bf16.mxu1 %v7590_v40  ;;  %v7654_v40 = vld [vmem:[%s10029_s2 + $0xf88] ss:$16 sps:$4 sm:$0xff]  }
 0x29e   :  { %v2804_v3 = vpop.f32.mrf.mxu0  ;;  %4492 = vmatmul.mubr.bf16.vlgmr.msra.gmra.mxu0 %v4135_v27 }
 0x29f   :  { %v9691_v44 = vadd.f32 %v2804_v3, %v9483_v50  ;;  %v2845_v9 = vpop.f32.mrf.mxu1  ;;  %4533 = vmatmul.mubr.bf16.vlgmr.msra.gmra.mxu1 %v4135_v27  ;;  %5023 = vmatpush1.bf16.msra.mxu0 %v7585_v1  ;;  %v7599_v50 = vld [vmem:[%s10029_s2 + $0xea4] ss:$16 sps:$4 sm:$0xff]   ;;  %v7662_v27 = vld [vmem:[%s10029_s2 + $0xf6c] ss:$16 sps:$4 sm:$0xff]  }
 0x2a0   :  { %v9697_v11 = vadd.f32 %v2845_v9, %v9489_v54  ;;  %5054 = vmatprep.mubr.bf16.mxu0 %v4699_v6  ;;  %5064 = vmatpush1.bf16.msra.mxu1 %v7588_v28  ;;  %v2806_v53 = vpop.f32.mrf.mxu0  ;;  %v7602_v54 = vld [vmem:[%s10029_s2 + $0xeac] ss:$16 sps:$4 sm:$0xff]   ;;  %v7659_v1 = vld [vmem:[%s10029_s2 + $0xf64] ss:$16 sps:$4 sm:$0xff]   ;;  %v7657_v28 = vld [vmem:[%s10029_s2 + $0xf60] ss:$16 sps:$4 sm:$0xff]  }
 0x2a1   :  { %5095 = vmatprep.mubr.bf16.mxu1 %v4699_v6  ;;  %v9706_v33 = vadd.f32 %v2806_v53, %v9498_v20  ;;  %v2847_v0 = vpop.f32.mrf.mxu1  ;;  %5024 = vmatprep.subr.bf16.mxu0 %v7593_v2  ;;  %v7660_v2 = vld [vmem:[%s10029_s2 + $0xf68] ss:$16 sps:$4 sm:$0xff]   ;;  %v7665_v3 = vld [vmem:[%s10029_s2 + $0xf44] ss:$16 sps:$4 sm:$0xff]   ;;  %v7668_v6 = vld [vmem:[%s10029_s2 + $0xf4c] ss:$16 sps:$4 sm:$0xff]  }
 0x2a2   :  { %v9712_v37 = vadd.f32 %v2847_v0, %v9504_v58  ;;  %v2808_v17 = vpop.f32.mrf.mxu0  ;;  %5065 = vmatprep.subr.bf16.mxu1 %v7596_v8  ;;  %v7605_v58 = vld [vmem:[%s10029_s2 + $0xe84] ss:$16 sps:$4 sm:$0xff]   ;;  %v7663_v8 = vld [vmem:[%s10029_s2 + $0xf40] ss:$16 sps:$4 sm:$0xff]   ;;  %v7666_v9 = vld [vmem:[%s10029_s2 + $0xf48] ss:$16 sps:$4 sm:$0xff]  }
 0x2a3   :  { %v2849_v38 = vpop.f32.mrf.mxu1  ;;  %5025 = vmatpush1.bf16.msra.mxu0 %v7591_v10  ;;  %v7671_v10 = vld [vmem:[%s10029_s2 + $0xf24] ss:$16 sps:$4 sm:$0xff]   ;;  %v7674_v53 = vld [vmem:[%s10029_s2 + $0xf2c] ss:$16 sps:$4 sm:$0xff]   ;;  %v7675_v17 = vld [vmem:[%s10029_s2 + $0xf00] ss:$16 sps:$4 sm:$0xff]  }
 0x2a4   :  { %5066 = vmatpush1.bf16.msra.mxu1 %v7594_v47  ;;  %v2809_v20 = vpop.f32.mrf.mxu0  ;;  %5026 = vmatprep.subr.bf16.mxu0 %v7599_v50  ;;  %v7669_v47 = vld [vmem:[%s10029_s2 + $0xf20] ss:$16 sps:$4 sm:$0xff]   ;;  %v7672_v50 = vld [vmem:[%s10029_s2 + $0xf28] ss:$16 sps:$4 sm:$0xff]   ;;  %v7677_v0 = vld [vmem:[%s10029_s2 + $0xf04] ss:$16 sps:$4 sm:$0xff]  }
 0x2a5   :  { %v2850_v56 = vpop.f32.mrf.mxu1  ;;  %5067 = vmatprep.subr.bf16.mxu1 %v7602_v54  ;;  %v7680_v54 = vld [vmem:[%s10029_s2 + $0xf0c] ss:$16 sps:$4 sm:$0xff]   ;;  %v7678_v38 = vld [vmem:[%s10029_s2 + $0xf08] ss:$16 sps:$4 sm:$0xff]  }
 0x2a7   :  { %5027 = vmatpush1.bf16.msra.mxu0 %v7597_v39  ;;  %v4698_v39 = vpack.c.b16 %v8594_v55, %v8594_v55  ;;  %v7681_v55 = vld [vmem:[%s10030_s3 + $0x78] sm:$0xff]  }
 0x2a8   :  { %5068 = vmatpush1.bf16.msra.mxu1 %v7600_v35  ;;  %5028 = vmatprep.subr.bf16.mxu0 %v7605_v58 }
 0x2a9   :  { %5069 = vmatprep.subr.bf16.mxu1 %v7608_v32 }
 0x2ab   :  { %5029 = vmatpush1.bf16.msra.mxu0 %v7603_v34 }
 0x2ac   :  { %5070 = vmatpush1.bf16.msra.mxu1 %v7606_v26  ;;  %5030 = vmatprep.subr.bf16.mxu0 %v7611_v49 }
 0x2ad   :  { %5071 = vmatprep.subr.bf16.mxu1 %v7614_v18 }
 0x2af   :  { %5031 = vmatpush1.bf16.msra.mxu0 %v7609_v59 }
 0x2b0   :  { %5072 = vmatpush1.bf16.msra.mxu1 %v7612_v41  ;;  %5032 = vmatprep.subr.bf16.mxu0 %v7617_v4 }
 0x2b1   :  { %5073 = vmatprep.subr.bf16.mxu1 %v7620_v13  ;;  %v7686_v13 = vld [vmem:[%s10030_s3 + $0xf0] sm:$0xff]  }
 0x2b3   :  { %5033 = vmatpush1.bf16.msra.mxu0 %v7615_v46  ;;  %v7687_v46 = vld [vmem:[%s10030_s3 + $0x30] sm:$0xff]  }
 0x2b4   :  { %5074 = vmatpush1.bf16.msra.mxu1 %v7618_v48  ;;  %5034 = vmatprep.subr.bf16.mxu0 %v7623_v43  ;;  %v7688_v48 = vld [vmem:[%s10030_s3 + $0xb0] sm:$0xff]   ;;  %v7689_v43 = vld [vmem:[%s10030_s3 + $0x68] sm:$0xff]  }
 0x2b5   :  { %5075 = vmatprep.subr.bf16.mxu1 %v7626_v29  ;;  %v7690_v29 = vld [vmem:[%s10030_s3 + $0xe8] sm:$0xff]  }
 0x2b7   :  { %5035 = vmatpush1.bf16.msra.mxu0 %v7621_v22  ;;  %v7691_v22 = vld [vmem:[%s10030_s3 + $0x28] sm:$0xff]  }
 0x2b8   :  { %5076 = vmatpush1.bf16.msra.mxu1 %v7624_v31  ;;  %5036 = vmatprep.subr.bf16.mxu0 %v7629_v14  ;;  %v7692_v31 = vld [vmem:[%s10030_s3 + $0xa8] sm:$0xff]   ;;  %v7693_v14 = vld [vmem:[%s10030_s3 + $0x60] sm:$0xff]  }
 0x2b9   :  { %5077 = vmatprep.subr.bf16.mxu1 %v7632_v7  ;;  %v7694_v7 = vld [vmem:[%s10030_s3 + $0xe0] sm:$0xff]  }
 0x2bb   :  { %5037 = vmatpush1.bf16.msra.mxu0 %v7627_v61  ;;  %v7695_v61 = vld [vmem:[%s10030_s3 + $0x20] sm:$0xff]  }
 0x2bc   :  { %5078 = vmatpush1.bf16.msra.mxu1 %v7630_v51  ;;  %5038 = vmatprep.subr.bf16.mxu0 %v7635_v16  ;;  %v7696_v51 = vld [vmem:[%s10030_s3 + $0xa0] sm:$0xff]   ;;  %v7697_v16 = vld [vmem:[%s10030_s3 + $0x58] sm:$0xff]  }
 0x2bd   :  { %5079 = vmatprep.subr.bf16.mxu1 %v7638_v12  ;;  %v7698_v12 = vld [vmem:[%s10030_s3 + $0xd8] sm:$0xff]  }
 0x2bf   :  { %5039 = vmatpush2.bf16.msra.mxu0 %v7633_v36  ;;  %v7699_v36 = vld [vmem:[%s10030_s3 + $0x18] sm:$0xff]  }
 0x2c0   :  { %5080 = vmatpush2.bf16.msra.mxu1 %v7636_v52  ;;  %5040 = vmatprep.subr.bf16.mxu0 %v7641_v15  ;;  %v7700_v52 = vld [vmem:[%s10030_s3 + $0x98] sm:$0xff]  }
 0x2c1   :  { %5081 = vmatprep.subr.bf16.mxu1 %v7644_v60 }
 0x2c3   :  { %5041 = vmatpush2.bf16.msra.mxu0 %v7639_v19 }
 0x2c4   :  { %5082 = vmatpush2.bf16.msra.mxu1 %v7642_v5  ;;  %5042 = vmatprep.subr.bf16.mxu0 %v7647_v57 }
 0x2c5   :  { %5083 = vmatprep.subr.bf16.mxu1 %v7650_v45 }
 0x2c7   :  { %5043 = vmatpush2.bf16.msra.mxu0 %v7645_v63 }
 0x2c8   :  { %5084 = vmatpush2.bf16.msra.mxu1 %v7648_v21  ;;  %5044 = vmatprep.subr.bf16.mxu0 %v7653_v42 }
 0x2c9   :  { %5085 = vmatprep.subr.bf16.mxu1 %v7656_v62 }
 0x2cb   :  { %5045 = vmatpush2.bf16.msra.mxu0 %v7651_v30 }
 0x2cc   :  { %5086 = vmatpush2.bf16.msra.mxu1 %v7654_v40  ;;  %5046 = vmatprep.subr.bf16.mxu0 %v7659_v1  ;;  %v7701_v1 = vld [vmem:[%s10030_s3 + $0x50] sm:$0xff]  }
 0x2cd   :  { %5087 = vmatprep.subr.bf16.mxu1 %v7662_v27  ;;  %v7702_v27 = vld [vmem:[%s10030_s3 + $0xd0] sm:$0xff]  }
 0x2cf   :  { %5047 = vmatpush2.bf16.msra.mxu0 %v7657_v28  ;;  %v7703_v28 = vld [vmem:[%s10030_s3 + $0x10] sm:$0xff]  }
 0x2d0   :  { %5088 = vmatpush2.bf16.msra.mxu1 %v7660_v2  ;;  %5048 = vmatprep.subr.bf16.mxu0 %v7665_v3  ;;  %v7704_v2 = vld [vmem:[%s10030_s3 + $0x90] sm:$0xff]   ;;  %v7705_v3 = vld [vmem:[%s10030_s3 + $0x48] sm:$0xff]  }
 0x2d1   :  { %5089 = vmatprep.subr.bf16.mxu1 %v7668_v6  ;;  %v7706_v6 = vld [vmem:[%s10030_s3 + $0xc8] sm:$0xff]  }
 0x2d3   :  { %5049 = vmatpush2.bf16.msra.mxu0 %v7663_v8  ;;  %v7707_v8 = vld [vmem:[%s10030_s3 + $0x8] sm:$0xff]  }
 0x2d4   :  { %5090 = vmatpush2.bf16.msra.mxu1 %v7666_v9  ;;  %5050 = vmatprep.subr.bf16.mxu0 %v7671_v10  ;;  %v7708_v9 = vld [vmem:[%s10030_s3 + $0x88] sm:$0xff]   ;;  %v7709_v10 = vld [vmem:[%s10030_s3 + $0x40] sm:$0xff]  }
 0x2d5   :  { %5091 = vmatprep.subr.bf16.mxu1 %v7674_v53  ;;  %v7710_v53 = vld [vmem:[%s10030_s3 + $0xc0] sm:$0xff]  }
 0x2d7   :  { %5051 = vmatpush2.bf16.msra.mxu0 %v7669_v47  ;;  %v7711_v47 = vld [vmem:[%s10030_s3] sm:$0xff]  }
 0x2d8   :  { %5092 = vmatpush2.bf16.msra.mxu1 %v7672_v50  ;;  %5052 = vmatprep.subr.bf16.mxu0 %v7677_v0  ;;  %v7712_v50 = vld [vmem:[%s10030_s3 + $0x80] sm:$0xff]   ;;  %v7744_v0 = vmov 0.0  }
 0x2d9   :  { %5093 = vmatprep.subr.bf16.mxu1 %v7680_v54 }
 0x2db   :  { %5053 = vmatpush2.bf16.msra.mxu0 %v7675_v17 }
 0x2dc   :  { %5094 = vmatpush2.bf16.msra.mxu1 %v7678_v38  ;;  %6739 = vmatprep.subr.bf16.mxu0 %v7681_v55 }
 0x2de   :  { %v3367_v20 = vpop.f32.mrf.mxu0  ;;  %5055 = vmatmul.mubr.bf16.vlgmr.msra.gmra.mxu0 %v4698_v39 }
 0x2df   :  { %v3415_v35 = vadd.f32 %v3367_v20, %v9691_v44  ;;  %v3408_v58 = vpop.f32.mrf.mxu1  ;;  %5096 = vmatmul.mubr.bf16.vlgmr.msra.gmra.mxu1 %v4698_v39  ;;  %v7682_v44 = vld [vmem:[%s10030_s3 + $0xf8] sm:$0xff]  }
 0x2e0   :  { %v3417_v56 = vadd.f32 %v3408_v58, %v9697_v11  ;;  %v3369_v32 = vpop.f32.mrf.mxu0  ;;  %v7683_v11 = vld [vmem:[%s10030_s3 + $0x38] sm:$0xff]   ;;  %6761 = vmatprep.subr.bf16.mxu1 %v7682_v44 }
 0x2e1   :  { %v3416_v34 = vadd.f32 %v3369_v32, %v9706_v33  ;;  %v3410_v26 = vpop.f32.mrf.mxu1  ;;  %v7684_v33 = vld [vmem:[%s10030_s3 + $0xb8] sm:$0xff]   ;;  %6740 = vmatpush3.bf16.msra.mxu0 %v7683_v11 }
 0x2e2   :  { %v3418_v49 = vadd.f32 %v3410_v26, %v9712_v37  ;;  %v3371_v18 = vpop.f32.mrf.mxu0  ;;  %v7685_v37 = vld [vmem:[%s10030_s3 + $0x70] sm:$0xff]   ;;  %6762 = vmatpush3.bf16.msra.mxu1 %v7684_v33  ;;  %v5108_v26 = vld [vmem:[%s10033_s6] sm:$0xf] }
 0x2e3   :  { %v3412_v59 = vpop.f32.mrf.mxu1  ;;  %6741 = vmatprep.subr.bf16.mxu0 %v7685_v37  ;;  %6763 = vmatprep.subr.bf16.mxu1 %v7686_v13  ;;  %v5124_v18 = vsub.s32 3, %v8210_v23  ;;  %v5117_v33 = vrot.slane %v5108_v26, %v8216_v25 }
 0x2e4   :  { %v3372_v41 = vpop.f32.mrf.mxu0  ;;  %v5113_v59 = vrot.slane %v5108_v26, %v8213_v24 }
 0x2e5   :  { %v3413_v4 = vpop.f32.mrf.mxu1  ;;  %6742 = vmatpush3.bf16.msra.mxu0 %v7687_v46 }
 0x2e6   :  { %6764 = vmatpush3.bf16.msra.mxu1 %v7688_v48  ;;  %6743 = vmatprep.subr.bf16.mxu0 %v7689_v43  ;;  %v5125_v48 = vrot.slane %v5108_v26, %v5124_v18 }
 0x2e7   :  { %6765 = vmatprep.subr.bf16.mxu1 %v7690_v29 }
 0x2e9   :  { %6744 = vmatpush3.bf16.msra.mxu0 %v7691_v22 }
 0x2ea   :  { %6766 = vmatpush3.bf16.msra.mxu1 %v7692_v31  ;;  %6745 = vmatprep.subr.bf16.mxu0 %v7693_v14 }
 0x2eb   :  { %6767 = vmatprep.subr.bf16.mxu1 %v7694_v7 }
 0x2ed   :  { %6746 = vmatpush3.bf16.msra.mxu0 %v7695_v61 }
 0x2ee   :  { %6768 = vmatpush3.bf16.msra.mxu1 %v7696_v51  ;;  %6747 = vmatprep.subr.bf16.mxu0 %v7697_v16 }
 0x2ef   :  { %6769 = vmatprep.subr.bf16.mxu1 %v7698_v12 }
 0x2f1   :  { %6748 = vmatpush3.bf16.msra.mxu0 %v7699_v36 }
 0x2f2   :  { %6770 = vmatpush3.bf16.msra.mxu1 %v7700_v52  ;;  %6749 = vmatprep.subr.bf16.mxu0 %v7701_v1 }
 0x2f3   :  { %6771 = vmatprep.subr.bf16.mxu1 %v7702_v27 }
 0x2f5   :  { %6750 = vmatpush3.bf16.msra.mxu0 %v7703_v28  ;;  %v6697_v28 = vld [vmem:[%s10034_s7] ss:$0 sm:$0xff]  ;;  %s7746_s7 = smov [#allocation3]  }
 0x2f6   :  { %6772 = vmatpush3.bf16.msra.mxu1 %v7704_v2  ;;  %6751 = vmatprep.subr.bf16.mxu0 %v7705_v3  ;;  %s5617_s30 = sshll.u32 %s7746_s7, 4  ;;  %s5618_s30 = int_to_ptr.vmem [resolvable:$true] %s5617_s30 }
 0x2f7   :  { %6773 = vmatprep.subr.bf16.mxu1 %v7706_v6  ;;  %s7725_s10 = scalar_lea.vmem %s5618_s30, 32  ;;  %p7726_p1 = scmp.lt.s32.totalorder %s5618_s30, %s5618_s30 }
 0x2f9   :  { %6752 = vmatpush3.bf16.msra.mxu0 %v7707_v8 }
 0x2fa   :  { %6774 = vmatpush3.bf16.msra.mxu1 %v7708_v9  ;;  %6753 = vmatprep.subr.bf16.mxu0 %v7709_v10 }
 0x2fb   :  { %6775 = vmatprep.subr.bf16.mxu1 %v7710_v53 }
 0x2fd   :  { %6754 = vmatpush3.bf16.msra.mxu0 %v7711_v47 }
 0x2fe   :  { %6776 = vmatpush3.bf16.msra.mxu1 %v7712_v50  ;;  %6792 = vmatprep.subr.bf16.mxu0 %v7744_v0 }
 0x31e   :  { %v3930_v15 = vpop.f32.mrf.mxu0 }
 0x31f   :  { %v3978_v60 = vadd.f32 %v3930_v15, %v3415_v35  ;;  %v3971_v19 = vpop.f32.mrf.mxu1 }
 0x320   :  { %v3980_v5 = vadd.f32 %v3971_v19, %v3417_v56  ;;  %v3932_v57 = vpop.f32.mrf.mxu0 }
 0x321   :  { %v3979_v45 = vadd.f32 %v3932_v57, %v3416_v34  ;;  %v3973_v63 = vpop.f32.mrf.mxu1 }
 0x322   :  { %v3981_v21 = vadd.f32 %v3973_v63, %v3418_v49  ;;  %v3934_v42 = vpop.f32.mrf.mxu0  ;;  %v5120_v49 = vsub.s32 2, %v8210_v23  ;;  %v7715_v63 = vld [vmem:[%s10031_s4 + $0x28] sm:$0xff]  }
 0x323   :  { %v3975_v62 = vpop.f32.mrf.mxu1  ;;  %v7717_v42 = vld [vmem:[%s10031_s4 + $0x18] sm:$0xff]  }
 0x324   :  { %v3935_v30 = vpop.f32.mrf.mxu0  ;;  %v5121_v4 = vrot.slane %v5108_v26, %v5120_v49  ;;  %v7718_v62 = vld [vmem:[%s10031_s4 + $0x10] sm:$0xff]  }
 0x325   :  { %v3976_v40 = vpop.f32.mrf.mxu1  ;;  %v7719_v30 = vld [vmem:[%s10031_s4 + $0x8] sm:$0xff]  }
 0x326   :  { %v7720_v40 = vld [vmem:[%s10031_s4] sm:$0xff]  }
 0x35e   :  { %v4493_v54 = vpop.f32.mrf.mxu0 }
 0x35f   :  { %v4541_v17 = vadd.f32 %v4493_v54, %v3978_v60  ;;  %v4534_v38 = vpop.f32.mrf.mxu1  ;;  %v7713_v60 = vld [vmem:[%s10031_s4 + $0x38] sm:$0xff]  }
 0x360   :  { %v4543_v39 = vadd.f32 %v4534_v38, %v3980_v5  ;;  %v4495_v20 = vpop.f32.mrf.mxu0 }
 0x361   :  { %v4536_v35 = vpop.f32.mrf.mxu1  ;;  %v4542_v55 = vadd.f32 %v4495_v20, %v3979_v45  ;;  %v7714_v45 = vld [vmem:[%s10031_s4 + $0x30] sm:$0xff]  }
 0x362   :  { %v4497_v58 = vpop.f32.mrf.mxu0  ;;  %v4544_v37 = vadd.f32 %v4536_v35, %v3981_v21  ;;  %v7716_v21 = vld [vmem:[%s10031_s4 + $0x20] sm:$0xff]  }
 0x363   :  { %v4538_v56 = vpop.f32.mrf.mxu1 }
 0x364   :  { %v4498_v32 = vpop.f32.mrf.mxu0 }
 0x365   :  { %v4539_v34 = vpop.f32.mrf.mxu1 }
 0x39e   :  { %v5056_v41 = vpop.f32.mrf.mxu0 }
 0x39f   :  { %v5104_v44 = vadd.f32 %v5056_v41, %v4541_v17  ;;  %v5097_v11 = vpop.f32.mrf.mxu1 }
 0x3a0   :  { %v5106_v13 = vadd.f32 %v5097_v11, %v4543_v39  ;;  %v5058_v46 = vpop.f32.mrf.mxu0 }
 0x3a1   :  { %v5130_v43 = vadd.f32 %v5113_v59, %v5104_v44  ;;  %v5105_v29 = vadd.f32 %v5058_v46, %v4542_v55  ;;  %v5099_v22 = vpop.f32.mrf.mxu1 }
 0x3a2   :  { %v5132_v31 = vadd.f32 %v5121_v4, %v5106_v13  ;;  %v5107_v14 = vadd.f32 %v5099_v22, %v4544_v37  ;;  %v5060_v7 = vpop.f32.mrf.mxu0 }
 0x3a3   :  { %v5131_v23 = vadd.f32 %v5117_v33, %v5105_v29  ;;  %v5101_v61 = vpop.f32.mrf.mxu1  ;;  %v5134_v24 = vmax.f32 %v5130_v43, 0.0 }
 0x3a4   :  { %v5133_v51 = vadd.f32 %v5125_v48, %v5107_v14  ;;  %v5061_v16 = vpop.f32.mrf.mxu0  ;;  %v5136_v12 = vmax.f32 %v5132_v31, 0.0 }
 0x3a5   :  { %v5135_v36 = vmax.f32 %v5131_v23, 0.0  ;;  %v5102_v52 = vpop.f32.mrf.mxu1  ;;  %v5138_v19 = vpack.c.bf16 %v5134_v24, %v5134_v24 }
 0x3a6   :  { %v5137_v15 = vmax.f32 %v5133_v51, 0.0  ;;  %v5140_v57 = vpack.c.bf16 %v5136_v12, %v5136_v12 }
 0x3a7   :  { %v5139_v25 = vpack.c.bf16 %v5135_v36, %v5135_v36 }
 0x3a8   :  { %v5141_v5 = vpack.c.bf16 %v5137_v15, %v5137_v15 }
 0x3a9   :  { %5437 = vmatprep.mubr.bf16.mxu0 %v5139_v25 }
 0x3aa   :  { %5477 = vmatprep.mubr.bf16.mxu1 %v5141_v5  ;;  %5438 = vmatmul.mubr.bf16.vlgmr.msra.gmra.mxu0 %v5138_v19 }
 0x3ab   :  { %5478 = vmatmul.mubr.bf16.vlgmr.msra.gmra.mxu1 %v5140_v57  ;;  %6793 = vmatpush3.bf16.msra.mxu0 %v7713_v60 }
 0x3ac   :  { %6794 = vmatprep.subr.bf16.mxu0 %v7744_v0  ;;  %6808 = vmatprep.mubr.msk.bf16.mxu0 %vm7745_vm3, %v7744_v0 }
 0x3af   :  { %6795 = vmatpush3.bf16.msra.mxu0 %v7714_v45 }
 0x3b0   :  { %6796 = vmatprep.subr.bf16.mxu0 %v7744_v0 }
 0x3b3   :  { %6797 = vmatpush3.bf16.msra.mxu0 %v7715_v63 }
 0x3b4   :  { %6798 = vmatprep.subr.bf16.mxu0 %v7744_v0 }
 0x3b7   :  { %6799 = vmatpush3.bf16.msra.mxu0 %v7716_v21 }
 0x3b8   :  { %6800 = vmatprep.subr.bf16.mxu0 %v7744_v0 }
 0x3bb   :  { %6801 = vmatpush3.bf16.msra.mxu0 %v7717_v42 }
 0x3bc   :  { %6802 = vmatprep.subr.bf16.mxu0 %v7744_v0 }
 0x3bf   :  { %6803 = vmatpush3.bf16.msra.mxu0 %v7718_v62 }
 0x3c0   :  { %6804 = vmatprep.subr.bf16.mxu0 %v7744_v0 }
 0x3c3   :  { %6805 = vmatpush3.bf16.msra.mxu0 %v7719_v30 }
 0x3c4   :  { %6806 = vmatprep.subr.bf16.mxu0 %v7744_v0  ;;  %v6730_v0 = vld [vmem:[%s10035_s8] ss:$0 sm:$0xff]  ;;  %s7721_s8 = scalar_lea.vmem %s5618_s30, 16 }
 0x3c5   :  { %p7722_p0 = scmp.ne.s32.totalorder %s5618_s30, %s7721_s8  ;;  %p7727_p2 = scmp.lt.s32.totalorder %s7725_s10, %s7721_s8 }
 0x3c7   :  { %6807 = vmatpush3.bf16.msra.mxu0 %v7720_v40  ;;  %p7728_p3 = por %p7727_p2, %p7726_p1 }
 0x3c9   :  { %p7729_p4 = pnand %p7728_p3, %p7722_p0 }
 0x46a   :  { %v6755_v1 = vpop.f32.mrf.mxu0 }
 0x46b   :  { %v6777_v27 = vpop.f32.mrf.mxu1 }
 0x46c   :  { %v6756_v2 = vpop.f32.mrf.mxu0 }
 0x46d   :  { %v6757_v3 = vadd.f32 %v6756_v2, %v6755_v1  ;;  %v6778_v6 = vpop.f32.mrf.mxu1 }
 0x46e   :  { %v6758_v8 = vpop.f32.mrf.mxu0  ;;  %v6779_v10 = vadd.f32 %v6778_v6, %v6777_v27 }
 0x46f   :  { %v5440_v9 = vadd.f32 %v6757_v3, %v6697_v28  ;;  %v6780_v53 = vpop.f32.mrf.mxu1 }
 0x470   :  { %v6759_v47 = vpop.f32.mrf.mxu0 }
 0x471   :  { %v5480_v50 = vadd.f32 %v6779_v10, %v5440_v9  ;;  %v6781_v54 = vpop.f32.mrf.mxu1 }
 0x473   :  { %v5485_v17 = vmax.f32 %v5480_v50, 0.0 }
 0x475   :  { %v5486_v38 = vpack.c.bf16 %v5485_v17, %v5485_v17 }
 0x477   :  { %6809 = vmatmul.mubr.bf16.vlgmr.msra.gmra.mxu0 %v5486_v38 }
 0x537   :  { %v5592_v39 = vpop.f32.mrf.mxu0 }
 0x538   :  { %v5593_v20 = vadd.f32 %v6730_v0, %v5592_v39 }
 0x539   :  { %v6810_v35 = vpop.f32.mrf.mxu0 }
 0x53a   :  { %v5598_v58 = vmax.f32 %v5593_v20, 0.0 }
 0x53b   :  { %v5595_v56 = vpop.f32.mrf.mxu0 }
 0x53c   :  { %v5600_v32 = vsel %vm5599_vm4, %v5598_v58, 0.0 }
 0x53d   :  { %v5601_v34 = vrot.slane %v5600_v32, 4  ;;  %v6811_v26 = vpop.f32.mrf.mxu0 }
 0x53f   :  { %v5602_v49 = vadd.f32 %v5601_v34, %v5600_v32 }
 0x541   :  { %v5603_v18 = vrot.slane %v5602_v49, 2 }
 0x543   :  { %v5604_v59 = vadd.f32 %v5603_v18, %v5602_v49 }
 0x545   :  { %v5605_v41 = vrot.slane %v5604_v59, 1 }
 0x547   :  { %v5606_v4 = vadd.f32 %v5605_v41, %v5604_v59 }
 0x549   :  { %v5608_v55 = vmul.f32 0.25, %v5606_v4 }
 0x54b   :  { %5610 = vst.msk [vmem:[#allocation3] sm:$0x1] %vm5609_vm5, %v5608_v55 }
 0x54c   :  { %7732 = shalt.err (!%p7729_p4)
}
 0x54d   :  { %5620 = dma.vmem_to_hbm [thread:$0]  %s5618_s30, 16, %s10036_s9, [#allocation4]  }
 0x54e   :  { %7741 = dma.done.wait [#allocation4], 16  }
 0x54f   :  { %7742 = vsyncadd [#allocation4], 4294967280 }
 0x550   :  { %5624 = vsyncpa [#allocation4], 1 }

</bundles_post_ra>
